<compile_context>
chip_gen: v7x
topology: tpu7x:2x2x1
jax: 0.10.0
libtpu: 0.0.40
codegen_flags: <defaults>
</compile_context>

<pallas_src>
import math
import numpy as np

import jax
import jax.numpy as jnp
from jax import lax
from jax.experimental import pallas as pl
from jax.experimental.pallas import tpu as pltpu

WINDOW_SIZE = 11
SIGMA = 1.5
CHANNEL = 3
C1 = 0.01 ** 2
C2 = 0.03 ** 2


def _gauss_1d(window_size, sigma):
    g = np.array(
        [math.exp(-((x - window_size // 2) ** 2) / float(2 * sigma ** 2))
         for x in range(window_size)],
        dtype=np.float64,
    )
    g = g / g.sum()
    return g.astype(np.float32)


def _band_matrix(n, g):
    """(n, n) banded Toeplitz matrix B with B[k, j] = g[k - j + pad] (band
    clipped at the edges == zero padding).  Then `row @ B` is the zero-padded
    'same' 1-D Gaussian convolution of `row`.  g is symmetric, so B == B.T and
    the same matrix serves the column pass (left multiplication)."""
    k = len(g)
    pad = k // 2
    m = np.zeros((n, n), dtype=np.float32)
    for d in range(-pad, pad + 1):
        js = np.arange(max(0, -d), n - max(0, d))
        m[js + d, js] = g[d + pad]
    return m


def _make_ssim_kernel(P, H, W, n_valid_planes, n_total_planes):
    """Kernel processing P planes per grid step.  Planes >= n_valid_planes are
    zero-padding added by the wrapper and are masked out of the nanmean."""
    G = 5 * P  # five stacked filter inputs per plane

    def kernel(a_ref, b_ref, gw_ref, gh_ref, sum_ref, cnt_ref):
        a = a_ref[...].astype(jnp.float32)      # (P, H, W)
        b = b_ref[...].astype(jnp.float32)      # (P, H, W)
        gw = gw_ref[...]                        # (W, W) band matrix
        gh = gh_ref[...]                        # (H, H) band matrix

        # Stack the five filter inputs so both separable passes are shared.
        stack = jnp.concatenate([a, b, a * a, b * b, a * b], axis=0)  # (5P,H,W)

        # Pass 1: Gaussian conv along W as a matmul on the MXU.
        if H % 8 == 0:
            # One big (5P*H, W) @ (W, W) matmul (layout-trivial reshape).
            r = jnp.dot(
                stack.reshape(G * H, W), gw,
                preferred_element_type=jnp.float32,
                precision=lax.Precision.HIGHEST,
            ).reshape(G, H, W)
        else:
            # Batched fallback for awkward H (no reshape across tiles).
            gw_b = jnp.broadcast_to(gw, (G, W, W))
            r = jnp.einsum(
                'ghw,gwv->ghv', stack, gw_b,
                preferred_element_type=jnp.float32,
                precision=lax.Precision.HIGHEST,
            )

        # Pass 2: Gaussian conv along H as a batched (H,H) @ (H,W) matmul.
        gh_b = jnp.broadcast_to(gh, (G, H, H))
        y = jnp.einsum(
            'gim,gmw->giw', gh_b, r,
            preferred_element_type=jnp.float32,
            precision=lax.Precision.HIGHEST,
        )                                        # (5P, H, W)

        mu1 = y[0:P]
        mu2 = y[P:2 * P]
        e_a2 = y[2 * P:3 * P]
        e_b2 = y[3 * P:4 * P]
        e_ab = y[4 * P:5 * P]

        mu1_sq = mu1 * mu1
        mu2_sq = mu2 * mu2
        mu12 = mu1 * mu2
        sigma1_sq = e_a2 - mu1_sq
        sigma2_sq = e_b2 - mu2_sq
        sigma12 = e_ab - mu12

        numerator = (2.0 * mu12 + C1) * (2.0 * sigma12 + C2)
        denominator = (mu1_sq + mu2_sq + C1) * (sigma1_sq + sigma2_sq + C2)
        ssim_map = numerator / denominator       # (P, H, W)

        # nanmean bookkeeping (NaN != NaN).
        valid = ssim_map == ssim_map
        if n_valid_planes != n_total_planes:
            # Mask out the zero-filled planes appended by the wrapper.
            gp = (pl.program_id(0) * P
                  + lax.broadcasted_iota(jnp.int32, (P, H, W), 0))
            valid = jnp.logical_and(valid, gp < n_valid_planes)

        s = jnp.sum(jnp.where(valid, ssim_map, 0.0))
        c = jnp.sum(valid.astype(jnp.float32))

        # Per-step partial results (parallel-safe; reduced in the wrapper).
        sum_ref[...] = jnp.zeros((1, 8, 128), jnp.float32) + s
        cnt_ref[...] = jnp.zeros((1, 8, 128), jnp.float32) + c

    return kernel


def ssim_pallas(A, B, window_size=WINDOW_SIZE, sigma=SIGMA,
                planes_per_step=None):
    """SSIM score of two NCHW image batches, matching the PyTorch module."""
    Bn, C, H, W = A.shape
    assert B.shape == A.shape
    N = Bn * C

    a = A.reshape(N, H, W).astype(jnp.float32)
    b = B.reshape(N, H, W).astype(jnp.float32)

    if planes_per_step is None:
        planes_per_step = N if N <= 16 else 16
    P = max(1, min(planes_per_step, N))
    steps = pl.cdiv(N, P)
    n_pad = steps * P - N
    if n_pad:
        pad_cfg = ((0, n_pad), (0, 0), (0, 0))
        a = jnp.pad(a, pad_cfg)
        b = jnp.pad(b, pad_cfg)

    g = _gauss_1d(window_size, sigma)
    gw = jnp.asarray(_band_matrix(W, g))   # (W, W)
    gh = jnp.asarray(_band_matrix(H, g))   # (H, H)

    kernel = _make_ssim_kernel(P, H, W, N, steps * P)

    img_spec = pl.BlockSpec((P, H, W), lambda i: (i, 0, 0))
    gw_spec = pl.BlockSpec((W, W), lambda i: (0, 0))
    gh_spec = pl.BlockSpec((H, H), lambda i: (0, 0))
    part_spec = pl.BlockSpec((1, 8, 128), lambda i: (i, 0, 0))

    sums, cnts = pl.pallas_call(
        kernel,
        out_shape=(jax.ShapeDtypeStruct((steps, 8, 128), jnp.float32),
                   jax.ShapeDtypeStruct((steps, 8, 128), jnp.float32)),
        grid_spec=pltpu.PrefetchScalarGridSpec(
            num_scalar_prefetch=0,
            grid=(steps,),
            in_specs=[img_spec, img_spec, gw_spec, gh_spec],
            out_specs=(part_spec, part_spec),
        ),
        compiler_params=pltpu.CompilerParams(
            dimension_semantics=("parallel",)),
    )(a, b, gw, gh)

    return jnp.sum(sums[:, 0, 0]) / jnp.sum(cnts[:, 0, 0])


def _ssim_reference(A, B, window_size=WINDOW_SIZE, sigma=SIGMA):
    """Pure-JAX reference mirroring the PyTorch forward (for validation)."""
    g = jnp.asarray(_gauss_1d(window_size, sigma))
    w2d = jnp.outer(g, g)
    C = A.shape[1]
    w = jnp.broadcast_to(w2d, (C, 1, window_size, window_size))
    pad = window_size // 2

    def conv(x):
        return lax.conv_general_dilated(
            x, w, window_strides=(1, 1), padding=[(pad, pad), (pad, pad)],
            dimension_numbers=("NCHW", "OIHW", "NCHW"), feature_group_count=C,
            precision=lax.Precision.HIGHEST)

    mu1, mu2 = conv(A), conv(B)
    mu1_sq, mu2_sq, mu12 = mu1 * mu1, mu2 * mu2, mu1 * mu2
    s1 = conv(A * A) - mu1_sq
    s2 = conv(B * B) - mu2_sq
    s12 = conv(A * B) - mu12
    num = (2 * mu12 + C1) * (2 * s12 + C2)
    den = (mu1_sq + mu2_sq + C1) * (s1 + s2 + C2)
    return jnp.nanmean(num / den)


if __name__ == "__main__":
    key = jax.random.PRNGKey(0)
    k1, k2 = jax.random.split(key)
    # small NCHW image batches (channel=3 matches the module default)
    A = jax.random.uniform(k1, (2, CHANNEL, 16, 16), dtype=jnp.float32)
    B = jax.random.uniform(k2, (2, CHANNEL, 16, 16), dtype=jnp.float32)

    score = jax.block_until_ready(ssim_pallas(A, B))
    ref = jax.block_until_ready(_ssim_reference(A, B))
    assert np.allclose(np.asarray(score), np.asarray(ref),
                       rtol=1e-3, atol=1e-5), f"pallas={score} ref={ref}"
    print("KERNEL_OK")
</pallas_src>

<mosaic_0001>
module attributes {stable_mosaic.version = 11 : i64} {
  func.func @kernel(%arg0: i32, %arg1: memref<6x16x16xf32, #tpu.memory_space<vmem>>, %arg2: memref<6x16x16xf32, #tpu.memory_space<vmem>>, %arg3: memref<16x16xf32, #tpu.memory_space<vmem>>, %arg4: memref<16x16xf32, #tpu.memory_space<vmem>>, %arg5: memref<1x8x128xf32, #tpu.memory_space<vmem>>, %arg6: memref<1x8x128xf32, #tpu.memory_space<vmem>>) attributes {dimension_semantics = [#tpu.dimension_semantics<parallel>], iteration_bounds = array<i64: 1>, scalar_prefetch = 0 : i64, scratch_operands = 0 : i64, tpu.core_type = #tpu.core_type<tc>, window_params = [{transform_indices = @transform_0, window_bounds = array<i64: 6, 16, 16>}, {transform_indices = @transform_1, window_bounds = array<i64: 6, 16, 16>}, {pipeline_mode = #tpu.pipeline_mode<synchronous>, transform_indices = @transform_2, window_bounds = array<i64: 16, 16>}, {pipeline_mode = #tpu.pipeline_mode<synchronous>, transform_indices = @transform_3, window_bounds = array<i64: 16, 16>}, {transform_indices = @transform_4, window_bounds = array<i64: 1, 8, 128>}, {transform_indices = @transform_5, window_bounds = array<i64: 1, 8, 128>}]} {
    %c0 = arith.constant 0 : index
    %c0_0 = arith.constant 0 : index
    %c0_1 = arith.constant 0 : index
    %0 = vector.load %arg1[%c0, %c0_0, %c0_1] : memref<6x16x16xf32, #tpu.memory_space<vmem>>, vector<6x16x16xf32>
    %c0_2 = arith.constant 0 : index
    %c0_3 = arith.constant 0 : index
    %c0_4 = arith.constant 0 : index
    %1 = vector.load %arg2[%c0_2, %c0_3, %c0_4] : memref<6x16x16xf32, #tpu.memory_space<vmem>>, vector<6x16x16xf32>
    %c0_5 = arith.constant 0 : index
    %c0_6 = arith.constant 0 : index
    %2 = vector.load %arg3[%c0_5, %c0_6] : memref<16x16xf32, #tpu.memory_space<vmem>>, vector<16x16xf32>
    %c0_7 = arith.constant 0 : index
    %c0_8 = arith.constant 0 : index
    %3 = vector.load %arg4[%c0_7, %c0_8] : memref<16x16xf32, #tpu.memory_space<vmem>>, vector<16x16xf32>
    %4 = arith.mulf %0, %0 : vector<6x16x16xf32>
    %5 = arith.mulf %1, %1 : vector<6x16x16xf32>
    %6 = arith.mulf %0, %1 : vector<6x16x16xf32>
    %7 = tpu.concatenate %0, %1, %4, %5, %6 in 0 : vector<6x16x16xf32>, vector<6x16x16xf32>, vector<6x16x16xf32>, vector<6x16x16xf32>, vector<6x16x16xf32> -> vector<30x16x16xf32>
    %8 = vector.shape_cast %7 : vector<30x16x16xf32> to vector<480x16xf32>
    %cst = arith.constant dense<0.000000e+00> : vector<480x16xf32>
    %9 = tpu.matmul %8, %2, %cst {dimension_numbers = #tpu.dot_dimension_numbers<[1], [0], [0], [1], [0, 0, 1, 1], [], []>, precision = #tpu.contract_precision<fp32>} : vector<480x16xf32>, vector<16x16xf32>, vector<480x16xf32> -> vector<480x16xf32>
    %10 = vector.shape_cast %9 : vector<480x16xf32> to vector<30x16x16xf32>
    %11 = vector.shape_cast %3 : vector<16x16xf32> to vector<1x16x16xf32>
    %12 = vector.broadcast %11 : vector<1x16x16xf32> to vector<30x16x16xf32>
    "tpu.trace_start"() <{level = 10 : i32, message = "gim,gmw->giw"}> : () -> ()
    %cst_9 = arith.constant dense<0.000000e+00> : vector<30x16x16xf32>
    %13 = tpu.matmul %12, %10, %cst_9 {dimension_numbers = #tpu.dot_dimension_numbers<[2], [1], [1], [2], [0, 0, 0, 1, 1, 2], [0], [0]>, precision = #tpu.contract_precision<fp32>} : vector<30x16x16xf32>, vector<30x16x16xf32>, vector<30x16x16xf32> -> vector<30x16x16xf32>
    "tpu.trace_stop"() : () -> ()
    %14 = vector.extract_strided_slice %13 {offsets = [0, 0, 0], sizes = [6, 16, 16], strides = [1, 1, 1]} : vector<30x16x16xf32> to vector<6x16x16xf32>
    %15 = vector.extract_strided_slice %13 {offsets = [6, 0, 0], sizes = [6, 16, 16], strides = [1, 1, 1]} : vector<30x16x16xf32> to vector<6x16x16xf32>
    %16 = vector.extract_strided_slice %13 {offsets = [12, 0, 0], sizes = [6, 16, 16], strides = [1, 1, 1]} : vector<30x16x16xf32> to vector<6x16x16xf32>
    %17 = vector.extract_strided_slice %13 {offsets = [18, 0, 0], sizes = [6, 16, 16], strides = [1, 1, 1]} : vector<30x16x16xf32> to vector<6x16x16xf32>
    %18 = vector.extract_strided_slice %13 {offsets = [24, 0, 0], sizes = [6, 16, 16], strides = [1, 1, 1]} : vector<30x16x16xf32> to vector<6x16x16xf32>
    %19 = arith.mulf %14, %14 : vector<6x16x16xf32>
    %20 = arith.mulf %15, %15 : vector<6x16x16xf32>
    %21 = arith.mulf %14, %15 : vector<6x16x16xf32>
    %22 = arith.subf %16, %19 : vector<6x16x16xf32>
    %23 = arith.subf %17, %20 : vector<6x16x16xf32>
    %24 = arith.subf %18, %21 : vector<6x16x16xf32>
    %cst_10 = arith.constant 2.000000e+00 : f32
    %25 = vector.broadcast %cst_10 : f32 to vector<6x16x16xf32>
    %26 = arith.mulf %25, %21 : vector<6x16x16xf32>
    %cst_11 = arith.constant 9.99999974E-5 : f32
    %27 = vector.broadcast %cst_11 : f32 to vector<6x16x16xf32>
    %28 = arith.addf %26, %27 : vector<6x16x16xf32>
    %cst_12 = arith.constant 2.000000e+00 : f32
    %29 = vector.broadcast %cst_12 : f32 to vector<6x16x16xf32>
    %30 = arith.mulf %29, %24 : vector<6x16x16xf32>
    %cst_13 = arith.constant 8.99999984E-4 : f32
    %31 = vector.broadcast %cst_13 : f32 to vector<6x16x16xf32>
    %32 = arith.addf %30, %31 : vector<6x16x16xf32>
    %33 = arith.mulf %28, %32 : vector<6x16x16xf32>
    %34 = arith.addf %19, %20 : vector<6x16x16xf32>
    %cst_14 = arith.constant 9.99999974E-5 : f32
    %35 = vector.broadcast %cst_14 : f32 to vector<6x16x16xf32>
    %36 = arith.addf %34, %35 : vector<6x16x16xf32>
    %37 = arith.addf %22, %23 : vector<6x16x16xf32>
    %cst_15 = arith.constant 8.99999984E-4 : f32
    %38 = vector.broadcast %cst_15 : f32 to vector<6x16x16xf32>
    %39 = arith.addf %37, %38 : vector<6x16x16xf32>
    %40 = arith.mulf %36, %39 : vector<6x16x16xf32>
    %41 = arith.divf %33, %40 : vector<6x16x16xf32>
    %42 = arith.cmpf oeq, %41, %41 : vector<6x16x16xf32>
    %cst_16 = arith.constant 0.000000e+00 : f32
    %43 = vector.broadcast %cst_16 : f32 to vector<6x16x16xf32>
    %44 = arith.select %42, %41, %43 : vector<6x16x16xi1>, vector<6x16x16xf32>
    %45 = vector.shape_cast %44 : vector<6x16x16xf32> to vector<1x6x16x16xf32>
    %cst_17 = arith.constant dense<0.000000e+00> : vector<1xf32>
    %46 = vector.multi_reduction <add>, %45, %cst_17 [1, 2, 3] : vector<1x6x16x16xf32> to vector<1xf32>
    %47 = vector.shape_cast %46 : vector<1xf32> to vector<1x1x1x1xf32>
    %48 = vector.extract %47[0, 0, 0, 0] : f32 from vector<1x1x1x1xf32>
    %49 = arith.extui %42 : vector<6x16x16xi1> to vector<6x16x16xi32>
    %50 = arith.sitofp %49 : vector<6x16x16xi32> to vector<6x16x16xf32>
    %51 = vector.shape_cast %50 : vector<6x16x16xf32> to vector<1x6x16x16xf32>
    %cst_18 = arith.constant dense<0.000000e+00> : vector<1xf32>
    %52 = vector.multi_reduction <add>, %51, %cst_18 [1, 2, 3] : vector<1x6x16x16xf32> to vector<1xf32>
    %53 = vector.shape_cast %52 : vector<1xf32> to vector<1x1x1x1xf32>
    %54 = vector.extract %53[0, 0, 0, 0] : f32 from vector<1x1x1x1xf32>
    %cst_19 = arith.constant 0.000000e+00 : f32
    %55 = vector.broadcast %cst_19 : f32 to vector<1x8x128xf32>
    %56 = vector.broadcast %48 : f32 to vector<1x8x128xf32>
    %57 = arith.addf %55, %56 : vector<1x8x128xf32>
    %c0_20 = arith.constant 0 : index
    %c0_21 = arith.constant 0 : index
    %c0_22 = arith.constant 0 : index
    %58 = vector.load %arg5[%c0_20, %c0_21, %c0_22] : memref<1x8x128xf32, #tpu.memory_space<vmem>>, vector<1x8x128xf32>
    tpu.vector_store %arg5[%c0_20, %c0_21, %c0_22], %57 {strides = array<i32>} : memref<1x8x128xf32, #tpu.memory_space<vmem>>, vector<1x8x128xf32>,
    %cst_23 = arith.constant 0.000000e+00 : f32
    %59 = vector.broadcast %cst_23 : f32 to vector<1x8x128xf32>
    %60 = vector.broadcast %54 : f32 to vector<1x8x128xf32>
    %61 = arith.addf %59, %60 : vector<1x8x128xf32>
    %c0_24 = arith.constant 0 : index
    %c0_25 = arith.constant 0 : index
    %c0_26 = arith.constant 0 : index
    %62 = vector.load %arg6[%c0_24, %c0_25, %c0_26] : memref<1x8x128xf32, #tpu.memory_space<vmem>>, vector<1x8x128xf32>
    tpu.vector_store %arg6[%c0_24, %c0_25, %c0_26], %61 {strides = array<i32>} : memref<1x8x128xf32, #tpu.memory_space<vmem>>, vector<1x8x128xf32>,
    return
  }
  func.func @transform_0(%arg0: i32) -> (i32, i32, i32) {
    %c0_i32 = arith.constant 0 : i32
    %c0_i32_0 = arith.constant 0 : i32
    %c0_i32_1 = arith.constant 0 : i32
    return %arg0, %c0_i32, %c0_i32_0 : i32, i32, i32
  }
  func.func @transform_1(%arg0: i32) -> (i32, i32, i32) {
    %c0_i32 = arith.constant 0 : i32
    %c0_i32_0 = arith.constant 0 : i32
    %c0_i32_1 = arith.constant 0 : i32
    return %arg0, %c0_i32, %c0_i32_0 : i32, i32, i32
  }
  func.func @transform_2(%arg0: i32) -> (i32, i32) {
    %c0_i32 = arith.constant 0 : i32
    %c0_i32_0 = arith.constant 0 : i32
    %c0_i32_1 = arith.constant 0 : i32
    return %c0_i32, %c0_i32_0 : i32, i32
  }
  func.func @transform_3(%arg0: i32) -> (i32, i32) {
    %c0_i32 = arith.constant 0 : i32
    %c0_i32_0 = arith.constant 0 : i32
    %c0_i32_1 = arith.constant 0 : i32
    return %c0_i32, %c0_i32_0 : i32, i32
  }
  func.func @transform_4(%arg0: i32) -> (i32, i32, i32) {
    %c0_i32 = arith.constant 0 : i32
    %c0_i32_0 = arith.constant 0 : i32
    %c0_i32_1 = arith.constant 0 : i32
    return %arg0, %c0_i32, %c0_i32_0 : i32, i32, i32
  }
  func.func @transform_5(%arg0: i32) -> (i32, i32, i32) {
    %c0_i32 = arith.constant 0 : i32
    %c0_i32_0 = arith.constant 0 : i32
    %c0_i32_1 = arith.constant 0 : i32
    return %arg0, %c0_i32, %c0_i32_0 : i32, i32, i32
  }
}

</mosaic_0001>

<bundles_post_ra>
// kernel: tpu_custom_call.1
= control target key start
LH: loop header
LB: loop body
LE: loop exit
PB: predicated region body
PF: predicated region fallthrough
CT: control target
= control target key end

     0   :  { %11 = vsyncpa [#allocation3], 0  ;;  %s25839_s0 = inlined_call_operand.hbm [shape: f32[6,16,16], index: 0, kind: input, shape index: {}]   ;;  %s25840_s1 = inlined_call_operand.hbm [shape: f32[6,16,16], index: 1, kind: input, shape index: {}]   ;;  %s25841_s2 = inlined_call_operand.hbm [shape: f32[16,16], index: 2, kind: input, shape index: {}]   ;;  %s25842_s3 = inlined_call_operand.hbm [shape: f32[16,16], index: 3, kind: input, shape index: {}]   ;;  %s25843_s4 = inlined_call_operand.hbm [shape: f32[1,8,128], index: 4, kind: output, shape index: {0}]   ;;  %s25844_s5 = inlined_call_operand.hbm [shape: f32[1,8,128], index: 5, kind: output, shape index: {1}]  }
   0x1   :  { %12 = vsyncpa [#allocation6], 0 }
   0x2   :  { %13 = vsyncpa [#allocation9], 0 }
   0x3   :  { %14 = vsyncpa [#allocation4], 0 }
   0x4   :  { %15 = vsyncpa [#allocation12], 0  ;;  %s23199_s18 = smov [#allocation5]   ;;  %s23200_s20 = smov [#allocation2]  }
   0x5   :  { %s33_s19 = sshll.u32 %s23199_s18, 4  ;;  %s21_s21 = sshll.u32 %s23200_s20, 4  ;;  %s34_s19 = int_to_ptr.vmem [resolvable:$true] %s33_s19  ;;  %s23238_s21 = int_to_ptr.vmem [resolvable:$true] %s21_s21 }
   0x6   :  { %s23057_s24 = scalar_lea.hbm %s25840_s1, 1536 }
   0x7   :  { %p23058_p0 = scmp.ne.s32.totalorder %s25840_s1, %s23057_s24  ;;  %p23061_p1 = scmp.lt.u32.totalorder %s23057_s24, %s25840_s1 }
   0x9   :  { %p23063_p2 = pnand %p23061_p1, %p23058_p0 }
   0xb   :  { %23066 = shalt.err (!%p23063_p2)
}
   0xc   :  { %s23067_s29 = scalar_lea.vmem %s34_s19, 1536  ;;  %p23072_p4 = scmp.lt.s32.totalorder %s34_s19, %s34_s19 }
   0xd   :  { %p23068_p3 = scmp.ne.s32.totalorder %s34_s19, %s23067_s29  ;;  %p23073_p5 = scmp.lt.s32.totalorder %s23067_s29, %s23067_s29 }
   0xf   :  { %p23074_p6 = por %p23073_p5, %p23072_p4 }
  0x11   :  { %p23075_p7 = pnand %p23074_p6, %p23068_p3 }
  0x13   :  { %23078 = shalt.err (!%p23075_p7)
}
  0x14   :  { %s23201_s30 = smov 128   ;;  %s23202_s6 = smov 8  }
  0x15   :  { %39 = dma.hbm_to_vmem [thread:$0]  %s25840_s1, 1536, %s34_s19, [#allocation6], %s23201_s30, %s23201_s30, %s23202_s6  }
  0x16   :  { %s23079_s11 = scalar_lea.hbm %s25839_s0, 1536 }
  0x17   :  { %p23080_p8 = scmp.ne.s32.totalorder %s25839_s0, %s23079_s11  ;;  %p23083_p9 = scmp.lt.u32.totalorder %s23079_s11, %s25839_s0 }
  0x19   :  { %p23085_p10 = pnand %p23083_p9, %p23080_p8 }
  0x1b   :  { %23088 = shalt.err (!%p23085_p10)
}
  0x1c   :  { %s23089_s16 = scalar_lea.vmem %s23238_s21, 1536  ;;  %p23094_p12 = scmp.lt.s32.totalorder %s23238_s21, %s23238_s21 }
  0x1d   :  { %p23090_p11 = scmp.ne.s32.totalorder %s23238_s21, %s23089_s16  ;;  %p23095_p13 = scmp.lt.s32.totalorder %s23089_s16, %s23089_s16 }
  0x1f   :  { %p23096_p0 = por %p23095_p13, %p23094_p12 }
  0x21   :  { %p23097_p1 = pnand %p23096_p0, %p23090_p11 }
  0x23   :  { %23100 = shalt.err (!%p23097_p1)
}
  0x24   :  { %27 = dma.hbm_to_vmem [thread:$0]  %s25839_s0, 1536, %s23238_s21, [#allocation3], %s23201_s30, %s23201_s30, %s23202_s6  }
  0x25   :  { %s23203_s18 = smov [#allocation7]   ;;  %s23204_s20 = smov [#allocation8]  }
  0x26   :  { %s45_s19 = sshll.u32 %s23203_s18, 4  ;;  %s57_s22 = sshll.u32 %s23204_s20, 4  ;;  %s46_s19 = int_to_ptr.vmem [resolvable:$true] %s45_s19  ;;  %s23275_s22 = int_to_ptr.vmem [resolvable:$true] %s57_s22 }
  0x27   :  { %s23101_s25 = scalar_lea.hbm %s25841_s2, 256 }
  0x28   :  { %p23102_p2 = scmp.ne.s32.totalorder %s25841_s2, %s23101_s25  ;;  %p23105_p3 = scmp.lt.u32.totalorder %s23101_s25, %s25841_s2 }
  0x2a   :  { %p23107_p4 = pnand %p23105_p3, %p23102_p2 }
  0x2c   :  { %23110 = shalt.err (!%p23107_p4)
}
  0x2d   :  { %s23111_s0 = scalar_lea.vmem %s46_s19, 256  ;;  %p23116_p6 = scmp.lt.s32.totalorder %s46_s19, %s46_s19 }
  0x2e   :  { %p23112_p5 = scmp.ne.s32.totalorder %s46_s19, %s23111_s0  ;;  %p23117_p7 = scmp.lt.s32.totalorder %s23111_s0, %s23111_s0 }
  0x30   :  { %p23118_p8 = por %p23117_p7, %p23116_p6 }
  0x32   :  { %p23119_p9 = pnand %p23118_p8, %p23112_p5 }
  0x34   :  { %23122 = shalt.err (!%p23119_p9)
}
  0x35   :  { %51 = dma.hbm_to_vmem [thread:$0]  %s25841_s2, 256, %s46_s19, [#allocation6], %s23201_s30, %s23201_s30, %s23202_s6  }
  0x36   :  { %s23123_s10 = scalar_lea.hbm %s25842_s3, 256 }
  0x37   :  { %p23124_p10 = scmp.ne.s32.totalorder %s25842_s3, %s23123_s10  ;;  %p23127_p11 = scmp.lt.u32.totalorder %s23123_s10, %s25842_s3 }
  0x39   :  { %p23129_p12 = pnand %p23127_p11, %p23124_p10 }
  0x3b   :  { %23132 = shalt.err (!%p23129_p12)
}
  0x3c   :  { %s23133_s15 = scalar_lea.vmem %s23275_s22, 256  ;;  %p23138_p0 = scmp.lt.s32.totalorder %s23275_s22, %s23275_s22 }
  0x3d   :  { %p23134_p13 = scmp.ne.s32.totalorder %s23275_s22, %s23133_s15  ;;  %p23139_p1 = scmp.lt.s32.totalorder %s23133_s15, %s23133_s15 }
  0x3f   :  { %p23140_p2 = por %p23139_p1, %p23138_p0 }
  0x41   :  { %p23141_p3 = pnand %p23140_p2, %p23134_p13 }
  0x43   :  { %23144 = shalt.err (!%p23141_p3)
}
  0x44   :  { %63 = dma.hbm_to_vmem [thread:$0]  %s25842_s3, 256, %s23275_s22, [#allocation9], %s23201_s30, %s23201_s30, %s23202_s6  }
  0x45   :  { %23189 = dma.done.wait [#allocation3], 1536  }
  0x46   :  { %23190 = vsyncadd [#allocation3], 4294965760 }
  0x47   :  { %23191 = dma.done.wait [#allocation6], 1792  }
  0x48   :  { %23192 = vsyncadd [#allocation6], 4294965504 }
  0x49   :  { %23193 = dma.done.wait [#allocation9], 256  }
  0x4a   :  { %23194 = vsyncadd [#allocation9], 4294967040  ;;  %vm140_vm0 = vcmask 130048   ;;  %v100_v0 = vld [vmem:[#allocation7] sm:$0xff]  ;;  %v101_v1 = vld [vmem:[#allocation7 + $0x8] sm:$0xff]  ;;  %s23206_s3 = smov [#allocation10]  }
  0x4b   :  { %v23312_v2 = vld [vmem:[#allocation2] sm:$0xff]  ;;  %v322_v3 = vand.u32 4294901760, %v100_v0  ;;  %v325_v4 = vand.u32 4294901760, %v101_v1  ;;  %v23318_v7 = vld [vmem:[#allocation2 + $0x8] sm:$0xff]  ;;  %v23320_v8 = vld [vmem:[#allocation2 + $0x10] sm:$0xff]  ;;  %s18723_s30 = sshll.u32 %s23206_s3, 4  ;;  %s18724_s30 = int_to_ptr.vmem [resolvable:$true] %s18723_s30 }
  0x4c   :  { %v23314_v5 = vld [vmem:[#allocation5] sm:$0xff]  ;;  %v142_v6 = vsel %vm140_vm0, %v23312_v2, 0  ;;  %v145_v11 = vsel %vm140_vm0, %v23318_v7, 0  ;;  %v148_v12 = vsel %vm140_vm0, %v23320_v8, 0  ;;  %v23332_v13 = vld [vmem:[#allocation2 + $0x18] sm:$0xff]  ;;  %v23336_v15 = vld [vmem:[#allocation2 + $0x28] sm:$0xff]  ;;  %p23150_p5 = scmp.lt.s32.totalorder %s18724_s30, %s18724_s30 }
  0x4d   :  { %v23324_v9 = vmul.f32 %v23314_v5, %v23312_v2  ;;  %v23326_v10 = vand.u32 4294901760, %v142_v6  ;;  %v23334_v14 = vld [vmem:[#allocation2 + $0x20] sm:$0xff]  ;;  %v23338_v16 = vpack.c.bf16 %v325_v4, %v322_v3  ;;  %v23340_v17 = vand.u32 4294901760, %v145_v11  ;;  %v23401_v44 = vld [vmem:[#allocation2 + $0x30] sm:$0xff]  ;;  %v23403_v45 = vld [vmem:[#allocation2 + $0x38] sm:$0xff]  ;;  %s23207_s1 = smov [#allocation11]  }
  0x4e   :  { %v23342_v18 = vand.u32 4294901760, %v148_v12  ;;  %v151_v19 = vsel %vm140_vm0, %v23332_v13, 0  ;;  %v23351_v22 = vsub.f32 %v100_v0, %v322_v3  ;;  %v23353_v23 = vsub.f32 %v101_v1, %v325_v4  ;;  %v23408_v50 = vld [vmem:[#allocation2 + $0x40] sm:$0xff]  ;;  %v23410_v51 = vld [vmem:[#allocation2 + $0x48] sm:$0xff]  ;;  %v23414_v56 = vld [vmem:[#allocation2 + $0x50] sm:$0xff]  ;;  %s18733_s17 = sshll.u32 %s23207_s1, 4  ;;  %s18734_s17 = int_to_ptr.vmem [resolvable:$true] %s18733_s17 }
  0x4f   :  { %26177 = vst [vmem:[#allocation18_spill] sm:$0xff] %v23326_v10  ;;  %26178 = vst [vmem:[#allocation19_spill] sm:$0xff] %v23340_v17  ;;  %v23347_v20 = vsub.f32 %v142_v6, %v23326_v10  ;;  %v23349_v21 = vand.u32 4294901760, %v151_v19  ;;  %21677 = vmatprep.subr.bf16.mxu0 %v23338_v16  ;;  %v23357_v24 = vsub.f32 %v145_v11, %v23340_v17  ;;  %v154_v26 = vsel %vm140_vm0, %v23334_v14, 0  ;;  %v23416_v57 = vld [vmem:[#allocation2 + $0x58] sm:$0xff]  ;;  %s23145_s18 = scalar_lea.vmem %s18724_s30, 128 }
  0x50   :  { %26179 = vst [vmem:[#allocation20_spill] sm:$0xff] %v23342_v18  ;;  %v23360_v25 = vsub.f32 %v148_v12, %v23342_v18  ;;  %v157_v27 = vsel %vm140_vm0, %v23336_v15, 0  ;;  %21679 = vmatpush3.bf16.msra.mxu0 %v23338_v16  ;;  %v25858_v30 = vand.u32 4294901760, %v23351_v22  ;;  %v25856_v31 = vand.u32 4294901760, %v23353_v23  ;;  %v23440_v12 = vld [vmem:[#allocation5 + $0x8] sm:$0xff]  ;;  %p23146_p4 = scmp.ne.s32.totalorder %s18724_s30, %s23145_s18  ;;  %p23151_p6 = scmp.lt.s32.totalorder %s23145_s18, %s23145_s18 }
  0x51   :  { %26180 = vst [vmem:[#allocation21_spill] sm:$0xff] %v23347_v20  ;;  %26181 = vst [vmem:[#allocation22_spill] sm:$0xff] %v23349_v21  ;;  %v25854_v28 = vand.u32 4294901760, %v23347_v20  ;;  %v23369_v29 = vsub.f32 %v151_v19, %v23349_v21  ;;  %v25851_v32 = vand.u32 4294901760, %v23357_v24  ;;  %v23375_v34 = vand.u32 4294901760, %v154_v26 }
  0x52   :  { %26182 = vst [vmem:[#allocation23_spill] sm:$0xff] %v23357_v24  ;;  %26183 = vst [vmem:[#allocation24_spill] sm:$0xff] %v23360_v25  ;;  %v25850_v33 = vand.u32 4294901760, %v23360_v25  ;;  %v23377_v35 = vand.u32 4294901760, %v157_v27  ;;  %v992_v38 = vsub.f32 %v23351_v22, %v25858_v30  ;;  %v999_v39 = vsub.f32 %v23353_v23, %v25856_v31  ;;  %v23522_v31 = vld [vmem:[#allocation5 + $0x38] sm:$0xff]  ;;  %p23152_p7 = por %p23151_p6, %p23150_p5 }
  0x53   :  { %26184 = vst [vmem:[#allocation25_spill] sm:$0xff] %v23369_v29  ;;  %26185 = vst [vmem:[#allocation26_spill] sm:$0xff] %v23375_v34  ;;  %v391_v36 = vsub.f32 %v23347_v20, %v25854_v28  ;;  %v25849_v37 = vand.u32 4294901760, %v23369_v29  ;;  %v401_v40 = vsub.f32 %v23357_v24, %v25851_v32  ;;  %v23396_v42 = vsub.f32 %v154_v26, %v23375_v34 }
  0x54   :  { %26186 = vst [vmem:[#allocation27_spill] sm:$0xff] %v23377_v35  ;;  %v411_v41 = vsub.f32 %v23360_v25, %v25850_v33  ;;  %v23399_v43 = vsub.f32 %v157_v27, %v23377_v35  ;;  %v993_v48 = vand.u32 4294901760, %v992_v38  ;;  %v1000_v49 = vand.u32 4294901760, %v999_v39  ;;  %p23153_p8 = pnand %p23152_p7, %p23146_p4 }
  0x55   :  { %26187 = vst [vmem:[#allocation28_spill] sm:$0xff] %v23396_v42  ;;  %v392_v46 = vand.u32 4294901760, %v391_v36  ;;  %v421_v47 = vsub.f32 %v23369_v29, %v25849_v37  ;;  %v402_v52 = vand.u32 4294901760, %v401_v40  ;;  %v25847_v54 = vand.u32 4294901760, %v23396_v42 }
  0x56   :  { %26188 = vst [vmem:[#allocation29_spill] sm:$0xff] %v23399_v43  ;;  %v412_v53 = vand.u32 4294901760, %v411_v41  ;;  %v25845_v55 = vand.u32 4294901760, %v23399_v43  ;;  %v21680_v59 = vpack.c.bf16 %v1000_v49, %v993_v48  ;;  %v160_v60 = vsel %vm140_vm0, %v23401_v44, 0 }
  0x57   :  { %19856 = vmatprep.mubr.f32.mxu0 %v392_v46  ;;  %v422_v58 = vand.u32 4294901760, %v421_v47  ;;  %v163_v61 = vsel %vm140_vm0, %v23403_v45, 0  ;;  %v431_v62 = vsub.f32 %v23396_v42, %v25847_v54  ;;  %v23428_v0 = vand.u32 4294901760, %v160_v60 }
  0x58   :  { %19857 = vmatmul.mubr.f32.vlgmr.msra.gmra.mrb[0].mxu0 %v402_v52  ;;  %v441_v63 = vsub.f32 %v23399_v43, %v25845_v55  ;;  %v23430_v1 = vand.u32 4294901760, %v163_v61  ;;  %21681 = vmatprep.subr.bf16.mxu0 %v21680_v59  ;;  %v166_v3 = vsel %vm140_vm0, %v23408_v50, 0  ;;  %v169_v4 = vsel %vm140_vm0, %v23410_v51, 0  ;;  %v23490_v55 = vld [vmem:[#allocation5 + $0x18] sm:$0xff] }
  0x59   :  { %26189 = vst [vmem:[#allocation30_spill] sm:$0xff] %v23428_v0  ;;  %19859 = vmatprep.mubr.f32.mxu0 %v412_v53  ;;  %v172_v6 = vsel %vm140_vm0, %v23414_v56, 0  ;;  %v175_v11 = vsel %vm140_vm0, %v23416_v57, 0  ;;  %21683 = vmatpush3.bf16.msra.mxu0 %v21680_v59  ;;  %v432_v19 = vand.u32 4294901760, %v431_v62  ;;  %v23443_v27 = vsub.f32 %v160_v60, %v23428_v0 }
  0x5a   :  { %26190 = vst [vmem:[#allocation31_spill] sm:$0xff] %v23430_v1  ;;  %v442_v26 = vand.u32 4294901760, %v441_v63  ;;  %v23446_v36 = vsub.f32 %v163_v61, %v23430_v1  ;;  %v23448_v38 = vand.u32 4294901760, %v166_v3  ;;  %v23450_v39 = vand.u32 4294901760, %v169_v4 }
  0x5b   :  { %26191 = vst [vmem:[#allocation32_spill] sm:$0xff] %v23443_v27  ;;  %v23452_v40 = vand.u32 4294901760, %v172_v6  ;;  %v23454_v41 = vand.u32 4294901760, %v175_v11  ;;  %v25846_v46 = vand.u32 4294901760, %v23443_v27  ;;  %v178_v48 = vsel %vm140_vm0, %v23314_v5, 0 }
  0x5c   :  { %26192 = vst [vmem:[#allocation33_spill] sm:$0xff] %v23446_v36  ;;  %26193 = vst [vmem:[#allocation34_spill] sm:$0xff] %v23448_v38  ;;  %19860 = vmatmul.mubr.f32.gmra.mrb[2].mxu0 %v422_v58  ;;  %v25848_v47 = vand.u32 4294901760, %v23446_v36  ;;  %v181_v49 = vsel %vm140_vm0, %v23440_v12, 0  ;;  %v23463_v52 = vsub.f32 %v166_v3, %v23448_v38  ;;  %v23466_v53 = vsub.f32 %v169_v4, %v23450_v39 }
  0x5d   :  { %26194 = vst [vmem:[#allocation35_spill] sm:$0xff] %v23450_v39  ;;  %26195 = vst [vmem:[#allocation36_spill] sm:$0xff] %v23452_v40  ;;  %19862 = vmatprep.mubr.f32.mxu0 %v432_v19  ;;  %v23469_v59 = vsub.f32 %v172_v6, %v23452_v40  ;;  %v23472_v58 = vsub.f32 %v175_v11, %v23454_v41  ;;  %v451_v60 = vsub.f32 %v23443_v27, %v25846_v46  ;;  %v23488_v19 = vld [vmem:[#allocation5 + $0x10] sm:$0xff] }
  0x5e   :  { %26196 = vst [vmem:[#allocation37_spill] sm:$0xff] %v23454_v41  ;;  %26197 = vst [vmem:[#allocation38_spill] sm:$0xff] %v23463_v52  ;;  %v461_v61 = vsub.f32 %v23446_v36, %v25848_v47  ;;  %v23480_v62 = vand.u32 4294901760, %v178_v48  ;;  %v23482_v63 = vand.u32 4294901760, %v181_v49  ;;  %v25852_v3 = vand.u32 4294901760, %v23463_v52 }
  0x5f   :  { %26198 = vst [vmem:[#allocation39_spill] sm:$0xff] %v23466_v53  ;;  %26199 = vst [vmem:[#allocation40_spill] sm:$0xff] %v23469_v59  ;;  %v25853_v4 = vand.u32 4294901760, %v23466_v53  ;;  %v25855_v6 = vand.u32 4294901760, %v23469_v59  ;;  %v25857_v11 = vand.u32 4294901760, %v23472_v58  ;;  %v452_v46 = vand.u32 4294901760, %v451_v60 }
  0x60   :  { %26200 = vst [vmem:[#allocation41_spill] sm:$0xff] %v23472_v58  ;;  %26201 = vst [vmem:[#allocation42_spill] sm:$0xff] %v23480_v62  ;;  %19863 = vmatmul.mubr.f32.gmra.mrb[4].mxu0 %v442_v26  ;;  %v462_v54 = vand.u32 4294901760, %v461_v61  ;;  %v23493_v47 = vsub.f32 %v178_v48, %v23480_v62  ;;  %v23496_v37 = vsub.f32 %v181_v49, %v23482_v63  ;;  %v23510_v60 = vld [vmem:[#allocation5 + $0x20] sm:$0xff]  ;;  %v23512_v49 = vld [vmem:[#allocation5 + $0x28] sm:$0xff]  ;;  %v187_v28 = vsel %vm140_vm0, %v23490_v55, 0 }
  0x61   :  { %26202 = vst [vmem:[#allocation43_spill] sm:$0xff] %v23482_v63  ;;  %v471_v33 = vsub.f32 %v23463_v52, %v25852_v3  ;;  %v481_v32 = vsub.f32 %v23466_v53, %v25853_v4  ;;  %v491_v26 = vsub.f32 %v23469_v59, %v25855_v6  ;;  %v501_v48 = vsub.f32 %v23472_v58, %v25857_v11  ;;  %v23520_v6 = vld [vmem:[#allocation5 + $0x30] sm:$0xff] }
  0x62   :  { %26203 = vst [vmem:[#allocation44_spill] sm:$0xff] %v23493_v47  ;;  %26204 = vst [vmem:[#allocation45_spill] sm:$0xff] %v23496_v37  ;;  %19865 = vmatprep.mubr.f32.mxu0 %v452_v46  ;;  %v25869_v61 = vand.u32 4294901760, %v23493_v47  ;;  %v184_v4 = vsel %vm140_vm0, %v23488_v19, 0  ;;  %v23529_v53 = vand.u32 4294901760, %v187_v28  ;;  %v190_v52 = vsel %vm140_vm0, %v23510_v60, 0 }
  0x63   :  { %v472_v11 = vand.u32 4294901760, %v471_v33  ;;  %v482_v30 = vand.u32 4294901760, %v481_v32  ;;  %v492_v58 = vand.u32 4294901760, %v491_v26  ;;  %v502_v59 = vand.u32 4294901760, %v501_v48  ;;  %v23541_v26 = vld [vmem:[#allocation5 + $0x48] sm:$0xff] }
  0x64   :  { %19866 = vmatmul.mubr.f32.gmra.mrb[6].mxu0 %v462_v54  ;;  %v511_v46 = vsub.f32 %v23493_v47, %v25869_v61  ;;  %v23527_v3 = vand.u32 4294901760, %v184_v4  ;;  %26206 = vst [vmem:[#allocation47_spill] sm:$0xff] %v23529_v53  ;;  %v193_v36 = vsel %vm140_vm0, %v23512_v49, 0  ;;  %v196_v32 = vsel %vm140_vm0, %v23520_v6, 0  ;;  %v23539_v54 = vld [vmem:[#allocation5 + $0x40] sm:$0xff] }
  0x65   :  { %19868 = vmatprep.mubr.f32.mxu0 %v472_v11  ;;  %v199_v33 = vsel %vm140_vm0, %v23522_v31, 0  ;;  %v26207_v61 = vand.u32 4294901760, %v23496_v37  ;;  %v23550_v27 = vsub.f32 %v187_v28, %v23529_v53  ;;  %v23552_v43 = vand.u32 4294901760, %v190_v52 }
  0x66   :  { %26205 = vst [vmem:[#allocation46_spill] sm:$0xff] %v23527_v3  ;;  %v512_v48 = vand.u32 4294901760, %v511_v46  ;;  %v23547_v47 = vsub.f32 %v184_v4, %v23527_v3  ;;  %v23554_v42 = vand.u32 4294901760, %v193_v36  ;;  %v23556_v29 = vand.u32 4294901760, %v196_v32 }
  0x67   :  { %v521_v11 = vsub.f32 %v23496_v37, %v26207_v61  ;;  %26209 = vst [vmem:[#allocation49_spill] sm:$0xff] %v23550_v27  ;;  %26210 = vst [vmem:[#allocation50_spill] sm:$0xff] %v23552_v43  ;;  %v23558_v25 = vand.u32 4294901760, %v199_v33  ;;  %v202_v4 = vsel %vm140_vm0, %v23539_v54, 0  ;;  %v205_v28 = vsel %vm140_vm0, %v23541_v26, 0 }
  0x68   :  { %26208 = vst [vmem:[#allocation48_spill] sm:$0xff] %v23547_v47  ;;  %26211 = vst [vmem:[#allocation51_spill] sm:$0xff] %v23554_v42  ;;  %19869 = vmatmul.mubr.f32.gmra.mrb[8].mxu0 %v482_v30  ;;  %v25898_v46 = vand.u32 4294901760, %v23547_v47  ;;  %v23567_v61 = vsub.f32 %v190_v52, %v23552_v43  ;;  %v23570_v37 = vsub.f32 %v193_v36, %v23554_v42  ;;  %v26218_v53 = vand.u32 4294901760, %v23550_v27  ;;  %v23594_v42 = vld [vmem:[#allocation5 + $0x58] sm:$0xff] }
  0x69   :  { %26212 = vst [vmem:[#allocation52_spill] sm:$0xff] %v23556_v29  ;;  %26213 = vst [vmem:[#allocation53_spill] sm:$0xff] %v23558_v25  ;;  %19871 = vmatprep.mubr.f32.mxu0 %v492_v58  ;;  %v23573_v20 = vsub.f32 %v196_v32, %v23556_v29  ;;  %v23576_v30 = vsub.f32 %v199_v33, %v23558_v25  ;;  %v23584_v3 = vand.u32 4294901760, %v202_v4  ;;  %v23586_v52 = vand.u32 4294901760, %v205_v28  ;;  %v23592_v25 = vld [vmem:[#allocation5 + $0x50] sm:$0xff] }
  0x6a   :  { %26214 = vst [vmem:[#allocation54_spill] sm:$0xff] %v23567_v61  ;;  %26215 = vst [vmem:[#allocation55_spill] sm:$0xff] %v23570_v37  ;;  %v531_v24 = vsub.f32 %v23547_v47, %v25898_v46  ;;  %v541_v58 = vsub.f32 %v23550_v27, %v26218_v53  ;;  %v522_v46 = vand.u32 4294901760, %v521_v11  ;;  %v104_v36 = vmul.f32 %v23312_v2, %v23312_v2 }
  0x6b   :  { %26216 = vst [vmem:[#allocation56_spill] sm:$0xff] %v23573_v20  ;;  %26217 = vst [vmem:[#allocation57_spill] sm:$0xff] %v23576_v30  ;;  %v23597_v53 = vsub.f32 %v202_v4, %v23584_v3  ;;  %v23600_v27 = vsub.f32 %v205_v28, %v23586_v52  ;;  %v26223_v29 = vand.u32 4294901760, %v23567_v61  ;;  %v26224_v47 = vand.u32 4294901760, %v23570_v37 }
  0x6c   :  { %26219 = vst [vmem:[#allocation58_spill] sm:$0xff] %v23584_v3  ;;  %26220 = vst [vmem:[#allocation59_spill] sm:$0xff] %v23586_v52  ;;  %19872 = vmatmul.mubr.f32.gmra.mrb[10].mxu0 %v502_v59  ;;  %v532_v32 = vand.u32 4294901760, %v531_v24  ;;  %v26225_v11 = vand.u32 4294901760, %v23573_v20  ;;  %v208_v28 = vsel %vm140_vm0, %v23592_v25, 0  ;;  %v211_v2 = vsel %vm140_vm0, %v23594_v42, 0 }
  0x6d   :  { %26221 = vst [vmem:[#allocation60_spill] sm:$0xff] %v23597_v53  ;;  %26222 = vst [vmem:[#allocation61_spill] sm:$0xff] %v23600_v27  ;;  %19874 = vmatprep.mubr.f32.mxu0 %v512_v48  ;;  %v551_v33 = vsub.f32 %v23567_v61, %v26223_v29  ;;  %v561_v59 = vsub.f32 %v23570_v37, %v26224_v47  ;;  %v542_v48 = vand.u32 4294901760, %v541_v58  ;;  %v26226_v24 = vand.u32 4294901760, %v23576_v30 }
  0x6e   :  { %v571_v4 = vsub.f32 %v23573_v20, %v26225_v11  ;;  %v23622_v37 = vand.u32 4294901760, %v208_v28  ;;  %v23624_v11 = vand.u32 4294901760, %v211_v2  ;;  %v214_v20 = vsel %vm140_vm0, %v104_v36, 0 }
  0x6f   :  { %v581_v52 = vsub.f32 %v23576_v30, %v26226_v24  ;;  %v552_v61 = vand.u32 4294901760, %v551_v33  ;;  %v105_v58 = vmul.f32 %v23318_v7, %v23318_v7  ;;  %v106_v3 = vmul.f32 %v23320_v8, %v23320_v8 }
  0x70   :  { %19875 = vmatmul.mubr.f32.gmra.mrb[12].mxu0 %v522_v46  ;;  %26227 = vst [vmem:[#allocation62_spill] sm:$0xff] %v23622_v37  ;;  %26228 = vst [vmem:[#allocation63_spill] sm:$0xff] %v23624_v11  ;;  %v107_v24 = vmul.f32 %v23332_v13, %v23332_v13  ;;  %v562_v46 = vand.u32 4294901760, %v561_v59  ;;  %v572_v33 = vand.u32 4294901760, %v571_v4  ;;  %v23634_v47 = vsub.f32 %v208_v28, %v23622_v37 }
  0x71   :  { %19877 = vmatprep.mubr.f32.mxu0 %v532_v32  ;;  %v23637_v29 = vsub.f32 %v211_v2, %v23624_v11  ;;  %v23639_v32 = vand.u32 4294901760, %v214_v20  ;;  %v217_v36 = vsel %vm140_vm0, %v105_v58, 0  ;;  %v220_v30 = vsel %vm140_vm0, %v106_v3, 0 }
  0x72   :  { %26229 = vst [vmem:[#allocation64_spill] sm:$0xff] %v23634_v47  ;;  %v223_v43 = vsel %vm140_vm0, %v107_v24, 0  ;;  %v26232_v63 = vand.u32 4294901760, %v23597_v53  ;;  %v23648_v28 = vand.u32 4294901760, %v217_v36  ;;  %v23650_v37 = vand.u32 4294901760, %v220_v30 }
  0x73   :  { %26230 = vst [vmem:[#allocation65_spill] sm:$0xff] %v23637_v29  ;;  %26231 = vst [vmem:[#allocation66_spill] sm:$0xff] %v23639_v32  ;;  %v23653_v2 = vsub.f32 %v214_v20, %v23639_v32  ;;  %v23655_v58 = vand.u32 4294901760, %v223_v43  ;;  %v108_v3 = vmul.f32 %v23334_v14, %v23334_v14  ;;  %v582_v24 = vand.u32 4294901760, %v581_v52 }
  0x74   :  { %19878 = vmatmul.mubr.f32.gmra.mrb[14].mxu0 %v542_v48  ;;  %v591_v59 = vsub.f32 %v23597_v53, %v26232_v63  ;;  %26233 = vst [vmem:[#allocation67_spill] sm:$0xff] %v23648_v28  ;;  %26234 = vst [vmem:[#allocation68_spill] sm:$0xff] %v23650_v37  ;;  %v109_v48 = vmul.f32 %v23336_v15, %v23336_v15  ;;  %v23662_v63 = vsub.f32 %v217_v36, %v23648_v28 }
  0x75   :  { %19880 = vmatprep.mubr.f32.mxu0 %v552_v61  ;;  %26235 = vst [vmem:[#allocation69_spill] sm:$0xff] %v23653_v2  ;;  %26236 = vst [vmem:[#allocation70_spill] sm:$0xff] %v23655_v58  ;;  %v26238_v4 = vand.u32 4294901760, %v23600_v27  ;;  %v226_v20 = vsel %vm140_vm0, %v108_v3, 0  ;;  %v26239_v11 = vand.u32 4294901760, %v23634_v47  ;;  %v23673_v41 = vsub.f32 %v220_v30, %v23650_v37 }
  0x76   :  { %26237 = vst [vmem:[#allocation71_spill] sm:$0xff] %v23662_v63  ;;  %v592_v32 = vand.u32 4294901760, %v591_v59  ;;  %v229_v36 = vsel %vm140_vm0, %v109_v48, 0  ;;  %v23679_v61 = vsub.f32 %v223_v43, %v23655_v58  ;;  %v23681_v3 = vand.u32 4294901760, %v226_v20 }
  0x77   :  { %v601_v53 = vsub.f32 %v23600_v27, %v26238_v4  ;;  %v611_v62 = vsub.f32 %v23634_v47, %v26239_v11  ;;  %26240 = vst [vmem:[#allocation72_spill] sm:$0xff] %v23673_v41  ;;  %v111_v11 = vmul.f32 %v23403_v45, %v23403_v45  ;;  %v26243_v59 = vand.u32 4294901760, %v23637_v29 }
  0x78   :  { %19881 = vmatmul.mubr.f32.gmra.mrb[16].mxu0 %v562_v46  ;;  %26241 = vst [vmem:[#allocation73_spill] sm:$0xff] %v23679_v61  ;;  %26242 = vst [vmem:[#allocation74_spill] sm:$0xff] %v23681_v3  ;;  %v110_v46 = vmul.f32 %v23401_v44, %v23401_v44  ;;  %v23691_v48 = vsub.f32 %v226_v20, %v23681_v3  ;;  %v23693_v4 = vand.u32 4294901760, %v229_v36 }
  0x79   :  { %19883 = vmatprep.mubr.f32.mxu0 %v572_v33  ;;  %v602_v30 = vand.u32 4294901760, %v601_v53  ;;  %v621_v33 = vsub.f32 %v23637_v29, %v26243_v59  ;;  %v612_v43 = vand.u32 4294901760, %v611_v62  ;;  %v235_v27 = vsel %vm140_vm0, %v111_v11, 0 }
  0x7a   :  { %26244 = vst [vmem:[#allocation75_spill] sm:$0xff] %v23691_v48  ;;  %26245 = vst [vmem:[#allocation76_spill] sm:$0xff] %v23693_v4  ;;  %v232_v47 = vsel %vm140_vm0, %v110_v46, 0  ;;  %v26246_v53 = vand.u32 4294901760, %v23653_v2  ;;  %v26247_v59 = vand.u32 4294901760, %v23662_v63  ;;  %v23707_v62 = vand.u32 4294901760, %v235_v27 }
  0x7b   :  { %v23705_v3 = vand.u32 4294901760, %v232_v47  ;;  %v114_v46 = vmul.f32 %v23414_v56, %v23414_v56  ;;  %v622_v11 = vand.u32 4294901760, %v621_v33  ;;  %v26252_v33 = vand.u32 4294901760, %v23673_v41 }
  0x7c   :  { %19884 = vmatmul.mubr.f32.gmra.mrb[18].mxu0 %v582_v24  ;;  %v631_v58 = vsub.f32 %v23653_v2, %v26246_v53  ;;  %v641_v20 = vsub.f32 %v23662_v63, %v26247_v59  ;;  %26249 = vst [vmem:[#allocation78_spill] sm:$0xff] %v23707_v62  ;;  %v112_v24 = vmul.f32 %v23408_v50, %v23408_v50 }
  0x7d   :  { %19886 = vmatprep.mubr.f32.mxu0 %v592_v32  ;;  %26248 = vst [vmem:[#allocation77_spill] sm:$0xff] %v23705_v3  ;;  %v113_v32 = vmul.f32 %v23410_v51, %v23410_v51  ;;  %v23717_v59 = vsub.f32 %v229_v36, %v23693_v4  ;;  %v23720_v29 = vsub.f32 %v232_v47, %v23705_v3  ;;  %v244_v36 = vsel %vm140_vm0, %v114_v46, 0 }
  0x7e   :  { %v238_v52 = vsel %vm140_vm0, %v112_v24, 0  ;;  %v115_v2 = vmul.f32 %v23416_v57, %v23416_v57  ;;  %v632_v37 = vand.u32 4294901760, %v631_v58  ;;  %v651_v53 = vsub.f32 %v23673_v41, %v26252_v33 }
  0x7f   :  { %26250 = vst [vmem:[#allocation79_spill] sm:$0xff] %v23717_v59  ;;  %26251 = vst [vmem:[#allocation80_spill] sm:$0xff] %v23720_v29  ;;  %v241_v63 = vsel %vm140_vm0, %v113_v32, 0  ;;  %v23729_v28 = vand.u32 4294901760, %v238_v52  ;;  %v26254_v47 = vand.u32 4294901760, %v23679_v61  ;;  %v23736_v32 = vsub.f32 %v235_v27, %v23707_v62 }
  0x80   :  { %19887 = vmatmul.mubr.f32.gmra.mrb[20].mxu0 %v602_v30  ;;  %v642_v30 = vand.u32 4294901760, %v641_v20  ;;  %v26256_v3 = vand.u32 4294901760, %v23691_v48  ;;  %v23742_v4 = vand.u32 4294901760, %v241_v63  ;;  %v116_v33 = vmul.f32 %v23314_v5, %v23314_v5 }
  0x81   :  { %19889 = vmatprep.mubr.f32.mxu0 %v612_v43  ;;  %26253 = vst [vmem:[#allocation81_spill] sm:$0xff] %v23729_v28  ;;  %v661_v24 = vsub.f32 %v23679_v61, %v26254_v47  ;;  %26255 = vst [vmem:[#allocation82_spill] sm:$0xff] %v23736_v32  ;;  %v23747_v46 = vand.u32 4294901760, %v244_v36  ;;  %v247_v47 = vsel %vm140_vm0, %v115_v2, 0  ;;  %v117_v27 = vmul.f32 %v23440_v12, %v23440_v12 }
  0x82   :  { %v671_v58 = vsub.f32 %v23691_v48, %v26256_v3  ;;  %26257 = vst [vmem:[#allocation83_spill] sm:$0xff] %v23742_v4  ;;  %v652_v61 = vand.u32 4294901760, %v651_v53  ;;  %v23753_v3 = vsub.f32 %v238_v52, %v23729_v28  ;;  %v250_v5 = vsel %vm140_vm0, %v116_v33, 0 }
  0x83   :  { %26258 = vst [vmem:[#allocation84_spill] sm:$0xff] %v23747_v46  ;;  %v662_v43 = vand.u32 4294901760, %v661_v24  ;;  %v23760_v20 = vand.u32 4294901760, %v247_v47  ;;  %v253_v2 = vsel %vm140_vm0, %v117_v27, 0  ;;  %v118_v41 = vmul.f32 %v23488_v19, %v23488_v19 }
  0x84   :  { %19890 = vmatmul.mubr.f32.gmra.mrb[22].mxu0 %v622_v11  ;;  %26259 = vst [vmem:[#allocation85_spill] sm:$0xff] %v23753_v3  ;;  %v23758_v11 = vsub.f32 %v241_v63, %v23742_v4  ;;  %v26262_v52 = vand.u32 4294901760, %v23717_v59  ;;  %v26263_v24 = vand.u32 4294901760, %v23720_v29  ;;  %v23772_v63 = vsub.f32 %v244_v36, %v23747_v46 }
  0x85   :  { %19892 = vmatprep.mubr.f32.mxu0 %v632_v37  ;;  %26261 = vst [vmem:[#allocation87_spill] sm:$0xff] %v23760_v20  ;;  %v672_v37 = vand.u32 4294901760, %v671_v58  ;;  %v23775_v27 = vand.u32 4294901760, %v250_v5  ;;  %v256_v4 = vsel %vm140_vm0, %v118_v41, 0  ;;  %v26266_v58 = vand.u32 4294901760, %v23736_v32 }
  0x86   :  { %26260 = vst [vmem:[#allocation86_spill] sm:$0xff] %v23758_v11  ;;  %v681_v53 = vsub.f32 %v23717_v59, %v26262_v52  ;;  %v691_v33 = vsub.f32 %v23720_v29, %v26263_v24  ;;  %26264 = vst [vmem:[#allocation88_spill] sm:$0xff] %v23772_v63  ;;  %v23783_v59 = vand.u32 4294901760, %v253_v2  ;;  %v23787_v36 = vsub.f32 %v247_v47, %v23760_v20 }
  0x87   :  { %26265 = vst [vmem:[#allocation89_spill] sm:$0xff] %v23775_v27  ;;  %v701_v52 = vsub.f32 %v23736_v32, %v26266_v58  ;;  %v120_v48 = vmul.f32 %v23510_v60, %v23510_v60  ;;  %v23792_v46 = vand.u32 4294901760, %v256_v4  ;;  %v121_v58 = vmul.f32 %v23512_v49, %v23512_v49 }
  0x88   :  { %19893 = vmatmul.mubr.f32.gmra.mrb[24].mxu0 %v642_v30  ;;  %v119_v30 = vmul.f32 %v23490_v55, %v23490_v55  ;;  %26267 = vst [vmem:[#allocation90_spill] sm:$0xff] %v23783_v59  ;;  %26268 = vst [vmem:[#allocation91_spill] sm:$0xff] %v23787_v36  ;;  %v682_v41 = vand.u32 4294901760, %v681_v53  ;;  %v692_v29 = vand.u32 4294901760, %v691_v33  ;;  %v26270_v32 = vand.u32 4294901760, %v23753_v3 }
  0x89   :  { %19895 = vmatprep.mubr.f32.mxu0 %v652_v61  ;;  %26269 = vst [vmem:[#allocation92_spill] sm:$0xff] %v23792_v46  ;;  %v23806_v53 = vsub.f32 %v253_v2, %v23783_v59  ;;  %v262_v20 = vsel %vm140_vm0, %v120_v48, 0  ;;  %v26274_v28 = vand.u32 4294901760, %v23758_v11  ;;  %v123_v59 = vmul.f32 %v23522_v31, %v23522_v31 }
  0x8a   :  { %v259_v61 = vsel %vm140_vm0, %v119_v30, 0  ;;  %v711_v24 = vsub.f32 %v23753_v3, %v26270_v32  ;;  %v23801_v30 = vsub.f32 %v250_v5, %v23775_v27  ;;  %v23816_v5 = vsub.f32 %v256_v4, %v23792_v46 }
  0x8b   :  { %26272 = vst [vmem:[#allocation94_spill] sm:$0xff] %v23806_v53  ;;  %v23808_v33 = vand.u32 4294901760, %v259_v61  ;;  %v721_v32 = vsub.f32 %v23758_v11, %v26274_v28  ;;  %v265_v3 = vsel %vm140_vm0, %v121_v58, 0  ;;  %v23826_v47 = vand.u32 4294901760, %v262_v20 }
  0x8c   :  { %19896 = vmatmul.mubr.f32.gmra.mrb[26].mxu0 %v662_v43  ;;  %26271 = vst [vmem:[#allocation93_spill] sm:$0xff] %v23801_v30  ;;  %v122_v43 = vmul.f32 %v23520_v6, %v23520_v6  ;;  %26275 = vst [vmem:[#allocation96_spill] sm:$0xff] %v23816_v5  ;;  %v712_v48 = vand.u32 4294901760, %v711_v24  ;;  %v124_v58 = vmul.f32 %v23539_v54, %v23539_v54  ;;  %v26280_v28 = vand.u32 4294901760, %v23787_v36 }
  0x8d   :  { %19898 = vmatprep.mubr.f32.mxu0 %v672_v37  ;;  %26273 = vst [vmem:[#allocation95_spill] sm:$0xff] %v23808_v33  ;;  %v702_v37 = vand.u32 4294901760, %v701_v52  ;;  %v26276_v52 = vand.u32 4294901760, %v23772_v63  ;;  %26277 = vst [vmem:[#allocation97_spill] sm:$0xff] %v23826_v47  ;;  %v125_v24 = vmul.f32 %v23541_v26, %v23541_v26  ;;  %v23849_v62 = vsub.f32 %v262_v20, %v23826_v47 }
  0x8e   :  { %v268_v2 = vsel %vm140_vm0, %v122_v43, 0  ;;  %v23834_v43 = vand.u32 4294901760, %v265_v3 }
  0x8f   :  { %v731_v27 = vsub.f32 %v23772_v63, %v26276_v52  ;;  %v722_v52 = vand.u32 4294901760, %v721_v32  ;;  %v741_v63 = vsub.f32 %v23787_v36, %v26280_v28  ;;  %v274_v28 = vsel %vm140_vm0, %v124_v58, 0 }
  0x90   :  { %19899 = vmatmul.mubr.f32.gmra.mrb[28].mxu0 %v682_v41  ;;  %v23830_v41 = vsub.f32 %v259_v61, %v23808_v33  ;;  %26278 = vst [vmem:[#allocation98_spill] sm:$0xff] %v23834_v43  ;;  %v271_v61 = vsel %vm140_vm0, %v123_v59, 0  ;;  %v26281_v33 = vand.u32 4294901760, %v23801_v30  ;;  %v126_v59 = vmul.f32 %v23592_v25, %v23592_v25 }
  0x91   :  { %19901 = vmatprep.mubr.f32.mxu0 %v692_v29  ;;  %v23836_v29 = vand.u32 4294901760, %v268_v2  ;;  %v732_v11 = vand.u32 4294901760, %v731_v27  ;;  %v23859_v27 = vsub.f32 %v265_v3, %v23834_v43  ;;  %v277_v20 = vsel %vm140_vm0, %v125_v24, 0 }
  0x92   :  { %v751_v46 = vsub.f32 %v23801_v30, %v26281_v33  ;;  %v23864_v33 = vand.u32 4294901760, %v271_v61  ;;  %v742_v4 = vand.u32 4294901760, %v741_v63  ;;  %v127_v58 = vmul.f32 %v23594_v42, %v23594_v42 }
  0x93   :  { %26279 = vst [vmem:[#allocation99_spill] sm:$0xff] %v23836_v29  ;;  %v23873_v30 = vand.u32 4294901760, %v274_v28  ;;  %v23878_v24 = vand.u32 4294901760, %v277_v20  ;;  %v280_v63 = vsel %vm140_vm0, %v126_v59, 0 }
  0x94   :  { %19902 = vmatmul.mubr.f32.gmra.mrb[30].mxu0 %v702_v37  ;;  %v26282_v37 = vand.u32 4294901760, %v23806_v53  ;;  %26284 = vst [vmem:[#allocation101_spill] sm:$0xff] %v23864_v33  ;;  %v283_v3 = vsel %vm140_vm0, %v127_v58, 0 }
  0x95   :  { %19904 = vmatprep.mubr.f32.mxu0 %v712_v48  ;;  %v23862_v48 = vsub.f32 %v268_v2, %v23836_v29  ;;  %26286 = vst [vmem:[#allocation102_spill] sm:$0xff] %v23873_v30  ;;  %v26287_v2 = vand.u32 4294901760, %v23830_v41  ;;  %26288 = vst [vmem:[#allocation103_spill] sm:$0xff] %v23878_v24  ;;  %v129_v29 = vmul.f32 %v23440_v12, %v23318_v7 }
  0x96   :  { %v761_v32 = vsub.f32 %v23806_v53, %v26282_v37  ;;  %v26285_v37 = vand.u32 4294901760, %v23816_v5  ;;  %v752_v53 = vand.u32 4294901760, %v751_v46  ;;  %v23902_v58 = vsub.f32 %v277_v20, %v23878_v24 }
  0x97   :  { %26283 = vst [vmem:[#allocation100_spill] sm:$0xff] %v23862_v48  ;;  %v781_v36 = vsub.f32 %v23830_v41, %v26287_v2  ;;  %v130_v2 = vmul.f32 %v23488_v19, %v23320_v8  ;;  %v26291_v8 = vand.u32 4294901760, %v23862_v48  ;;  %v131_v20 = vmul.f32 %v23490_v55, %v23332_v13 }
  0x98   :  { %19905 = vmatmul.mubr.f32.gmra.mrb[32].mxu0 %v722_v52  ;;  %v771_v40 = vsub.f32 %v23816_v5, %v26285_v37  ;;  %v762_v52 = vand.u32 4294901760, %v761_v32  ;;  %v26001_v37 = vand.u32 4294901760, %v23859_v27  ;;  %v26289_v32 = vand.u32 4294901760, %v23849_v62 }
  0x99   :  { %19907 = vmatprep.mubr.f32.mxu0 %v732_v11  ;;  %v23884_v11 = vsub.f32 %v271_v61, %v23864_v33  ;;  %v23895_v5 = vsub.f32 %v274_v28, %v23873_v30  ;;  %v23897_v61 = vand.u32 4294901760, %v280_v63  ;;  %v811_v12 = vsub.f32 %v23862_v48, %v26291_v8 }
  0x9a   :  { %v772_v46 = vand.u32 4294901760, %v771_v40  ;;  %v791_v59 = vsub.f32 %v23849_v62, %v26289_v32  ;;  %v286_v40 = vsel %vm140_vm0, %v23324_v9, 0  ;;  %v801_v7 = vsub.f32 %v23859_v27, %v26001_v37 }
  0x9b   :  { %26290 = vst [vmem:[#allocation104_spill] sm:$0xff] %v23897_v61  ;;  %v23913_v28 = vand.u32 4294901760, %v286_v40  ;;  %v289_v9 = vsel %vm140_vm0, %v129_v29, 0  ;;  %v26004_v37 = vand.u32 4294901760, %v23895_v5  ;;  %v23921_v8 = vsub.f32 %v280_v63, %v23897_v61 }
  0x9c   :  { %19908 = vmatmul.mubr.f32.gmra.mrb[34].mxu0 %v742_v4  ;;  %v782_v4 = vand.u32 4294901760, %v781_v36  ;;  %v292_v36 = vsel %vm140_vm0, %v130_v2, 0  ;;  %v792_v32 = vand.u32 4294901760, %v791_v59  ;;  %v132_v19 = vmul.f32 %v23510_v60, %v23334_v14 }
  0x9d   :  { %19910 = vmatprep.mubr.f32.mxu0 %v752_v53  ;;  %v23911_v53 = vand.u32 4294901760, %v283_v3  ;;  %26293 = vst [vmem:[#allocation106_spill] sm:$0xff] %v23913_v28  ;;  %v26294_v48 = vand.u32 4294901760, %v23884_v11  ;;  %v23932_v13 = vand.u32 4294901760, %v289_v9  ;;  %v23934_v55 = vand.u32 4294901760, %v292_v36 }
  0x9e   :  { %v812_v63 = vand.u32 4294901760, %v811_v12  ;;  %v23937_v59 = vsub.f32 %v286_v40, %v23913_v28  ;;  %v295_v14 = vsel %vm140_vm0, %v131_v20, 0  ;;  %v831_v60 = vsub.f32 %v23895_v5, %v26004_v37 }
  0x9f   :  { %26292 = vst [vmem:[#allocation105_spill] sm:$0xff] %v23911_v53  ;;  %v821_v29 = vsub.f32 %v23884_v11, %v26294_v48  ;;  %v23930_v2 = vsub.f32 %v283_v3, %v23911_v53  ;;  %26295 = vst [vmem:[#allocation107_spill] sm:$0xff] %v23932_v13  ;;  %v26005_v48 = vand.u32 4294901760, %v23921_v8  ;;  %v298_v3 = vsel %vm140_vm0, %v132_v19, 0 }
  0xa0   :  { %19911 = vmatmul.mubr.f32.gmra.mrb[36].mxu0 %v762_v52  ;;  %26296 = vst [vmem:[#allocation108_spill] sm:$0xff] %v23934_v55  ;;  %v133_v52 = vmul.f32 %v23512_v49, %v23336_v15  ;;  %v134_v40 = vmul.f32 %v23520_v6, %v23401_v44  ;;  %v23954_v20 = vsub.f32 %v289_v9, %v23932_v13  ;;  %v23959_v37 = vand.u32 4294901760, %v295_v14 }
  0xa1   :  { %19913 = vmatprep.mubr.f32.mxu0 %v772_v46  ;;  %v802_v46 = vand.u32 4294901760, %v801_v7  ;;  %v822_v19 = vand.u32 4294901760, %v821_v29  ;;  %v23962_v49 = vand.u32 4294901760, %v298_v3  ;;  %v851_v44 = vsub.f32 %v23921_v8, %v26005_v48 }
  0xa2   :  { %26298 = vst [vmem:[#allocation109_spill] sm:$0xff] %v23954_v20  ;;  %26300 = vst [vmem:[#allocation111_spill] sm:$0xff] %v23959_v37  ;;  %v301_v6 = vsel %vm140_vm0, %v133_v52, 0  ;;  %v135_v9 = vmul.f32 %v23522_v31, %v23403_v45  ;;  %v304_v12 = vsel %vm140_vm0, %v134_v40, 0  ;;  %v136_v29 = vmul.f32 %v23539_v54, %v23408_v50 }
  0xa3   :  { %26301 = vst [vmem:[#allocation112_spill] sm:$0xff] %v23962_v49  ;;  %v23979_v48 = vsub.f32 %v295_v14, %v23959_v37  ;;  %v26303_v31 = vand.u32 4294901760, %v23937_v59  ;;  %v23985_v52 = vsub.f32 %v298_v3, %v23962_v49  ;;  %v23987_v50 = vand.u32 4294901760, %v301_v6 }
  0xa4   :  { %19914 = vmatmul.mubr.f32.gmra.mrb[38].mxu0 %v782_v4  ;;  %v26297_v4 = vand.u32 4294901760, %v23902_v58  ;;  %v23991_v54 = vpack.c.bf16 %v23353_v23, %v23351_v22  ;;  %v23993_v40 = vand.u32 4294901760, %v304_v12  ;;  %v307_v14 = vsel %vm140_vm0, %v135_v9, 0 }
  0xa5   :  { %19916 = vmatprep.mubr.f32.mxu0 %v792_v32  ;;  %v23957_v32 = vsub.f32 %v292_v36, %v23934_v55  ;;  %v871_v45 = vsub.f32 %v23937_v59, %v26303_v31  ;;  %26304 = vst [vmem:[#allocation113_spill] sm:$0xff] %v23987_v50  ;;  %v138_v3 = vmul.f32 %v23592_v25, %v23414_v56  ;;  %v26012_v9 = vand.u32 4294901760, %v23979_v48 }
  0xa6   :  { %v841_v7 = vsub.f32 %v23902_v58, %v26297_v4  ;;  %v832_v4 = vand.u32 4294901760, %v831_v60  ;;  %v26006_v60 = vand.u32 4294901760, %v23954_v20  ;;  %26305 = vst [vmem:[#allocation114_spill] sm:$0xff] %v23993_v40  ;;  %21685 = vmatprep.subr.bf16.mxu0 %v23991_v54  ;;  %v24013_v25 = vand.u32 4294901760, %v307_v14 }
  0xa7   :  { %26299 = vst [vmem:[#allocation110_spill] sm:$0xff] %v23957_v32  ;;  %v26007_v15 = vand.u32 4294901760, %v23957_v32  ;;  %v24016_v56 = vsub.f32 %v304_v12, %v23993_v40 }
  0xa8   :  { %19917 = vmatmul.mubr.f32.gmra.mrb[40].mxu0 %v802_v46  ;;  %v842_v36 = vand.u32 4294901760, %v841_v7  ;;  %v26302_v46 = vand.u32 4294901760, %v23930_v2  ;;  %v852_v7 = vand.u32 4294901760, %v851_v44  ;;  %26307 = vst [vmem:[#allocation116_spill] sm:$0xff] %v24013_v25 }
  0xa9   :  { %19919 = vmatprep.mubr.f32.mxu0 %v812_v63  ;;  %v891_v44 = vsub.f32 %v23957_v32, %v26007_v15  ;;  %v139_v15 = vmul.f32 %v23594_v42, %v23416_v57  ;;  %v26014_v42 = vand.u32 4294901760, %v24016_v56 }
  0xaa   :  { %v861_v63 = vsub.f32 %v23930_v2, %v26302_v46  ;;  %v310_v46 = vsel %vm140_vm0, %v136_v29, 0  ;;  %v24011_v29 = vsub.f32 %v301_v6, %v23987_v50  ;;  %v901_v6 = vsub.f32 %v23979_v48, %v26012_v9 }
  0xab   :  { %v931_v9 = vsub.f32 %v24016_v56, %v26014_v42 }
  0xac   :  { %19920 = vmatmul.mubr.f32.gmra.mrb[42].mxu0 %v822_v19  ;;  %v137_v19 = vmul.f32 %v23541_v26, %v23410_v51  ;;  %v862_v31 = vand.u32 4294901760, %v861_v63  ;;  %v872_v51 = vand.u32 4294901760, %v871_v45  ;;  %26306 = vst [vmem:[#allocation115_spill] sm:$0xff] %v24011_v29  ;;  %v24018_v63 = vand.u32 4294901760, %v310_v46 }
  0xad   :  { %19922 = vmatprep.mubr.f32.mxu0 %v832_v4  ;;  %v881_v4 = vsub.f32 %v23954_v20, %v26006_v60  ;;  %v892_v26 = vand.u32 4294901760, %v891_v44  ;;  %v26013_v32 = vand.u32 4294901760, %v24011_v29 }
  0xae   :  { %26308 = vst [vmem:[#allocation117_spill] sm:$0xff] %v24018_v63  ;;  %v313_v60 = vsel %vm140_vm0, %v137_v19, 0  ;;  %v24032_v19 = vsub.f32 %v307_v14, %v24013_v25  ;;  %v24038_v57 = vsub.f32 %v310_v46, %v24018_v63 }
  0xaf   :  { %v882_v45 = vand.u32 4294901760, %v881_v4  ;;  %v24034_v20 = vand.u32 4294901760, %v313_v60  ;;  %v902_v4 = vand.u32 4294901760, %v901_v6  ;;  %v921_v44 = vsub.f32 %v24011_v29, %v26013_v32 }
  0xb0   :  { %19923 = vmatmul.mubr.f32.gmra.mrb[44].mxu0 %v842_v36  ;;  %v316_v36 = vsel %vm140_vm0, %v138_v3, 0  ;;  %26310 = vst [vmem:[#allocation118_spill] sm:$0xff] %v24032_v19  ;;  %26312 = vst [vmem:[#allocation120_spill] sm:$0xff] %v24038_v57  ;;  %v26015_v14 = vand.u32 4294901760, %v24032_v19 }
  0xb1   :  { %19925 = vmatprep.mubr.f32.mxu0 %v852_v7  ;;  %v26309_v7 = vand.u32 4294901760, %v23985_v52  ;;  %26311 = vst [vmem:[#allocation119_spill] sm:$0xff] %v24034_v20  ;;  %v24040_v3 = vand.u32 4294901760, %v316_v36  ;;  %v922_v6 = vand.u32 4294901760, %v921_v44 }
  0xb3   :  { %v911_v12 = vsub.f32 %v23985_v52, %v26309_v7  ;;  %26313 = vst [vmem:[#allocation121_spill] sm:$0xff] %v24040_v3  ;;  %v24048_v7 = vsub.f32 %v313_v60, %v24034_v20  ;;  %v941_v60 = vsub.f32 %v24032_v19, %v26015_v14 }
  0xb4   :  { %19926 = vmatmul.mubr.f32.gmra.mrb[46].mxu0 %v862_v31  ;;  %v319_v31 = vsel %vm140_vm0, %v139_v15, 0  ;;  %v26021_v15 = vand.u32 4294901760, %v24038_v57 }
  0xb5   :  { %19928 = vmatprep.mubr.f32.mxu0 %v872_v51  ;;  %v24050_v51 = vand.u32 4294901760, %v319_v31  ;;  %v912_v46 = vand.u32 4294901760, %v911_v12  ;;  %v26020_v32 = vand.u32 4294901760, %v24048_v7  ;;  %v932_v12 = vand.u32 4294901760, %v931_v9 }
  0xb6   :  { %v951_v42 = vsub.f32 %v24038_v57, %v26021_v15  ;;  %v26331_v15 = vld [vmem:[#allocation66_spill] sm:$0xff] }
  0xb7   :  { %26314 = vst [vmem:[#allocation122_spill] sm:$0xff] %v24050_v51  ;;  %v961_v44 = vsub.f32 %v24048_v7, %v26020_v32  ;;  %v26330_v32 = vld [vmem:[#allocation63_spill] sm:$0xff] }
  0xb8   :  { %19929 = vmatmul.mubr.f32.gmra.mrb[48].mxu0 %v882_v45  ;;  %v24057_v45 = vsub.f32 %v316_v36, %v24040_v3  ;;  %v952_v19 = vand.u32 4294901760, %v951_v42  ;;  %v26318_v42 = vld [vmem:[#allocation37_spill] sm:$0xff] }
  0xb9   :  { %19931 = vmatprep.mubr.f32.mxu0 %v892_v26  ;;  %v24064_v26 = vsub.f32 %v319_v31, %v24050_v51  ;;  %v962_v31 = vand.u32 4294901760, %v961_v44  ;;  %v26322_v44 = vld [vmem:[#allocation47_spill] sm:$0xff] }
  0xba   :  { %26315 = vst [vmem:[#allocation123_spill] sm:$0xff] %v24057_v45  ;;  %v26019_v36 = vand.u32 4294901760, %v24057_v45 }
  0xbb   :  { %26316 = vst [vmem:[#allocation124_spill] sm:$0xff] %v24064_v26  ;;  %v26018_v14 = vand.u32 4294901760, %v24064_v26 }
  0xbc   :  { %19932 = vmatmul.mubr.f32.gmra.mrb[50].mxu0 %v902_v4  ;;  %v942_v4 = vand.u32 4294901760, %v941_v60  ;;  %v971_v9 = vsub.f32 %v24057_v45, %v26019_v36  ;;  %v26329_v36 = vld [vmem:[#allocation62_spill] sm:$0xff] }
  0xbd   :  { %19934 = vmatprep.mubr.f32.mxu0 %v912_v46  ;;  %v981_v46 = vsub.f32 %v24064_v26, %v26018_v14  ;;  %v26328_v14 = vld [vmem:[#allocation59_spill] sm:$0xff] }
  0xbf   :  { %v982_v60 = vand.u32 4294901760, %v981_v46  ;;  %v26325_v46 = vld [vmem:[#allocation52_spill] sm:$0xff] }
  0xc0   :  { %19935 = vmatmul.mubr.f32.gmra.mrb[52].mxu0 %v922_v6  ;;  %v972_v6 = vand.u32 4294901760, %v971_v9  ;;  %v26323_v9 = vld [vmem:[#allocation50_spill] sm:$0xff] }
  0xc1   :  { %19937 = vmatprep.mubr.f32.mxu0 %v932_v12  ;;  %v26320_v12 = vld [vmem:[#allocation43_spill] sm:$0xff] }
  0xc4   :  { %19938 = vmatmul.mubr.f32.gmra.mrb[54].mxu0 %v942_v4  ;;  %v26321_v4 = vld [vmem:[#allocation46_spill] sm:$0xff] }
  0xc5   :  { %19940 = vmatprep.mubr.f32.mxu0 %v952_v19  ;;  %v26317_v19 = vld [vmem:[#allocation36_spill] sm:$0xff] }
  0xc8   :  { %19941 = vmatmul.mubr.f32.gmra.mrb[56].mxu0 %v962_v31  ;;  %v26324_v31 = vld [vmem:[#allocation51_spill] sm:$0xff] }
  0xc9   :  { %19943 = vmatprep.mubr.f32.mxu0 %v972_v6  ;;  %v26326_v6 = vld [vmem:[#allocation53_spill] sm:$0xff] }
  0xcc   :  { %19944 = vmatmul.mubr.f32.gmra.mrb[58].mxu0 %v982_v60  ;;  %v26327_v60 = vld [vmem:[#allocation58_spill] sm:$0xff] }
  0xcd   :  { %19950 = vmatprep.mubr.f32.mxu0 %v23326_v10 }
  0xd0   :  { %19951 = vmatmul.mubr.f32.vlgmr.msra.gmra.mrb[0].mxu0 %v23340_v17 }
  0xd1   :  { %19953 = vmatprep.mubr.f32.mxu0 %v23342_v18  ;;  %21687 = vmatpush3.bf16.msra.mxu0 %v23991_v54  ;;  %v26319_v54 = vld [vmem:[#allocation42_spill] sm:$0xff] }
  0xd2   :  { %21689 = vmatprep.subr.bf16.mxu0 %v23338_v16  ;;  %v26392_v18 = vld [vmem:[#allocation118_spill] sm:$0xff] }
  0xd4   :  { %19954 = vmatmul.mubr.f32.gmra.mrb[2].mxu0 %v23349_v21  ;;  %v26391_v21 = vld [vmem:[#allocation110_spill] sm:$0xff] }
  0xd5   :  { %19956 = vmatprep.mubr.f32.mxu0 %v23375_v34  ;;  %v26390_v34 = vld [vmem:[#allocation109_spill] sm:$0xff] }
  0xd8   :  { %19957 = vmatmul.mubr.f32.gmra.mrb[4].mxu0 %v23377_v35  ;;  %v26389_v35 = vld [vmem:[#allocation100_spill] sm:$0xff] }
  0xd9   :  { %19959 = vmatprep.mubr.f32.mxu0 %v23428_v0  ;;  %v26388_v0 = vld [vmem:[#allocation96_spill] sm:$0xff] }
  0xdc   :  { %19960 = vmatmul.mubr.f32.gmra.mrb[6].mxu0 %v23430_v1  ;;  %v26387_v1 = vld [vmem:[#allocation94_spill] sm:$0xff] }
  0xdd   :  { %19962 = vmatprep.mubr.f32.mxu0 %v23448_v38  ;;  %v26386_v38 = vld [vmem:[#allocation93_spill] sm:$0xff] }
  0xe0   :  { %19963 = vmatmul.mubr.f32.gmra.mrb[8].mxu0 %v23450_v39  ;;  %v26385_v39 = vld [vmem:[#allocation91_spill] sm:$0xff] }
  0xe1   :  { %19965 = vmatprep.mubr.f32.mxu0 %v26317_v19  ;;  %v26384_v19 = vld [vmem:[#allocation88_spill] sm:$0xff] }
  0xe4   :  { %19966 = vmatmul.mubr.f32.gmra.mrb[10].mxu0 %v26318_v42  ;;  %v26383_v42 = vld [vmem:[#allocation86_spill] sm:$0xff] }
  0xe5   :  { %19968 = vmatprep.mubr.f32.mxu0 %v26319_v54  ;;  %v26382_v54 = vld [vmem:[#allocation85_spill] sm:$0xff] }
  0xe8   :  { %19969 = vmatmul.mubr.f32.gmra.mrb[12].mxu0 %v26320_v12  ;;  %v26381_v12 = vld [vmem:[#allocation82_spill] sm:$0xff] }
  0xe9   :  { %19971 = vmatprep.mubr.f32.mxu0 %v26321_v4  ;;  %v26332_v4 = vld [vmem:[#allocation67_spill] sm:$0xff] }
  0xec   :  { %19972 = vmatmul.mubr.f32.gmra.mrb[14].mxu0 %v26322_v44  ;;  %v26333_v44 = vld [vmem:[#allocation68_spill] sm:$0xff] }
  0xed   :  { %19974 = vmatprep.mubr.f32.mxu0 %v26323_v9  ;;  %v26334_v9 = vld [vmem:[#allocation70_spill] sm:$0xff] }
  0xf0   :  { %19975 = vmatmul.mubr.f32.gmra.mrb[16].mxu0 %v26324_v31  ;;  %v26335_v31 = vld [vmem:[#allocation74_spill] sm:$0xff] }
  0xf1   :  { %19977 = vmatprep.mubr.f32.mxu0 %v26325_v46  ;;  %v26336_v46 = vld [vmem:[#allocation76_spill] sm:$0xff] }
  0xf4   :  { %19978 = vmatmul.mubr.f32.gmra.mrb[18].mxu0 %v26326_v6  ;;  %v26337_v6 = vld [vmem:[#allocation77_spill] sm:$0xff] }
  0xf5   :  { %19980 = vmatprep.mubr.f32.mxu0 %v26327_v60  ;;  %v26338_v60 = vld [vmem:[#allocation78_spill] sm:$0xff] }
  0xf8   :  { %19981 = vmatmul.mubr.f32.gmra.mrb[20].mxu0 %v26328_v14  ;;  %v26339_v14 = vld [vmem:[#allocation81_spill] sm:$0xff] }
  0xf9   :  { %19983 = vmatprep.mubr.f32.mxu0 %v26329_v36  ;;  %v26340_v36 = vld [vmem:[#allocation83_spill] sm:$0xff] }
  0xfc   :  { %19984 = vmatmul.mubr.f32.gmra.mrb[22].mxu0 %v26330_v32  ;;  %v26341_v32 = vld [vmem:[#allocation84_spill] sm:$0xff] }
  0xfd   :  { %19986 = vmatprep.mubr.f32.mxu0 %v26331_v15  ;;  %v26342_v15 = vld [vmem:[#allocation87_spill] sm:$0xff] }
 0x100   :  { %19987 = vmatmul.mubr.f32.gmra.mrb[24].mxu0 %v26332_v4  ;;  %v26343_v4 = vld [vmem:[#allocation89_spill] sm:$0xff] }
 0x101   :  { %19989 = vmatprep.mubr.f32.mxu0 %v26333_v44  ;;  %v26344_v44 = vld [vmem:[#allocation90_spill] sm:$0xff] }
 0x104   :  { %19990 = vmatmul.mubr.f32.gmra.mrb[26].mxu0 %v26334_v9  ;;  %v26345_v9 = vld [vmem:[#allocation92_spill] sm:$0xff] }
 0x105   :  { %19992 = vmatprep.mubr.f32.mxu0 %v26335_v31  ;;  %v26346_v31 = vld [vmem:[#allocation95_spill] sm:$0xff] }
 0x108   :  { %19993 = vmatmul.mubr.f32.gmra.mrb[28].mxu0 %v26336_v46  ;;  %v26380_v46 = vld [vmem:[#allocation80_spill] sm:$0xff] }
 0x109   :  { %19995 = vmatprep.mubr.f32.mxu0 %v26337_v6  ;;  %v26379_v6 = vld [vmem:[#allocation79_spill] sm:$0xff] }
 0x10c   :  { %19996 = vmatmul.mubr.f32.gmra.mrb[30].mxu0 %v26338_v60  ;;  %v26347_v60 = vld [vmem:[#allocation99_spill] sm:$0xff] }
 0x10d   :  { %19998 = vmatprep.mubr.f32.mxu0 %v26339_v14  ;;  %v26378_v14 = vld [vmem:[#allocation75_spill] sm:$0xff] }
 0x110   :  { %19999 = vmatmul.mubr.f32.gmra.mrb[32].mxu0 %v26340_v36  ;;  %v26377_v36 = vld [vmem:[#allocation73_spill] sm:$0xff] }
 0x111   :  { %20001 = vmatprep.mubr.f32.mxu0 %v26341_v32  ;;  %v26376_v32 = vld [vmem:[#allocation72_spill] sm:$0xff] }
 0x114   :  { %20002 = vmatmul.mubr.f32.gmra.mrb[34].mxu0 %v26342_v15  ;;  %v26375_v15 = vld [vmem:[#allocation71_spill] sm:$0xff] }
 0x115   :  { %20004 = vmatprep.mubr.f32.mxu0 %v26343_v4  ;;  %v26374_v4 = vld [vmem:[#allocation69_spill] sm:$0xff] }
 0x118   :  { %20005 = vmatmul.mubr.f32.gmra.mrb[36].mxu0 %v26344_v44  ;;  %v26373_v44 = vld [vmem:[#allocation65_spill] sm:$0xff] }
 0x119   :  { %20007 = vmatprep.mubr.f32.mxu0 %v26345_v9  ;;  %v26372_v9 = vld [vmem:[#allocation64_spill] sm:$0xff] }
 0x11c   :  { %20008 = vmatmul.mubr.f32.gmra.mrb[38].mxu0 %v26346_v31  ;;  %v26371_v31 = vld [vmem:[#allocation61_spill] sm:$0xff] }
 0x11d   :  { %20010 = vmatprep.mubr.f32.mxu0 %v23826_v47  ;;  %v26370_v47 = vld [vmem:[#allocation60_spill] sm:$0xff] }
 0x120   :  { %20011 = vmatmul.mubr.f32.gmra.mrb[40].mxu0 %v23834_v43  ;;  %v26369_v43 = vld [vmem:[#allocation57_spill] sm:$0xff] }
 0x121   :  { %20013 = vmatprep.mubr.f32.mxu0 %v26347_v60  ;;  %v26368_v60 = vld [vmem:[#allocation56_spill] sm:$0xff] }
 0x124   :  { %20014 = vmatmul.mubr.f32.gmra.mrb[42].mxu0 %v23864_v33  ;;  %v26367_v33 = vld [vmem:[#allocation55_spill] sm:$0xff] }
 0x125   :  { %20016 = vmatprep.mubr.f32.mxu0 %v23873_v30  ;;  %v26366_v30 = vld [vmem:[#allocation54_spill] sm:$0xff] }
 0x128   :  { %20017 = vmatmul.mubr.f32.gmra.mrb[44].mxu0 %v23878_v24  ;;  %v26365_v24 = vld [vmem:[#allocation49_spill] sm:$0xff] }
 0x129   :  { %20019 = vmatprep.mubr.f32.mxu0 %v23897_v61  ;;  %v26364_v61 = vld [vmem:[#allocation48_spill] sm:$0xff] }
 0x12c   :  { %20020 = vmatmul.mubr.f32.gmra.mrb[46].mxu0 %v23911_v53  ;;  %v26363_v53 = vld [vmem:[#allocation45_spill] sm:$0xff] }
 0x12d   :  { %20022 = vmatprep.mubr.f32.mxu0 %v23913_v28  ;;  %v26362_v28 = vld [vmem:[#allocation44_spill] sm:$0xff] }
 0x130   :  { %20023 = vmatmul.mubr.f32.gmra.mrb[48].mxu0 %v23932_v13  ;;  %v26348_v13 = vld [vmem:[#allocation21_spill] sm:$0xff] }
 0x131   :  { %20025 = vmatprep.mubr.f32.mxu0 %v23934_v55  ;;  %v26393_v17 = vand.u32 4294901760, %v26348_v13 }
 0x134   :  { %20026 = vmatmul.mubr.f32.gmra.mrb[50].mxu0 %v23959_v37  ;;  %v26349_v37 = vand.u32 4294901760, %v23351_v22  ;;  %v26357_v22 = vld [vmem:[#allocation33_spill] sm:$0xff] }
 0x135   :  { %20028 = vmatprep.mubr.f32.mxu0 %v23962_v49  ;;  %v26350_v49 = vand.u32 4294901760, %v23353_v23  ;;  %v26358_v23 = vld [vmem:[#allocation38_spill] sm:$0xff] }
 0x137   :  { %v24147_v55 = vpack.c.bf16 %v26350_v49, %v26349_v37  ;;  %v26359_v37 = vld [vmem:[#allocation39_spill] sm:$0xff]  ;;  %v26360_v49 = vld [vmem:[#allocation40_spill] sm:$0xff] }
 0x138   :  { %20029 = vmatmul.mubr.f32.gmra.mrb[52].mxu0 %v23987_v50  ;;  %v26351_v50 = vld [vmem:[#allocation23_spill] sm:$0xff] }
 0x139   :  { %20031 = vmatprep.mubr.f32.mxu0 %v23993_v40  ;;  %v26352_v40 = vld [vmem:[#allocation24_spill] sm:$0xff]  ;;  %v26394_v10 = vand.u32 4294901760, %v26351_v50 }
 0x13c   :  { %20032 = vmatmul.mubr.f32.gmra.mrb[54].mxu0 %v24013_v25  ;;  %v26361_v25 = vld [vmem:[#allocation41_spill] sm:$0xff] }
 0x13d   :  { %20034 = vmatprep.mubr.f32.mxu0 %v24018_v63  ;;  %v26356_v63 = vld [vmem:[#allocation32_spill] sm:$0xff] }
 0x140   :  { %20035 = vmatmul.mubr.f32.gmra.mrb[56].mxu0 %v24034_v20  ;;  %v26353_v20 = vld [vmem:[#allocation25_spill] sm:$0xff] }
 0x141   :  { %20037 = vmatprep.mubr.f32.mxu0 %v24040_v3  ;;  %v26354_v3 = vld [vmem:[#allocation28_spill] sm:$0xff] }
 0x144   :  { %20038 = vmatmul.mubr.f32.gmra.mrb[58].mxu0 %v24050_v51  ;;  %v26355_v51 = vld [vmem:[#allocation29_spill] sm:$0xff] }
 0x145   :  { %20044 = vmatprep.mubr.f32.mxu0 %v26348_v13  ;;  %v26401_v13 = vand.u32 4294901760, %v26358_v23 }
 0x148   :  { %20045 = vmatmul.mubr.f32.vlgmr.msra.gmra.mrb[0].mxu0 %v26351_v50  ;;  %v26404_v50 = vand.u32 4294901760, %v26361_v25 }
 0x149   :  { %20047 = vmatprep.mubr.f32.mxu0 %v26352_v40  ;;  %21691 = vmatpush3.bf16.msra.mxu0 %v23338_v16 }
 0x14a   :  { %21693 = vmatprep.subr.bf16.mxu0 %v24147_v55 }
 0x14c   :  { %20048 = vmatmul.mubr.f32.gmra.mrb[2].mxu0 %v26353_v20 }
 0x14d   :  { %20050 = vmatprep.mubr.f32.mxu0 %v26354_v3 }
 0x150   :  { %20051 = vmatmul.mubr.f32.gmra.mrb[4].mxu0 %v26355_v51 }
 0x151   :  { %20053 = vmatprep.mubr.f32.mxu0 %v26356_v63 }
 0x154   :  { %20054 = vmatmul.mubr.f32.gmra.mrb[6].mxu0 %v26357_v22 }
 0x155   :  { %20056 = vmatprep.mubr.f32.mxu0 %v26358_v23 }
 0x158   :  { %20057 = vmatmul.mubr.f32.gmra.mrb[8].mxu0 %v26359_v37 }
 0x159   :  { %20059 = vmatprep.mubr.f32.mxu0 %v26360_v49 }
 0x15c   :  { %20060 = vmatmul.mubr.f32.gmra.mrb[10].mxu0 %v26361_v25  ;;  %v26411_v25 = vand.u32 4294901760, %v26368_v60 }
 0x15d   :  { %20062 = vmatprep.mubr.f32.mxu0 %v26362_v28 }
 0x160   :  { %20063 = vmatmul.mubr.f32.gmra.mrb[12].mxu0 %v26363_v53 }
 0x161   :  { %20065 = vmatprep.mubr.f32.mxu0 %v26364_v61 }
 0x164   :  { %20066 = vmatmul.mubr.f32.gmra.mrb[14].mxu0 %v26365_v24 }
 0x165   :  { %20068 = vmatprep.mubr.f32.mxu0 %v26366_v30 }
 0x168   :  { %20069 = vmatmul.mubr.f32.gmra.mrb[16].mxu0 %v26367_v33 }
 0x169   :  { %20071 = vmatprep.mubr.f32.mxu0 %v26368_v60 }
 0x16c   :  { %20072 = vmatmul.mubr.f32.gmra.mrb[18].mxu0 %v26369_v43 }
 0x16d   :  { %20074 = vmatprep.mubr.f32.mxu0 %v26370_v47 }
 0x170   :  { %20075 = vmatmul.mubr.f32.gmra.mrb[20].mxu0 %v26371_v31 }
 0x171   :  { %20077 = vmatprep.mubr.f32.mxu0 %v26372_v9 }
 0x174   :  { %20078 = vmatmul.mubr.f32.gmra.mrb[22].mxu0 %v26373_v44 }
 0x175   :  { %20080 = vmatprep.mubr.f32.mxu0 %v26374_v4 }
 0x178   :  { %20081 = vmatmul.mubr.f32.gmra.mrb[24].mxu0 %v26375_v15 }
 0x179   :  { %20083 = vmatprep.mubr.f32.mxu0 %v26376_v32 }
 0x17c   :  { %20084 = vmatmul.mubr.f32.gmra.mrb[26].mxu0 %v26377_v36 }
 0x17d   :  { %20086 = vmatprep.mubr.f32.mxu0 %v26378_v14 }
 0x180   :  { %20087 = vmatmul.mubr.f32.gmra.mrb[28].mxu0 %v26379_v6 }
 0x181   :  { %20089 = vmatprep.mubr.f32.mxu0 %v26380_v46 }
 0x184   :  { %20090 = vmatmul.mubr.f32.gmra.mrb[30].mxu0 %v26381_v12 }
 0x185   :  { %20092 = vmatprep.mubr.f32.mxu0 %v26382_v54 }
 0x188   :  { %20093 = vmatmul.mubr.f32.gmra.mrb[32].mxu0 %v26383_v42 }
 0x189   :  { %20095 = vmatprep.mubr.f32.mxu0 %v26384_v19 }
 0x18c   :  { %20096 = vmatmul.mubr.f32.gmra.mrb[34].mxu0 %v26385_v39 }
 0x18d   :  { %20098 = vmatprep.mubr.f32.mxu0 %v26386_v38 }
 0x190   :  { %20099 = vmatmul.mubr.f32.gmra.mrb[36].mxu0 %v26387_v1 }
 0x191   :  { %20101 = vmatprep.mubr.f32.mxu0 %v26388_v0 }
 0x194   :  { %20102 = vmatmul.mubr.f32.gmra.mrb[38].mxu0 %v23830_v41 }
 0x195   :  { %20104 = vmatprep.mubr.f32.mxu0 %v23849_v62 }
 0x198   :  { %20105 = vmatmul.mubr.f32.gmra.mrb[40].mxu0 %v23859_v27 }
 0x199   :  { %20107 = vmatprep.mubr.f32.mxu0 %v26389_v35 }
 0x19c   :  { %20108 = vmatmul.mubr.f32.gmra.mrb[42].mxu0 %v23884_v11 }
 0x19d   :  { %20110 = vmatprep.mubr.f32.mxu0 %v23895_v5 }
 0x1a0   :  { %20111 = vmatmul.mubr.f32.gmra.mrb[44].mxu0 %v23902_v58 }
 0x1a1   :  { %20113 = vmatprep.mubr.f32.mxu0 %v23921_v8 }
 0x1a4   :  { %20114 = vmatmul.mubr.f32.gmra.mrb[46].mxu0 %v23930_v2 }
 0x1a5   :  { %20116 = vmatprep.mubr.f32.mxu0 %v23937_v59 }
 0x1a8   :  { %20117 = vmatmul.mubr.f32.gmra.mrb[48].mxu0 %v26390_v34 }
 0x1a9   :  { %20119 = vmatprep.mubr.f32.mxu0 %v26391_v21 }
 0x1ac   :  { %20120 = vmatmul.mubr.f32.gmra.mrb[50].mxu0 %v23979_v48 }
 0x1ad   :  { %20122 = vmatprep.mubr.f32.mxu0 %v23985_v52 }
 0x1b0   :  { %20123 = vmatmul.mubr.f32.gmra.mrb[52].mxu0 %v24011_v29  ;;  %v26395_v29 = vand.u32 4294901760, %v26352_v40  ;;  %v26405_v40 = vand.u32 4294901760, %v26362_v28  ;;  %v26412_v28 = vand.u32 4294901760, %v26369_v43  ;;  %v26419_v43 = vand.u32 4294901760, %v26376_v32 }
 0x1b1   :  { %20125 = vmatprep.mubr.f32.mxu0 %v24016_v56  ;;  %v26426_v32 = vand.u32 4294901760, %v26383_v42  ;;  %v26433_v42 = vand.u32 4294901760, %v23849_v62  ;;  %v26440_v62 = vand.u32 4294901760, %v23930_v2  ;;  %v26448_v2 = vand.u32 4294901760, %v24016_v56  ;;  %v26459_v56 = vld [vmem:[#allocation20_spill] sm:$0xff] }
 0x1b4   :  { %20126 = vmatmul.mubr.f32.gmra.mrb[54].mxu0 %v26392_v18 }
 0x1b5   :  { %20128 = vmatprep.mubr.f32.mxu0 %v24038_v57  ;;  %v26396_v57 = vand.u32 4294901760, %v26353_v20  ;;  %v26403_v20 = vand.u32 4294901760, %v26360_v49  ;;  %v26458_v49 = vld [vmem:[#allocation19_spill] sm:$0xff] }
 0x1b8   :  { %20129 = vmatmul.mubr.f32.gmra.mrb[56].mxu0 %v24048_v7 }
 0x1b9   :  { %20131 = vmatprep.mubr.f32.mxu0 %v24057_v45  ;;  %v26397_v45 = vand.u32 4294901760, %v26354_v3  ;;  %v26409_v3 = vand.u32 4294901760, %v26366_v30  ;;  %v26416_v30 = vand.u32 4294901760, %v26373_v44  ;;  %v26423_v44 = vand.u32 4294901760, %v26380_v46 }
 0x1ba   :  { %v26430_v46 = vand.u32 4294901760, %v26387_v1  ;;  %v26437_v1 = vand.u32 4294901760, %v23895_v5  ;;  %v26444_v5 = vand.u32 4294901760, %v23979_v48  ;;  %v26453_v48 = vld [vmem:[#allocation123_spill] sm:$0xff] }
 0x1bc   :  { %20132 = vmatmul.mubr.f32.gmra.mrb[58].mxu0 %v24064_v26  ;;  %v26398_v26 = vand.u32 4294901760, %v26355_v51  ;;  %v26410_v51 = vand.u32 4294901760, %v26367_v33  ;;  %v26417_v33 = vand.u32 4294901760, %v26374_v4  ;;  %v26424_v4 = vand.u32 4294901760, %v26381_v12 }
 0x1bd   :  { %20138 = vmatprep.mubr.f32.mxu0 %v26393_v17  ;;  %v26399_v17 = vand.u32 4294901760, %v26356_v63  ;;  %v26407_v63 = vand.u32 4294901760, %v26364_v61  ;;  %v26414_v61 = vand.u32 4294901760, %v26371_v31  ;;  %v26429_v31 = vand.u32 4294901760, %v26386_v38 }
 0x1be   :  { %v26431_v12 = vand.u32 4294901760, %v26388_v0  ;;  %v26436_v38 = vand.u32 4294901760, %v23884_v11  ;;  %v26438_v0 = vand.u32 4294901760, %v23902_v58  ;;  %v26443_v11 = vand.u32 4294901760, %v26391_v21 }
 0x1bf   :  { %v26445_v58 = vand.u32 4294901760, %v23985_v52  ;;  %v26452_v21 = vand.u32 4294901760, %v24048_v7  ;;  %v26455_v52 = vld [vmem:[#allocation124_spill] sm:$0xff]  ;;  %v26462_v7 = vld [vmem:[#allocation27_spill] sm:$0xff] }
 0x1c0   :  { %20139 = vmatmul.mubr.f32.vlgmr.msra.gmra.mrb[0].mxu0 %v26394_v10  ;;  %v26400_v10 = vand.u32 4294901760, %v26357_v22  ;;  %v26454_v22 = vand.u32 4294901760, %v26453_v48  ;;  %v26456_v23 = vand.u32 4294901760, %v26455_v52  ;;  %v102_v48 = vld [vmem:[#allocation8] sm:$0xff] }
 0x1c1   :  { %20141 = vmatprep.mubr.f32.mxu0 %v26395_v29  ;;  %21695 = vmatpush3.bf16.msra.mxu0 %v24147_v55  ;;  %v26402_v55 = vand.u32 4294901760, %v26359_v37  ;;  %v26406_v29 = vand.u32 4294901760, %v26363_v53  ;;  %v26413_v53 = vand.u32 4294901760, %v26370_v47  ;;  %v26420_v47 = vand.u32 4294901760, %v26377_v36  ;;  %v26457_v37 = vld [vmem:[#allocation18_spill] sm:$0xff] }
 0x1c2   :  { %21697 = vmatprep.subr.bf16.mxu0 %v23338_v16  ;;  %v26427_v36 = vand.u32 4294901760, %v26384_v19  ;;  %v26434_v19 = vand.u32 4294901760, %v23859_v27  ;;  %v26441_v27 = vand.u32 4294901760, %v23937_v59  ;;  %v26449_v59 = vand.u32 4294901760, %v26392_v18  ;;  %v26460_v18 = vld [vmem:[#allocation22_spill] sm:$0xff] }
 0x1c4   :  { %20142 = vmatmul.mubr.f32.gmra.mrb[2].mxu0 %v26396_v57  ;;  %v26408_v57 = vand.u32 4294901760, %v26365_v24  ;;  %v26415_v24 = vand.u32 4294901760, %v26372_v9  ;;  %v26422_v9 = vand.u32 4294901760, %v26379_v6 }
 0x1c5   :  { %20144 = vmatprep.mubr.f32.mxu0 %v26397_v45  ;;  %v26418_v45 = vand.u32 4294901760, %v26375_v15  ;;  %v26425_v15 = vand.u32 4294901760, %v26382_v54  ;;  %v26432_v54 = vand.u32 4294901760, %v23830_v41  ;;  %v26439_v41 = vand.u32 4294901760, %v23921_v8  ;;  %v26446_v8 = vld [vmem:[#allocation115_spill] sm:$0xff] }
 0x1c6   :  { %v26447_v6 = vand.u32 4294901760, %v26446_v8  ;;  %v26510_v8 = vld [vmem:[#allocation113_spill] sm:$0xff] }
 0x1c8   :  { %20145 = vmatmul.mubr.f32.gmra.mrb[4].mxu0 %v26398_v26  ;;  %v26421_v26 = vand.u32 4294901760, %v26378_v14  ;;  %v26428_v14 = vand.u32 4294901760, %v26385_v39  ;;  %v26435_v39 = vand.u32 4294901760, %v26389_v35  ;;  %v26442_v35 = vand.u32 4294901760, %v26390_v34  ;;  %v26450_v34 = vld [vmem:[#allocation120_spill] sm:$0xff] }
 0x1c9   :  { %20147 = vmatprep.mubr.f32.mxu0 %v26399_v17  ;;  %v26451_v60 = vand.u32 4294901760, %v26450_v34  ;;  %v26461_v17 = vld [vmem:[#allocation26_spill] sm:$0xff]  ;;  %v26514_v34 = vld [vmem:[#allocation119_spill] sm:$0xff] }
 0x1cc   :  { %20148 = vmatmul.mubr.f32.gmra.mrb[6].mxu0 %v26400_v10  ;;  %v26463_v10 = vld [vmem:[#allocation30_spill] sm:$0xff] }
 0x1cd   :  { %20150 = vmatprep.mubr.f32.mxu0 %v26401_v13  ;;  %v26464_v13 = vld [vmem:[#allocation31_spill] sm:$0xff] }
 0x1d0   :  { %20151 = vmatmul.mubr.f32.gmra.mrb[8].mxu0 %v26402_v55  ;;  %v26465_v55 = vld [vmem:[#allocation34_spill] sm:$0xff] }
 0x1d1   :  { %20153 = vmatprep.mubr.f32.mxu0 %v26403_v20  ;;  %v26466_v20 = vld [vmem:[#allocation35_spill] sm:$0xff] }
 0x1d4   :  { %20154 = vmatmul.mubr.f32.gmra.mrb[10].mxu0 %v26404_v50  ;;  %v26467_v50 = vld [vmem:[#allocation36_spill] sm:$0xff] }
 0x1d5   :  { %20156 = vmatprep.mubr.f32.mxu0 %v26405_v40  ;;  %v26468_v40 = vld [vmem:[#allocation37_spill] sm:$0xff] }
 0x1d8   :  { %20157 = vmatmul.mubr.f32.gmra.mrb[12].mxu0 %v26406_v29  ;;  %v26469_v29 = vld [vmem:[#allocation42_spill] sm:$0xff] }
 0x1d9   :  { %20159 = vmatprep.mubr.f32.mxu0 %v26407_v63  ;;  %v26471_v63 = vld [vmem:[#allocation46_spill] sm:$0xff] }
 0x1dc   :  { %20160 = vmatmul.mubr.f32.gmra.mrb[14].mxu0 %v26408_v57  ;;  %v26472_v57 = vld [vmem:[#allocation47_spill] sm:$0xff] }
 0x1dd   :  { %20162 = vmatprep.mubr.f32.mxu0 %v26409_v3  ;;  %v26473_v3 = vld [vmem:[#allocation50_spill] sm:$0xff] }
 0x1e0   :  { %20163 = vmatmul.mubr.f32.gmra.mrb[16].mxu0 %v26410_v51  ;;  %v26474_v51 = vld [vmem:[#allocation51_spill] sm:$0xff] }
 0x1e1   :  { %20165 = vmatprep.mubr.f32.mxu0 %v26411_v25  ;;  %v26475_v25 = vld [vmem:[#allocation52_spill] sm:$0xff] }
 0x1e4   :  { %20166 = vmatmul.mubr.f32.gmra.mrb[18].mxu0 %v26412_v28  ;;  %v26476_v28 = vld [vmem:[#allocation53_spill] sm:$0xff] }
 0x1e5   :  { %20168 = vmatprep.mubr.f32.mxu0 %v26413_v53  ;;  %v26477_v53 = vld [vmem:[#allocation58_spill] sm:$0xff] }
 0x1e8   :  { %20169 = vmatmul.mubr.f32.gmra.mrb[20].mxu0 %v26414_v61  ;;  %v26478_v61 = vld [vmem:[#allocation59_spill] sm:$0xff] }
 0x1e9   :  { %20171 = vmatprep.mubr.f32.mxu0 %v26415_v24  ;;  %v26479_v24 = vld [vmem:[#allocation62_spill] sm:$0xff] }
 0x1ec   :  { %20172 = vmatmul.mubr.f32.gmra.mrb[22].mxu0 %v26416_v30  ;;  %v26480_v30 = vld [vmem:[#allocation63_spill] sm:$0xff] }
 0x1ed   :  { %20174 = vmatprep.mubr.f32.mxu0 %v26417_v33  ;;  %v26481_v33 = vld [vmem:[#allocation66_spill] sm:$0xff] }
 0x1f0   :  { %20175 = vmatmul.mubr.f32.gmra.mrb[24].mxu0 %v26418_v45  ;;  %v26482_v45 = vld [vmem:[#allocation67_spill] sm:$0xff] }
 0x1f1   :  { %20177 = vmatprep.mubr.f32.mxu0 %v26419_v43  ;;  %v26483_v43 = vld [vmem:[#allocation68_spill] sm:$0xff] }
 0x1f4   :  { %20178 = vmatmul.mubr.f32.gmra.mrb[26].mxu0 %v26420_v47  ;;  %v26484_v47 = vld [vmem:[#allocation70_spill] sm:$0xff] }
 0x1f5   :  { %20180 = vmatprep.mubr.f32.mxu0 %v26421_v26  ;;  %v26485_v26 = vld [vmem:[#allocation74_spill] sm:$0xff] }
 0x1f8   :  { %20181 = vmatmul.mubr.f32.gmra.mrb[28].mxu0 %v26422_v9  ;;  %v26486_v9 = vld [vmem:[#allocation76_spill] sm:$0xff] }
 0x1f9   :  { %20183 = vmatprep.mubr.f32.mxu0 %v26423_v44  ;;  %v26487_v44 = vld [vmem:[#allocation77_spill] sm:$0xff] }
 0x1fc   :  { %20184 = vmatmul.mubr.f32.gmra.mrb[30].mxu0 %v26424_v4  ;;  %v26488_v4 = vld [vmem:[#allocation78_spill] sm:$0xff] }
 0x1fd   :  { %20186 = vmatprep.mubr.f32.mxu0 %v26425_v15  ;;  %v26489_v15 = vld [vmem:[#allocation81_spill] sm:$0xff] }
 0x200   :  { %20187 = vmatmul.mubr.f32.gmra.mrb[32].mxu0 %v26426_v32  ;;  %v26490_v32 = vld [vmem:[#allocation83_spill] sm:$0xff] }
 0x201   :  { %20189 = vmatprep.mubr.f32.mxu0 %v26427_v36  ;;  %v26491_v36 = vld [vmem:[#allocation84_spill] sm:$0xff] }
 0x204   :  { %20190 = vmatmul.mubr.f32.gmra.mrb[34].mxu0 %v26428_v14  ;;  %v26492_v14 = vld [vmem:[#allocation87_spill] sm:$0xff] }
 0x205   :  { %20192 = vmatprep.mubr.f32.mxu0 %v26429_v31  ;;  %v26493_v31 = vld [vmem:[#allocation89_spill] sm:$0xff] }
 0x208   :  { %20193 = vmatmul.mubr.f32.gmra.mrb[36].mxu0 %v26430_v46  ;;  %v26494_v46 = vld [vmem:[#allocation90_spill] sm:$0xff] }
 0x209   :  { %20195 = vmatprep.mubr.f32.mxu0 %v26431_v12  ;;  %v26495_v12 = vld [vmem:[#allocation92_spill] sm:$0xff] }
 0x20c   :  { %20196 = vmatmul.mubr.f32.gmra.mrb[38].mxu0 %v26432_v54  ;;  %v26496_v54 = vld [vmem:[#allocation95_spill] sm:$0xff] }
 0x20d   :  { %20198 = vmatprep.mubr.f32.mxu0 %v26433_v42  ;;  %v26497_v42 = vld [vmem:[#allocation97_spill] sm:$0xff] }
 0x210   :  { %20199 = vmatmul.mubr.f32.gmra.mrb[40].mxu0 %v26434_v19  ;;  %v26498_v19 = vld [vmem:[#allocation98_spill] sm:$0xff] }
 0x211   :  { %20201 = vmatprep.mubr.f32.mxu0 %v26435_v39  ;;  %v26499_v39 = vld [vmem:[#allocation99_spill] sm:$0xff] }
 0x214   :  { %20202 = vmatmul.mubr.f32.gmra.mrb[42].mxu0 %v26436_v38  ;;  %v26500_v38 = vld [vmem:[#allocation101_spill] sm:$0xff] }
 0x215   :  { %20204 = vmatprep.mubr.f32.mxu0 %v26437_v1  ;;  %v26501_v1 = vld [vmem:[#allocation102_spill] sm:$0xff] }
 0x218   :  { %20205 = vmatmul.mubr.f32.gmra.mrb[44].mxu0 %v26438_v0  ;;  %v26502_v0 = vld [vmem:[#allocation103_spill] sm:$0xff] }
 0x219   :  { %20207 = vmatprep.mubr.f32.mxu0 %v26439_v41  ;;  %v26503_v41 = vld [vmem:[#allocation104_spill] sm:$0xff] }
 0x21c   :  { %20208 = vmatmul.mubr.f32.gmra.mrb[46].mxu0 %v26440_v62  ;;  %v26504_v62 = vld [vmem:[#allocation105_spill] sm:$0xff] }
 0x21d   :  { %20210 = vmatprep.mubr.f32.mxu0 %v26441_v27  ;;  %v26505_v27 = vld [vmem:[#allocation106_spill] sm:$0xff] }
 0x220   :  { %20211 = vmatmul.mubr.f32.gmra.mrb[48].mxu0 %v26442_v35  ;;  %v26506_v35 = vld [vmem:[#allocation107_spill] sm:$0xff] }
 0x221   :  { %20213 = vmatprep.mubr.f32.mxu0 %v26443_v11  ;;  %v26507_v11 = vld [vmem:[#allocation108_spill] sm:$0xff] }
 0x224   :  { %20214 = vmatmul.mubr.f32.gmra.mrb[50].mxu0 %v26444_v5  ;;  %v26508_v5 = vld [vmem:[#allocation111_spill] sm:$0xff] }
 0x225   :  { %20216 = vmatprep.mubr.f32.mxu0 %v26445_v58  ;;  %v26509_v58 = vld [vmem:[#allocation112_spill] sm:$0xff] }
 0x228   :  { %20217 = vmatmul.mubr.f32.gmra.mrb[52].mxu0 %v26447_v6  ;;  %v26511_v6 = vld [vmem:[#allocation114_spill] sm:$0xff] }
 0x229   :  { %20219 = vmatprep.mubr.f32.mxu0 %v26448_v2  ;;  %v26512_v2 = vld [vmem:[#allocation116_spill] sm:$0xff] }
 0x22c   :  { %20220 = vmatmul.mubr.f32.gmra.mrb[54].mxu0 %v26449_v59  ;;  %v26513_v59 = vld [vmem:[#allocation117_spill] sm:$0xff] }
 0x22d   :  { %20222 = vmatprep.mubr.f32.mxu0 %v26451_v60  ;;  %v26515_v60 = vld [vmem:[#allocation121_spill] sm:$0xff] }
 0x230   :  { %20223 = vmatmul.mubr.f32.gmra.mrb[56].mxu0 %v26452_v21  ;;  %v26516_v21 = vld [vmem:[#allocation122_spill] sm:$0xff] }
 0x231   :  { %20225 = vmatprep.mubr.f32.mxu0 %v26454_v22  ;;  %v3318_v22 = vsel %vm140_vm0, %v102_v48, 0 }
 0x232   :  { %v24437_v52 = vand.u32 4294901760, %v3318_v22 }
 0x234   :  { %20226 = vmatmul.mubr.f32.gmra.mrb[58].mxu0 %v26456_v23  ;;  %v24441_v23 = vsub.f32 %v3318_v22, %v24437_v52 }
 0x235   :  { %20232 = vmatprep.mubr.f32.mxu0 %v26457_v37 }
 0x238   :  { %20233 = vmatmul.mubr.f32.vlgmr.msra.gmra.mrb[0].mxu0 %v26458_v49 }
 0x239   :  { %20235 = vmatprep.mubr.f32.mxu0 %v26459_v56  ;;  %21699 = vmatpush3.bf16.msra.mxu0 %v23338_v16  ;;  %v26470_v16 = vld [vmem:[#allocation43_spill] sm:$0xff] }
 0x23c   :  { %20236 = vmatmul.mubr.f32.gmra.mrb[2].mxu0 %v26460_v18 }
 0x23d   :  { %20238 = vmatprep.mubr.f32.mxu0 %v26461_v17 }
 0x240   :  { %20239 = vmatmul.mubr.f32.gmra.mrb[4].mxu0 %v26462_v7 }
 0x241   :  { %20241 = vmatprep.mubr.f32.mxu0 %v26463_v10 }
 0x244   :  { %20242 = vmatmul.mubr.f32.gmra.mrb[6].mxu0 %v26464_v13 }
 0x245   :  { %20244 = vmatprep.mubr.f32.mxu0 %v26465_v55 }
 0x248   :  { %20245 = vmatmul.mubr.f32.gmra.mrb[8].mxu0 %v26466_v20 }
 0x249   :  { %20247 = vmatprep.mubr.f32.mxu0 %v26467_v50 }
 0x24c   :  { %20248 = vmatmul.mubr.f32.gmra.mrb[10].mxu0 %v26468_v40 }
 0x24d   :  { %20250 = vmatprep.mubr.f32.mxu0 %v26469_v29 }
 0x250   :  { %20251 = vmatmul.mubr.f32.gmra.mrb[12].mxu0 %v26470_v16 }
 0x251   :  { %20253 = vmatprep.mubr.f32.mxu0 %v26471_v63 }
 0x254   :  { %20254 = vmatmul.mubr.f32.gmra.mrb[14].mxu0 %v26472_v57 }
 0x255   :  { %20256 = vmatprep.mubr.f32.mxu0 %v26473_v3 }
 0x258   :  { %20257 = vmatmul.mubr.f32.gmra.mrb[16].mxu0 %v26474_v51 }
 0x259   :  { %20259 = vmatprep.mubr.f32.mxu0 %v26475_v25 }
 0x25c   :  { %20260 = vmatmul.mubr.f32.gmra.mrb[18].mxu0 %v26476_v28 }
 0x25d   :  { %20262 = vmatprep.mubr.f32.mxu0 %v26477_v53 }
 0x260   :  { %20263 = vmatmul.mubr.f32.gmra.mrb[20].mxu0 %v26478_v61 }
 0x261   :  { %20265 = vmatprep.mubr.f32.mxu0 %v26479_v24 }
 0x264   :  { %20266 = vmatmul.mubr.f32.gmra.mrb[22].mxu0 %v26480_v30 }
 0x265   :  { %20268 = vmatprep.mubr.f32.mxu0 %v26481_v33 }
 0x268   :  { %20269 = vmatmul.mubr.f32.gmra.mrb[24].mxu0 %v26482_v45 }
 0x269   :  { %20271 = vmatprep.mubr.f32.mxu0 %v26483_v43 }
 0x26c   :  { %20272 = vmatmul.mubr.f32.gmra.mrb[26].mxu0 %v26484_v47 }
 0x26d   :  { %20274 = vmatprep.mubr.f32.mxu0 %v26485_v26 }
 0x270   :  { %20275 = vmatmul.mubr.f32.gmra.mrb[28].mxu0 %v26486_v9 }
 0x271   :  { %20277 = vmatprep.mubr.f32.mxu0 %v26487_v44 }
 0x274   :  { %20278 = vmatmul.mubr.f32.gmra.mrb[30].mxu0 %v26488_v4 }
 0x275   :  { %20280 = vmatprep.mubr.f32.mxu0 %v26489_v15 }
 0x278   :  { %20281 = vmatmul.mubr.f32.gmra.mrb[32].mxu0 %v26490_v32 }
 0x279   :  { %20283 = vmatprep.mubr.f32.mxu0 %v26491_v36 }
 0x27c   :  { %20284 = vmatmul.mubr.f32.gmra.mrb[34].mxu0 %v26492_v14 }
 0x27d   :  { %20286 = vmatprep.mubr.f32.mxu0 %v26493_v31 }
 0x280   :  { %20287 = vmatmul.mubr.f32.gmra.mrb[36].mxu0 %v26494_v46 }
 0x281   :  { %20289 = vmatprep.mubr.f32.mxu0 %v26495_v12 }
 0x284   :  { %20290 = vmatmul.mubr.f32.gmra.mrb[38].mxu0 %v26496_v54 }
 0x285   :  { %20292 = vmatprep.mubr.f32.mxu0 %v26497_v42 }
 0x288   :  { %20293 = vmatmul.mubr.f32.gmra.mrb[40].mxu0 %v26498_v19 }
 0x289   :  { %20295 = vmatprep.mubr.f32.mxu0 %v26499_v39 }
 0x28c   :  { %20296 = vmatmul.mubr.f32.gmra.mrb[42].mxu0 %v26500_v38 }
 0x28d   :  { %20298 = vmatprep.mubr.f32.mxu0 %v26501_v1 }
 0x290   :  { %20299 = vmatmul.mubr.f32.gmra.mrb[44].mxu0 %v26502_v0 }
 0x291   :  { %20301 = vmatprep.mubr.f32.mxu0 %v26503_v41 }
 0x294   :  { %20302 = vmatmul.mubr.f32.gmra.mrb[46].mxu0 %v26504_v62 }
 0x295   :  { %20304 = vmatprep.mubr.f32.mxu0 %v26505_v27 }
 0x298   :  { %20305 = vmatmul.mubr.f32.gmra.mrb[48].mxu0 %v26506_v35 }
 0x299   :  { %20307 = vmatprep.mubr.f32.mxu0 %v26507_v11 }
 0x29c   :  { %20308 = vmatmul.mubr.f32.gmra.mrb[50].mxu0 %v26508_v5 }
 0x29d   :  { %20310 = vmatprep.mubr.f32.mxu0 %v26509_v58 }
 0x2a0   :  { %20311 = vmatmul.mubr.f32.gmra.mrb[52].mxu0 %v26510_v8 }
 0x2a1   :  { %20313 = vmatprep.mubr.f32.mxu0 %v26511_v6 }
 0x2a4   :  { %20314 = vmatmul.mubr.f32.gmra.mrb[54].mxu0 %v26512_v2 }
 0x2a5   :  { %20316 = vmatprep.mubr.f32.mxu0 %v26513_v59 }
 0x2a8   :  { %20317 = vmatmul.mubr.f32.gmra.mrb[56].mxu0 %v26514_v34 }
 0x2a9   :  { %20319 = vmatprep.mubr.f32.mxu0 %v26515_v60 }
 0x2ac   :  { %20320 = vmatmul.mubr.f32.gmra.mrb[58].mxu0 %v26516_v21 }
 0x2ad   :  { %20326 = vmatprep.mubr.f32.mxu0 %v26457_v37  ;;  %v24445_v37 = vand.u32 4294901760, %v24441_v23 }
 0x2b0   :  { %20327 = vmatmul.mubr.f32.vlgmr.msra.gmra.mrb[0].mxu0 %v26458_v49  ;;  %v3393_v49 = vsub.f32 %v24441_v23, %v24445_v37 }
 0x2b1   :  { %20329 = vmatprep.mubr.f32.mxu0 %v26459_v56 }
 0x2b2   :  { %v24451_v56 = vand.u32 4294901760, %v3393_v49 }
 0x2b4   :  { %20330 = vmatmul.mubr.f32.gmra.mrb[2].mxu0 %v26460_v18  ;;  %20420 = vmatprep.mubr.f32.mxu1 %v24451_v56  ;;  %v103_v18 = vld [vmem:[#allocation8 + $0x8] sm:$0xff] }
 0x2b5   :  { %20332 = vmatprep.mubr.f32.mxu0 %v26461_v17  ;;  %v3321_v17 = vsel %vm140_vm0, %v103_v18, 0 }
 0x2b8   :  { %20333 = vmatmul.mubr.f32.gmra.mrb[4].mxu0 %v26462_v7  ;;  %v24468_v7 = vand.u32 4294901760, %v3321_v17 }
 0x2b9   :  { %20335 = vmatprep.mubr.f32.mxu0 %v26463_v10 }
 0x2ba   :  { %v24471_v10 = vsub.f32 %v3321_v17, %v24468_v7 }
 0x2bc   :  { %20336 = vmatmul.mubr.f32.gmra.mrb[6].mxu0 %v26464_v13  ;;  %v24474_v13 = vand.u32 4294901760, %v24471_v10 }
 0x2bd   :  { %20338 = vmatprep.mubr.f32.mxu0 %v26465_v55 }
 0x2c0   :  { %20339 = vmatmul.mubr.f32.gmra.mrb[8].mxu0 %v26466_v20 }
 0x2c1   :  { %20341 = vmatprep.mubr.f32.mxu0 %v26467_v50 }
 0x2c4   :  { %20342 = vmatmul.mubr.f32.gmra.mrb[10].mxu0 %v26468_v40 }
 0x2c5   :  { %20344 = vmatprep.mubr.f32.mxu0 %v26469_v29  ;;  %v3403_v29 = vsub.f32 %v24471_v10, %v24474_v13 }
 0x2c8   :  { %20345 = vmatmul.mubr.f32.gmra.mrb[12].mxu0 %v26470_v16 }
 0x2c9   :  { %20347 = vmatprep.mubr.f32.mxu0 %v26471_v63 }
 0x2cc   :  { %20348 = vmatmul.mubr.f32.gmra.mrb[14].mxu0 %v26472_v57 }
 0x2cd   :  { %20350 = vmatprep.mubr.f32.mxu0 %v26473_v3 }
 0x2d0   :  { %20351 = vmatmul.mubr.f32.gmra.mrb[16].mxu0 %v26474_v51 }
 0x2d1   :  { %20353 = vmatprep.mubr.f32.mxu0 %v26475_v25 }
 0x2d4   :  { %20354 = vmatmul.mubr.f32.gmra.mrb[18].mxu0 %v26476_v28 }
 0x2d5   :  { %20356 = vmatprep.mubr.f32.mxu0 %v26477_v53 }
 0x2d8   :  { %20357 = vmatmul.mubr.f32.gmra.mrb[20].mxu0 %v26478_v61 }
 0x2d9   :  { %20359 = vmatprep.mubr.f32.mxu0 %v26479_v24  ;;  %v24481_v24 = vand.u32 4294901760, %v3403_v29 }
 0x2dc   :  { %20360 = vmatmul.mubr.f32.gmra.mrb[22].mxu0 %v26480_v30 }
 0x2dd   :  { %20362 = vmatprep.mubr.f32.mxu0 %v26481_v33 }
 0x2e0   :  { %20363 = vmatmul.mubr.f32.gmra.mrb[24].mxu0 %v26482_v45 }
 0x2e1   :  { %20365 = vmatprep.mubr.f32.mxu0 %v26483_v43 }
 0x2e4   :  { %20366 = vmatmul.mubr.f32.gmra.mrb[26].mxu0 %v26484_v47 }
 0x2e5   :  { %20368 = vmatprep.mubr.f32.mxu0 %v26485_v26 }
 0x2e8   :  { %20369 = vmatmul.mubr.f32.gmra.mrb[28].mxu0 %v26486_v9 }
 0x2e9   :  { %20371 = vmatprep.mubr.f32.mxu0 %v26487_v44 }
 0x2ec   :  { %20372 = vmatmul.mubr.f32.gmra.mrb[30].mxu0 %v26488_v4 }
 0x2ed   :  { %20374 = vmatprep.mubr.f32.mxu0 %v26489_v15 }
 0x2f0   :  { %20375 = vmatmul.mubr.f32.gmra.mrb[32].mxu0 %v26490_v32 }
 0x2f1   :  { %20377 = vmatprep.mubr.f32.mxu0 %v26491_v36 }
 0x2f4   :  { %20378 = vmatmul.mubr.f32.gmra.mrb[34].mxu0 %v26492_v14 }
 0x2f5   :  { %20380 = vmatprep.mubr.f32.mxu0 %v26493_v31 }
 0x2f8   :  { %20381 = vmatmul.mubr.f32.gmra.mrb[36].mxu0 %v26494_v46 }
 0x2f9   :  { %20383 = vmatprep.mubr.f32.mxu0 %v26495_v12 }
 0x2fc   :  { %20384 = vmatmul.mubr.f32.gmra.mrb[38].mxu0 %v26496_v54 }
 0x2fd   :  { %20386 = vmatprep.mubr.f32.mxu0 %v26497_v42 }
 0x300   :  { %20387 = vmatmul.mubr.f32.gmra.mrb[40].mxu0 %v26498_v19 }
 0x301   :  { %20389 = vmatprep.mubr.f32.mxu0 %v26499_v39 }
 0x304   :  { %20390 = vmatmul.mubr.f32.gmra.mrb[42].mxu0 %v26500_v38 }
 0x305   :  { %20392 = vmatprep.mubr.f32.mxu0 %v26501_v1 }
 0x308   :  { %20393 = vmatmul.mubr.f32.gmra.mrb[44].mxu0 %v26502_v0 }
 0x309   :  { %20395 = vmatprep.mubr.f32.mxu0 %v26503_v41 }
 0x30c   :  { %20396 = vmatmul.mubr.f32.gmra.mrb[46].mxu0 %v26504_v62 }
 0x30d   :  { %20398 = vmatprep.mubr.f32.mxu0 %v26505_v27 }
 0x310   :  { %20399 = vmatmul.mubr.f32.gmra.mrb[48].mxu0 %v26506_v35 }
 0x311   :  { %20401 = vmatprep.mubr.f32.mxu0 %v26507_v11 }
 0x314   :  { %20402 = vmatmul.mubr.f32.gmra.mrb[50].mxu0 %v26508_v5 }
 0x315   :  { %20404 = vmatprep.mubr.f32.mxu0 %v26509_v58 }
 0x318   :  { %20405 = vmatmul.mubr.f32.gmra.mrb[52].mxu0 %v26510_v8 }
 0x319   :  { %20407 = vmatprep.mubr.f32.mxu0 %v26511_v6 }
 0x31c   :  { %20408 = vmatmul.mubr.f32.gmra.mrb[54].mxu0 %v26512_v2 }
 0x31d   :  { %20410 = vmatprep.mubr.f32.mxu0 %v26513_v59 }
 0x320   :  { %20411 = vmatmul.mubr.f32.gmra.mrb[56].mxu0 %v26514_v34 }
 0x321   :  { %20413 = vmatprep.mubr.f32.mxu0 %v26515_v60 }
 0x324   :  { %20414 = vmatmul.mubr.f32.gmra.mrb[58].mxu0 %v26516_v21 }
 0x383   :  { %v20328_v55 = vpop.f32.mrb[0].mxu0 }
 0x384   :  { %v3327_v20 = vand.u32 4294901760, %v20328_v55  ;;  %v2959_v50 = vpop.f32.mrb[1].mxu0 }
 0x385   :  { %v3324_v40 = vand.u32 4294901760, %v2959_v50 }
 0x386   :  { %v3419_v16 = vsub.f32 %v20328_v55, %v3327_v20 }
 0x387   :  { %v24478_v63 = vpack.c.bf16 %v3327_v20, %v3324_v40  ;;  %v3412_v57 = vsub.f32 %v2959_v50, %v3324_v40  ;;  %v20331_v3 = vpop.f32.mrb[2].mxu0 }
 0x388   :  { %v3420_v51 = vand.u32 4294901760, %v3419_v16  ;;  %v3829_v25 = vand.u32 4294901760, %v20331_v3  ;;  %v2971_v28 = vpop.f32.mrb[3].mxu0 }
 0x389   :  { %v3413_v53 = vand.u32 4294901760, %v3412_v57  ;;  %v3826_v61 = vand.u32 4294901760, %v2971_v28  ;;  %21701 = vmatprep.subr.bf16.mxu1 %v24478_v63  ;;  %v21708_v30 = vpack.c.bf16 %v3419_v16, %v3412_v57 }
 0x38a   :  { %v3421_v33 = vsub.f32 %v3419_v16, %v3420_v51  ;;  %v3921_v45 = vsub.f32 %v20331_v3, %v3829_v25  ;;  %21703 = vmatpush3.bf16.msra.mxu1 %v24478_v63 }
 0x38b   :  { %v3414_v43 = vsub.f32 %v3412_v57, %v3413_v53  ;;  %v24484_v47 = vpack.c.bf16 %v3829_v25, %v3826_v61  ;;  %v3914_v26 = vsub.f32 %v2971_v28, %v3826_v61  ;;  %v20334_v9 = vpop.f32.mrb[4].mxu0  ;;  %v24486_v44 = vpack.c.bf16 %v3420_v51, %v3413_v53 }
 0x38c   :  { %v3922_v4 = vand.u32 4294901760, %v3921_v45  ;;  %v4331_v15 = vand.u32 4294901760, %v20334_v9  ;;  %v2983_v32 = vpop.f32.mrb[5].mxu0  ;;  %v3422_v36 = vand.u32 4294901760, %v3421_v33 }
 0x38d   :  { %v3915_v14 = vand.u32 4294901760, %v3914_v26  ;;  %v4328_v31 = vand.u32 4294901760, %v2983_v32  ;;  %20421 = vmatmul.mubr.f32.vlgmr.msra.gmra.mrb[0].mxu1 %v24481_v24  ;;  %v3415_v46 = vand.u32 4294901760, %v3414_v43  ;;  %v24489_v12 = vpack.c.bf16 %v3921_v45, %v3914_v26 }
 0x38e   :  { %v3923_v54 = vsub.f32 %v3921_v45, %v3922_v4  ;;  %v4423_v42 = vsub.f32 %v20334_v9, %v4331_v15  ;;  %20427 = vmatprep.mubr.f32.mxu1 %v24437_v52 }
 0x38f   :  { %v3916_v19 = vsub.f32 %v3914_v26, %v3915_v14  ;;  %v24492_v39 = vpack.c.bf16 %v4331_v15, %v4328_v31  ;;  %v4416_v38 = vsub.f32 %v2983_v32, %v4328_v31  ;;  %v20337_v1 = vpop.f32.mrb[6].mxu0  ;;  %v21704_v0 = vpack.c.bf16 %v3422_v36, %v3415_v46 }
 0x390   :  { %v4424_v41 = vand.u32 4294901760, %v4423_v42  ;;  %v4833_v62 = vand.u32 4294901760, %v20337_v1  ;;  %v2995_v27 = vpop.f32.mrb[7].mxu0  ;;  %v3924_v35 = vand.u32 4294901760, %v3923_v54  ;;  %v24494_v11 = vpack.c.bf16 %v3922_v4, %v3915_v14 }
 0x391   :  { %v4417_v5 = vand.u32 4294901760, %v4416_v38  ;;  %v4830_v58 = vand.u32 4294901760, %v2995_v27  ;;  %21705 = vmatprep.subr.bf16.mxu1 %v21704_v0  ;;  %v3917_v8 = vand.u32 4294901760, %v3916_v19  ;;  %v24496_v6 = vpack.c.bf16 %v4423_v42, %v4416_v38 }
 0x392   :  { %v4425_v2 = vsub.f32 %v4423_v42, %v4424_v41  ;;  %v4925_v59 = vsub.f32 %v20337_v1, %v4833_v62  ;;  %21707 = vmatpush3.bf16.msra.mxu1 %v21704_v0 }
 0x393   :  { %v4418_v34 = vsub.f32 %v4416_v38, %v4417_v5  ;;  %v24498_v60 = vpack.c.bf16 %v4833_v62, %v4830_v58  ;;  %v4918_v21 = vsub.f32 %v2995_v27, %v4830_v58  ;;  %v20340_v48 = vpop.f32.mrb[8].mxu0  ;;  %21709 = vmatprep.subr.bf16.mxu1 %v21708_v30  ;;  %v24500_v22 = vpack.c.bf16 %v3924_v35, %v3917_v8 }
 0x394   :  { %v4926_v49 = vand.u32 4294901760, %v4925_v59  ;;  %v5335_v18 = vand.u32 4294901760, %v20340_v48  ;;  %v3007_v17 = vpop.f32.mrb[9].mxu0  ;;  %v4426_v55 = vand.u32 4294901760, %v4425_v2  ;;  %v24502_v20 = vpack.c.bf16 %v4424_v41, %v4417_v5 }
 0x395   :  { %v4919_v50 = vand.u32 4294901760, %v4918_v21  ;;  %v5332_v40 = vand.u32 4294901760, %v3007_v17  ;;  %20428 = vmatmul.mubr.f32.vlgmr.msra.gmra.mrb[0].mxu1 %v24468_v7  ;;  %v4419_v29 = vand.u32 4294901760, %v4418_v34  ;;  %v24505_v16 = vpack.c.bf16 %v4925_v59, %v4918_v21 }
 0x396   :  { %v4927_v57 = vsub.f32 %v4925_v59, %v4926_v49  ;;  %v5427_v3 = vsub.f32 %v20340_v48, %v5335_v18  ;;  %21711 = vmatpush3.bf16.msra.mxu1 %v21708_v30  ;;  %20434 = vmatprep.mubr.f32.mxu1 %v24441_v23 }
 0x397   :  { %v4920_v51 = vsub.f32 %v4918_v21, %v4919_v50  ;;  %v24508_v25 = vpack.c.bf16 %v5335_v18, %v5332_v40  ;;  %v5420_v28 = vsub.f32 %v3007_v17, %v5332_v40  ;;  %v20343_v53 = vpop.f32.mrb[10].mxu0  ;;  %21713 = vmatprep.subr.bf16.mxu1 %v24478_v63  ;;  %v24511_v61 = vpack.c.bf16 %v4426_v55, %v4419_v29 }
 0x398   :  { %v5428_v33 = vand.u32 4294901760, %v5427_v3  ;;  %v5837_v45 = vand.u32 4294901760, %v20343_v53  ;;  %v3019_v43 = vpop.f32.mrb[11].mxu0  ;;  %v4928_v26 = vand.u32 4294901760, %v4927_v57  ;;  %v24513_v9 = vpack.c.bf16 %v4926_v49, %v4919_v50 }
 0x399   :  { %v5421_v4 = vand.u32 4294901760, %v5420_v28  ;;  %v5834_v15 = vand.u32 4294901760, %v3019_v43  ;;  %v4921_v30 = vand.u32 4294901760, %v4920_v51  ;;  %v24515_v32 = vpack.c.bf16 %v5427_v3, %v5420_v28 }
 0x39a   :  { %v5429_v36 = vsub.f32 %v5427_v3, %v5428_v33  ;;  %v5929_v14 = vsub.f32 %v20343_v53, %v5837_v45 }
 0x39b   :  { %v5422_v31 = vsub.f32 %v5420_v28, %v5421_v4  ;;  %v24517_v46 = vpack.c.bf16 %v5837_v45, %v5834_v15  ;;  %v5922_v54 = vsub.f32 %v3019_v43, %v5834_v15  ;;  %v20346_v42 = vpop.f32.mrb[12].mxu0  ;;  %v24519_v19 = vpack.c.bf16 %v4928_v26, %v4921_v30 }
 0x39c   :  { %v5930_v38 = vand.u32 4294901760, %v5929_v14  ;;  %v6339_v1 = vand.u32 4294901760, %v20346_v42  ;;  %v3031_v0 = vpop.f32.mrb[13].mxu0  ;;  %v5430_v41 = vand.u32 4294901760, %v5429_v36  ;;  %v24521_v62 = vpack.c.bf16 %v5428_v33, %v5421_v4 }
 0x39d   :  { %v5923_v27 = vand.u32 4294901760, %v5922_v54  ;;  %v6336_v35 = vand.u32 4294901760, %v3031_v0  ;;  %20435 = vmatmul.mubr.f32.vlgmr.msra.gmra.mrb[0].mxu1 %v24471_v10  ;;  %v5423_v5 = vand.u32 4294901760, %v5422_v31  ;;  %v24524_v58 = vpack.c.bf16 %v5929_v14, %v5922_v54 }
 0x39e   :  { %v5931_v8 = vsub.f32 %v5929_v14, %v5930_v38  ;;  %v6431_v2 = vsub.f32 %v20346_v42, %v6339_v1  ;;  %21715 = vmatpush3.bf16.msra.mxu1 %v24478_v63  ;;  %20441 = vmatprep.mubr.f32.mxu1 %v24445_v37 }
 0x39f   :  { %v5924_v59 = vsub.f32 %v5922_v54, %v5923_v27  ;;  %v24528_v34 = vpack.c.bf16 %v6339_v1, %v6336_v35  ;;  %v6424_v21 = vsub.f32 %v3031_v0, %v6336_v35  ;;  %21717 = vmatprep.subr.bf16.mxu1 %v24486_v44  ;;  %v20349_v48 = vpop.f32.mrb[14].mxu0  ;;  %v24531_v49 = vpack.c.bf16 %v5430_v41, %v5423_v5 }
 0x3a0   :  { %v6432_v18 = vand.u32 4294901760, %v6431_v2  ;;  %v6841_v17 = vand.u32 4294901760, %v20349_v48  ;;  %v3043_v55 = vpop.f32.mrb[15].mxu0  ;;  %v5932_v50 = vand.u32 4294901760, %v5931_v8  ;;  %v24533_v40 = vpack.c.bf16 %v5930_v38, %v5923_v27 }
 0x3a1   :  { %v6425_v29 = vand.u32 4294901760, %v6424_v21  ;;  %v6838_v57 = vand.u32 4294901760, %v3043_v55  ;;  %v5925_v3 = vand.u32 4294901760, %v5924_v59  ;;  %v24535_v51 = vpack.c.bf16 %v6431_v2, %v6424_v21 }
 0x3a2   :  { %v6433_v28 = vsub.f32 %v6431_v2, %v6432_v18  ;;  %v6933_v53 = vsub.f32 %v20349_v48, %v6841_v17 }
 0x3a3   :  { %v6426_v33 = vsub.f32 %v6424_v21, %v6425_v29  ;;  %v24537_v45 = vpack.c.bf16 %v6841_v17, %v6838_v57  ;;  %v6926_v43 = vsub.f32 %v3043_v55, %v6838_v57  ;;  %v20352_v26 = vpop.f32.mrb[16].mxu0  ;;  %v24539_v4 = vpack.c.bf16 %v5932_v50, %v5925_v3 }
 0x3a4   :  { %v6934_v15 = vand.u32 4294901760, %v6933_v53  ;;  %v7343_v30 = vand.u32 4294901760, %v20352_v26  ;;  %v3055_v36 = vpop.f32.mrb[17].mxu0  ;;  %v6434_v14 = vand.u32 4294901760, %v6433_v28  ;;  %v24541_v31 = vpack.c.bf16 %v6432_v18, %v6425_v29 }
 0x3a5   :  { %v6927_v54 = vand.u32 4294901760, %v6926_v43  ;;  %v7340_v42 = vand.u32 4294901760, %v3055_v36  ;;  %20442 = vmatmul.mubr.f32.vlgmr.msra.gmra.mrb[0].mxu1 %v24474_v13  ;;  %v6427_v38 = vand.u32 4294901760, %v6426_v33  ;;  %v24544_v1 = vpack.c.bf16 %v6933_v53, %v6926_v43 }
 0x3a6   :  { %v6935_v0 = vsub.f32 %v6933_v53, %v6934_v15  ;;  %v7435_v41 = vsub.f32 %v20352_v26, %v7343_v30  ;;  %21719 = vmatpush3.bf16.msra.mxu1 %v24486_v44  ;;  %20448 = vmatprep.mubr.f32.mxu1 %v24437_v52 }
 0x3a7   :  { %v6928_v27 = vsub.f32 %v6926_v43, %v6927_v54  ;;  %v24548_v35 = vpack.c.bf16 %v7343_v30, %v7340_v42  ;;  %v7428_v5 = vsub.f32 %v3055_v36, %v7340_v42  ;;  %21721 = vmatprep.subr.bf16.mxu1 %v24478_v63  ;;  %v20355_v8 = vpop.f32.mrb[18].mxu0  ;;  %v24551_v2 = vpack.c.bf16 %v6434_v14, %v6427_v38 }
 0x3a8   :  { %v7436_v59 = vand.u32 4294901760, %v7435_v41  ;;  %v7845_v21 = vand.u32 4294901760, %v20355_v8  ;;  %v3067_v48 = vpop.f32.mrb[19].mxu0  ;;  %v6936_v18 = vand.u32 4294901760, %v6935_v0  ;;  %v24553_v17 = vpack.c.bf16 %v6934_v15, %v6927_v54 }
 0x3a9   :  { %v7429_v55 = vand.u32 4294901760, %v7428_v5  ;;  %v7842_v50 = vand.u32 4294901760, %v3067_v48  ;;  %v6929_v44 = vand.u32 4294901760, %v6928_v27  ;;  %v24555_v29 = vpack.c.bf16 %v7435_v41, %v7428_v5 }
 0x3aa   :  { %v7437_v57 = vsub.f32 %v7435_v41, %v7436_v59  ;;  %v7937_v3 = vsub.f32 %v20355_v8, %v7845_v21 }
 0x3ab   :  { %26517 = vst [vmem:[#allocation21_spill] sm:$0xff] %v24555_v29  ;;  %v7430_v28 = vsub.f32 %v7428_v5, %v7429_v55  ;;  %v24557_v53 = vpack.c.bf16 %v7845_v21, %v7842_v50  ;;  %v7930_v33 = vsub.f32 %v3067_v48, %v7842_v50  ;;  %v20358_v43 = vpop.f32.mrb[20].mxu0  ;;  %v24559_v26 = vpack.c.bf16 %v6936_v18, %v6929_v44 }
 0x3ac   :  { %v7938_v30 = vand.u32 4294901760, %v7937_v3  ;;  %v8347_v36 = vand.u32 4294901760, %v20358_v43  ;;  %v3079_v14 = vpop.f32.mrb[21].mxu0  ;;  %v7438_v42 = vand.u32 4294901760, %v7437_v57  ;;  %v24561_v15 = vpack.c.bf16 %v7436_v59, %v7429_v55 }
 0x3ad   :  { %26518 = vst [vmem:[#allocation23_spill] sm:$0xff] %v24557_v53  ;;  %v7931_v54 = vand.u32 4294901760, %v7930_v33  ;;  %v8344_v38 = vand.u32 4294901760, %v3079_v14  ;;  %20449 = vmatmul.mubr.f32.vlgmr.msra.gmra.mrb[0].mxu1 %v24468_v7  ;;  %v7431_v0 = vand.u32 4294901760, %v7430_v28  ;;  %v24564_v41 = vpack.c.bf16 %v7937_v3, %v7930_v33 }
 0x3ae   :  { %26519 = vst [vmem:[#allocation24_spill] sm:$0xff] %v24561_v15  ;;  %v7939_v27 = vsub.f32 %v7937_v3, %v7938_v30  ;;  %v8439_v5 = vsub.f32 %v20358_v43, %v8347_v36  ;;  %21723 = vmatpush3.bf16.msra.mxu1 %v24478_v63  ;;  %20455 = vmatprep.mubr.f32.mxu1 %v24437_v52 }
 0x3af   :  { %26520 = vst [vmem:[#allocation25_spill] sm:$0xff] %v24564_v41  ;;  %v7932_v8 = vsub.f32 %v7930_v33, %v7931_v54  ;;  %v24568_v21 = vpack.c.bf16 %v8347_v36, %v8344_v38  ;;  %v8432_v48 = vsub.f32 %v3079_v14, %v8344_v38  ;;  %21725 = vmatprep.subr.bf16.mxu1 %v24484_v47  ;;  %v20361_v59 = vpop.f32.mrb[22].mxu0 }
 0x3b0   :  { %v24571_v18 = vpack.c.bf16 %v7438_v42, %v7431_v0  ;;  %v8440_v55 = vand.u32 4294901760, %v8439_v5  ;;  %v8849_v50 = vand.u32 4294901760, %v20361_v59  ;;  %v3091_v44 = vpop.f32.mrb[23].mxu0  ;;  %v7940_v57 = vand.u32 4294901760, %v7939_v27 }
 0x3b1   :  { %26521 = vst [vmem:[#allocation28_spill] sm:$0xff] %v24568_v21  ;;  %v24573_v28 = vpack.c.bf16 %v7938_v30, %v7931_v54  ;;  %v8433_v3 = vand.u32 4294901760, %v8432_v48  ;;  %v8846_v43 = vand.u32 4294901760, %v3091_v44  ;;  %v7933_v63 = vand.u32 4294901760, %v7932_v8 }
 0x3b2   :  { %v24575_v41 = vpack.c.bf16 %v8439_v5, %v8432_v48  ;;  %v8441_v33 = vsub.f32 %v8439_v5, %v8440_v55  ;;  %v8941_v36 = vsub.f32 %v20361_v59, %v8849_v50 }
 0x3b3   :  { %26522 = vst [vmem:[#allocation29_spill] sm:$0xff] %v24573_v28  ;;  %v8434_v21 = vsub.f32 %v8432_v48, %v8433_v3  ;;  %v24577_v14 = vpack.c.bf16 %v8849_v50, %v8846_v43  ;;  %v8934_v38 = vsub.f32 %v3091_v44, %v8846_v43  ;;  %v20364_v53 = vpop.f32.mrb[24].mxu0  ;;  %v24579_v42 = vpack.c.bf16 %v7940_v57, %v7933_v63 }
 0x3b4   :  { %26523 = vst [vmem:[#allocation32_spill] sm:$0xff] %v24575_v41  ;;  %v8942_v0 = vand.u32 4294901760, %v8941_v36  ;;  %v9351_v15 = vand.u32 4294901760, %v20364_v53  ;;  %v3103_v29 = vpop.f32.mrb[25].mxu0  ;;  %v8442_v27 = vand.u32 4294901760, %v8441_v33  ;;  %v24581_v30 = vpack.c.bf16 %v8440_v55, %v8433_v3 }
 0x3b5   :  { %26524 = vst [vmem:[#allocation33_spill] sm:$0xff] %v24577_v14  ;;  %v8935_v54 = vand.u32 4294901760, %v8934_v38  ;;  %v9348_v28 = vand.u32 4294901760, %v3103_v29  ;;  %20456 = vmatmul.mubr.f32.vlgmr.msra.gmra.mrb[0].mxu1 %v24468_v7  ;;  %v8435_v8 = vand.u32 4294901760, %v8434_v21  ;;  %v24584_v5 = vpack.c.bf16 %v8941_v36, %v8934_v38 }
 0x3b6   :  { %26525 = vst [vmem:[#allocation38_spill] sm:$0xff] %v24581_v30  ;;  %v8943_v48 = vsub.f32 %v8941_v36, %v8942_v0  ;;  %v9443_v59 = vsub.f32 %v20364_v53, %v9351_v15  ;;  %21727 = vmatpush3.bf16.msra.mxu1 %v24484_v47  ;;  %20462 = vmatprep.mubr.f32.mxu1 %v24451_v56 }
 0x3b7   :  { %26526 = vst [vmem:[#allocation39_spill] sm:$0xff] %v24584_v5  ;;  %v8936_v50 = vsub.f32 %v8934_v38, %v8935_v54  ;;  %v24588_v44 = vpack.c.bf16 %v9351_v15, %v9348_v28  ;;  %v9436_v57 = vsub.f32 %v3103_v29, %v9348_v28  ;;  %21729 = vmatprep.subr.bf16.mxu1 %v24500_v22  ;;  %v20367_v55 = vpop.f32.mrb[26].mxu0 }
 0x3b8   :  { %v24591_v3 = vpack.c.bf16 %v8442_v27, %v8435_v8  ;;  %v9444_v43 = vand.u32 4294901760, %v9443_v59  ;;  %v9853_v63 = vand.u32 4294901760, %v20367_v55  ;;  %v3115_v21 = vpop.f32.mrb[27].mxu0  ;;  %v8944_v33 = vand.u32 4294901760, %v8943_v48 }
 0x3b9   :  { %26527 = vst [vmem:[#allocation40_spill] sm:$0xff] %v24588_v44  ;;  %v24593_v5 = vpack.c.bf16 %v8942_v0, %v8935_v54  ;;  %v9437_v53 = vand.u32 4294901760, %v9436_v57  ;;  %v9850_v36 = vand.u32 4294901760, %v3115_v21  ;;  %20463 = vmatmul.mubr.f32.vlgmr.msra.gmra.mrb[2].mxu1 %v24481_v24  ;;  %v8937_v14 = vand.u32 4294901760, %v8936_v50 }
 0x3ba   :  { %26528 = vst [vmem:[#allocation41_spill] sm:$0xff] %v24591_v3  ;;  %v24596_v38 = vpack.c.bf16 %v9443_v59, %v9436_v57  ;;  %v9445_v15 = vsub.f32 %v9443_v59, %v9444_v43  ;;  %v9945_v29 = vsub.f32 %v20367_v55, %v9853_v63  ;;  %21731 = vmatpush3.bf16.msra.mxu1 %v24500_v22 }
 0x3bb   :  { %26529 = vst [vmem:[#allocation44_spill] sm:$0xff] %v24593_v5  ;;  %20469 = vmatprep.mubr.f32.mxu1 %v24437_v52  ;;  %v9438_v28 = vsub.f32 %v9436_v57, %v9437_v53  ;;  %v24600_v27 = vpack.c.bf16 %v9853_v63, %v9850_v36  ;;  %v9938_v8 = vsub.f32 %v3115_v21, %v9850_v36  ;;  %v20370_v0 = vpop.f32.mrb[28].mxu0 }
 0x3bc   :  { %26530 = vst [vmem:[#allocation45_spill] sm:$0xff] %v24596_v38  ;;  %21733 = vmatprep.subr.bf16.mxu1 %v24489_v12  ;;  %v24603_v54 = vpack.c.bf16 %v8944_v33, %v8937_v14  ;;  %v9946_v48 = vand.u32 4294901760, %v9945_v29  ;;  %v10355_v44 = vand.u32 4294901760, %v20370_v0  ;;  %v3127_v50 = vpop.f32.mrb[29].mxu0  ;;  %v9446_v5 = vand.u32 4294901760, %v9445_v15 }
 0x3bd   :  { %26531 = vst [vmem:[#allocation48_spill] sm:$0xff] %v24600_v27  ;;  %v24605_v38 = vpack.c.bf16 %v9444_v43, %v9437_v53  ;;  %v9939_v59 = vand.u32 4294901760, %v9938_v8  ;;  %v10352_v55 = vand.u32 4294901760, %v3127_v50  ;;  %v9439_v22 = vand.u32 4294901760, %v9438_v28 }
 0x3be   :  { %26532 = vst [vmem:[#allocation49_spill] sm:$0xff] %v24603_v54  ;;  %v24607_v30 = vpack.c.bf16 %v9945_v29, %v9938_v8  ;;  %v9947_v57 = vsub.f32 %v9945_v29, %v9946_v48  ;;  %v10447_v63 = vsub.f32 %v20370_v0, %v10355_v44 }
 0x3bf   :  { %26533 = vst [vmem:[#allocation54_spill] sm:$0xff] %v24605_v38  ;;  %v9940_v27 = vsub.f32 %v9938_v8, %v9939_v59  ;;  %v24609_v21 = vpack.c.bf16 %v10355_v44, %v10352_v55  ;;  %v10440_v36 = vsub.f32 %v3127_v50, %v10352_v55  ;;  %v20373_v41 = vpop.f32.mrb[30].mxu0  ;;  %v24611_v14 = vpack.c.bf16 %v9446_v5, %v9439_v22 }
 0x3c0   :  { %26534 = vst [vmem:[#allocation55_spill] sm:$0xff] %v24607_v30  ;;  %v10448_v33 = vand.u32 4294901760, %v10447_v63  ;;  %v10857_v54 = vand.u32 4294901760, %v20373_v41  ;;  %v3139_v3 = vpop.f32.mrb[31].mxu0  ;;  %v9948_v15 = vand.u32 4294901760, %v9947_v57  ;;  %v24613_v43 = vpack.c.bf16 %v9946_v48, %v9939_v59 }
 0x3c1   :  { %26535 = vst [vmem:[#allocation56_spill] sm:$0xff] %v24609_v21  ;;  %v10441_v53 = vand.u32 4294901760, %v10440_v36  ;;  %v10854_v38 = vand.u32 4294901760, %v3139_v3  ;;  %20470 = vmatmul.mubr.f32.vlgmr.msra.gmra.mrb[2].mxu1 %v24468_v7  ;;  %v9941_v28 = vand.u32 4294901760, %v9940_v27  ;;  %v24616_v29 = vpack.c.bf16 %v10447_v63, %v10440_v36 }
 0x3c2   :  { %26536 = vst [vmem:[#allocation57_spill] sm:$0xff] %v24613_v43  ;;  %v10449_v8 = vsub.f32 %v10447_v63, %v10448_v33  ;;  %v10949_v44 = vsub.f32 %v20373_v41, %v10857_v54  ;;  %21735 = vmatpush3.bf16.msra.mxu1 %v24489_v12  ;;  %20476 = vmatprep.mubr.f32.mxu1 %v24441_v23 }
 0x3c3   :  { %26537 = vst [vmem:[#allocation60_spill] sm:$0xff] %v24616_v29  ;;  %v10442_v5 = vsub.f32 %v10440_v36, %v10441_v53  ;;  %v24620_v0 = vpack.c.bf16 %v10857_v54, %v10854_v38  ;;  %v10942_v50 = vsub.f32 %v3139_v3, %v10854_v38  ;;  %21737 = vmatprep.subr.bf16.mxu1 %v24484_v47  ;;  %v20376_v48 = vpop.f32.mrb[32].mxu0 }
 0x3c4   :  { %v24623_v59 = vpack.c.bf16 %v9948_v15, %v9941_v28  ;;  %v10950_v55 = vand.u32 4294901760, %v10949_v44  ;;  %v11359_v22 = vand.u32 4294901760, %v20376_v48  ;;  %v3151_v27 = vpop.f32.mrb[33].mxu0  ;;  %v10450_v57 = vand.u32 4294901760, %v10449_v8 }
 0x3c5   :  { %26538 = vst [vmem:[#allocation61_spill] sm:$0xff] %v24620_v0  ;;  %v24625_v29 = vpack.c.bf16 %v10448_v33, %v10441_v53  ;;  %v10943_v41 = vand.u32 4294901760, %v10942_v50  ;;  %v11356_v63 = vand.u32 4294901760, %v3151_v27  ;;  %v10443_v12 = vand.u32 4294901760, %v10442_v5 }
 0x3c6   :  { %26539 = vst [vmem:[#allocation64_spill] sm:$0xff] %v24623_v59  ;;  %v24627_v21 = vpack.c.bf16 %v10949_v44, %v10942_v50  ;;  %v10951_v36 = vsub.f32 %v10949_v44, %v10950_v55  ;;  %v11451_v54 = vsub.f32 %v20376_v48, %v11359_v22 }
 0x3c7   :  { %26540 = vst [vmem:[#allocation65_spill] sm:$0xff] %v24625_v29  ;;  %v10944_v0 = vsub.f32 %v10942_v50, %v10943_v41  ;;  %v24629_v3 = vpack.c.bf16 %v11359_v22, %v11356_v63  ;;  %v11444_v38 = vsub.f32 %v3151_v27, %v11356_v63  ;;  %v20379_v43 = vpop.f32.mrb[34].mxu0  ;;  %v24631_v15 = vpack.c.bf16 %v10450_v57, %v10443_v12 }
 0x3c8   :  { %26541 = vst [vmem:[#allocation69_spill] sm:$0xff] %v24627_v21  ;;  %v11452_v28 = vand.u32 4294901760, %v11451_v54  ;;  %v11861_v30 = vand.u32 4294901760, %v20379_v43  ;;  %v3163_v59 = vpop.f32.mrb[35].mxu0  ;;  %v10952_v8 = vand.u32 4294901760, %v10951_v36  ;;  %v24633_v33 = vpack.c.bf16 %v10950_v55, %v10943_v41 }
 0x3c9   :  { %26542 = vst [vmem:[#allocation71_spill] sm:$0xff] %v24629_v3  ;;  %26543 = vst [vmem:[#allocation72_spill] sm:$0xff] %v24631_v15  ;;  %v11445_v53 = vand.u32 4294901760, %v11444_v38  ;;  %v11858_v29 = vand.u32 4294901760, %v3163_v59  ;;  %20477 = vmatmul.mubr.f32.vlgmr.msra.gmra.mrb[2].mxu1 %v24471_v10  ;;  %v10945_v5 = vand.u32 4294901760, %v10944_v0  ;;  %v24636_v44 = vpack.c.bf16 %v11451_v54, %v11444_v38 }
 0x3ca   :  { %26544 = vst [vmem:[#allocation73_spill] sm:$0xff] %v24633_v33  ;;  %v11453_v50 = vsub.f32 %v11451_v54, %v11452_v28  ;;  %v11953_v48 = vsub.f32 %v20379_v43, %v11861_v30  ;;  %21739 = vmatpush3.bf16.msra.mxu1 %v24484_v47  ;;  %20483 = vmatprep.mubr.f32.mxu1 %v24445_v37 }
 0x3cb   :  { %26545 = vst [vmem:[#allocation75_spill] sm:$0xff] %v24636_v44  ;;  %v11446_v22 = vsub.f32 %v11444_v38, %v11445_v53  ;;  %v24640_v27 = vpack.c.bf16 %v11861_v30, %v11858_v29  ;;  %v11946_v57 = vsub.f32 %v3163_v59, %v11858_v29  ;;  %21741 = vmatprep.subr.bf16.mxu1 %v24494_v11  ;;  %v20382_v55 = vpop.f32.mrb[36].mxu0 }
 0x3cc   :  { %v24643_v41 = vpack.c.bf16 %v10952_v8, %v10945_v5  ;;  %v11954_v63 = vand.u32 4294901760, %v11953_v48  ;;  %v12363_v12 = vand.u32 4294901760, %v20382_v55  ;;  %v3175_v0 = vpop.f32.mrb[37].mxu0  ;;  %v11454_v36 = vand.u32 4294901760, %v11453_v50 }
 0x3cd   :  { %26546 = vst [vmem:[#allocation79_spill] sm:$0xff] %v24640_v27  ;;  %v24645_v44 = vpack.c.bf16 %v11452_v28, %v11445_v53  ;;  %v11947_v43 = vand.u32 4294901760, %v11946_v57  ;;  %v12360_v54 = vand.u32 4294901760, %v3175_v0  ;;  %v11447_v3 = vand.u32 4294901760, %v11446_v22 }
 0x3ce   :  { %26547 = vst [vmem:[#allocation80_spill] sm:$0xff] %v24643_v41  ;;  %v24647_v33 = vpack.c.bf16 %v11953_v48, %v11946_v57  ;;  %v11955_v38 = vsub.f32 %v11953_v48, %v11954_v63  ;;  %v12455_v30 = vsub.f32 %v20382_v55, %v12363_v12 }
 0x3cf   :  { %26548 = vst [vmem:[#allocation82_spill] sm:$0xff] %v24645_v44  ;;  %v11948_v27 = vsub.f32 %v11946_v57, %v11947_v43  ;;  %v24649_v29 = vpack.c.bf16 %v12363_v12, %v12360_v54  ;;  %v12448_v59 = vsub.f32 %v3175_v0, %v12360_v54  ;;  %v20385_v21 = vpop.f32.mrb[38].mxu0  ;;  %v24651_v8 = vpack.c.bf16 %v11454_v36, %v11447_v3 }
 0x3d0   :  { %26549 = vst [vmem:[#allocation85_spill] sm:$0xff] %v24647_v33  ;;  %v12456_v5 = vand.u32 4294901760, %v12455_v30  ;;  %v12865_v41 = vand.u32 4294901760, %v20385_v21  ;;  %v3187_v15 = vpop.f32.mrb[39].mxu0  ;;  %v11956_v50 = vand.u32 4294901760, %v11955_v38  ;;  %v24653_v28 = vpack.c.bf16 %v11954_v63, %v11947_v43 }
 0x3d1   :  { %26550 = vst [vmem:[#allocation86_spill] sm:$0xff] %v24649_v29  ;;  %v12449_v53 = vand.u32 4294901760, %v12448_v59  ;;  %v12862_v44 = vand.u32 4294901760, %v3187_v15  ;;  %20484 = vmatmul.mubr.f32.vlgmr.msra.gmra.mrb[2].mxu1 %v24474_v13  ;;  %v11949_v22 = vand.u32 4294901760, %v11948_v27  ;;  %v24656_v48 = vpack.c.bf16 %v12455_v30, %v12448_v59 }
 0x3d2   :  { %26551 = vst [vmem:[#allocation88_spill] sm:$0xff] %v24653_v28  ;;  %v12457_v57 = vsub.f32 %v12455_v30, %v12456_v5  ;;  %v12957_v55 = vsub.f32 %v20385_v21, %v12865_v41  ;;  %21743 = vmatpush3.bf16.msra.mxu1 %v24494_v11  ;;  %20490 = vmatprep.mubr.f32.mxu1 %v24437_v52 }
 0x3d3   :  { %26552 = vst [vmem:[#allocation91_spill] sm:$0xff] %v24656_v48  ;;  %v12450_v3 = vsub.f32 %v12448_v59, %v12449_v53  ;;  %v24660_v12 = vpack.c.bf16 %v12865_v41, %v12862_v44  ;;  %v12950_v0 = vsub.f32 %v3187_v15, %v12862_v44  ;;  %21745 = vmatprep.subr.bf16.mxu1 %v24484_v47  ;;  %v20388_v63 = vpop.f32.mrb[40].mxu0 }
 0x3d4   :  { %v24663_v36 = vpack.c.bf16 %v11956_v50, %v11949_v22  ;;  %v12958_v43 = vand.u32 4294901760, %v12957_v55  ;;  %v13367_v54 = vand.u32 4294901760, %v20388_v63  ;;  %v3199_v27 = vpop.f32.mrb[41].mxu0  ;;  %v12458_v38 = vand.u32 4294901760, %v12457_v57 }
 0x3d5   :  { %26553 = vst [vmem:[#allocation93_spill] sm:$0xff] %v24660_v12  ;;  %v24665_v48 = vpack.c.bf16 %v12456_v5, %v12449_v53  ;;  %v12951_v21 = vand.u32 4294901760, %v12950_v0  ;;  %v13364_v30 = vand.u32 4294901760, %v3199_v27  ;;  %v12451_v11 = vand.u32 4294901760, %v12450_v3 }
 0x3d6   :  { %26554 = vst [vmem:[#allocation94_spill] sm:$0xff] %v24663_v36  ;;  %v24667_v29 = vpack.c.bf16 %v12957_v55, %v12950_v0  ;;  %v12959_v59 = vsub.f32 %v12957_v55, %v12958_v43  ;;  %v13459_v41 = vsub.f32 %v20388_v63, %v13367_v54 }
 0x3d7   :  { %26555 = vst [vmem:[#allocation96_spill] sm:$0xff] %v24665_v48  ;;  %v12952_v12 = vsub.f32 %v12950_v0, %v12951_v21  ;;  %v24669_v15 = vpack.c.bf16 %v13367_v54, %v13364_v30  ;;  %v13452_v44 = vsub.f32 %v3199_v27, %v13364_v30  ;;  %v20391_v28 = vpop.f32.mrb[42].mxu0  ;;  %v24671_v50 = vpack.c.bf16 %v12458_v38, %v12451_v11 }
 0x3d8   :  { %26556 = vst [vmem:[#allocation100_spill] sm:$0xff] %v24667_v29  ;;  %v13460_v22 = vand.u32 4294901760, %v13459_v41  ;;  %v13869_v33 = vand.u32 4294901760, %v20391_v28  ;;  %v3211_v36 = vpop.f32.mrb[43].mxu0  ;;  %v12960_v57 = vand.u32 4294901760, %v12959_v59  ;;  %v24673_v5 = vpack.c.bf16 %v12958_v43, %v12951_v21 }
 0x3d9   :  { %26557 = vst [vmem:[#allocation109_spill] sm:$0xff] %v24669_v15  ;;  %v13453_v53 = vand.u32 4294901760, %v13452_v44  ;;  %v13866_v48 = vand.u32 4294901760, %v3211_v36  ;;  %20491 = vmatmul.mubr.f32.vlgmr.msra.gmra.mrb[2].mxu1 %v24468_v7  ;;  %v12953_v3 = vand.u32 4294901760, %v12952_v12  ;;  %v24676_v55 = vpack.c.bf16 %v13459_v41, %v13452_v44 }
 0x3da   :  { %26558 = vst [vmem:[#allocation110_spill] sm:$0xff] %v24673_v5  ;;  %v13461_v0 = vsub.f32 %v13459_v41, %v13460_v22  ;;  %v13961_v63 = vsub.f32 %v20391_v28, %v13869_v33  ;;  %21747 = vmatpush3.bf16.msra.mxu1 %v24484_v47  ;;  %20497 = vmatprep.mubr.f32.mxu1 %v24437_v52 }
 0x3db   :  { %26559 = vst [vmem:[#allocation118_spill] sm:$0xff] %v24676_v55  ;;  %v13454_v54 = vsub.f32 %v13452_v44, %v13453_v53  ;;  %v24680_v27 = vpack.c.bf16 %v13869_v33, %v13866_v48  ;;  %v13954_v38 = vsub.f32 %v3211_v36, %v13866_v48  ;;  %21749 = vmatprep.subr.bf16.mxu1 %v24492_v39  ;;  %v20394_v43 = vpop.f32.mrb[44].mxu0 }
 0x3dc   :  { %v24683_v21 = vpack.c.bf16 %v12960_v57, %v12953_v3  ;;  %v13962_v30 = vand.u32 4294901760, %v13961_v63  ;;  %v14371_v11 = vand.u32 4294901760, %v20394_v43  ;;  %v3223_v12 = vpop.f32.mrb[45].mxu0  ;;  %v13462_v59 = vand.u32 4294901760, %v13461_v0 }
 0x3dd   :  { %26560 = vst [vmem:[#allocation115_spill] sm:$0xff] %v24680_v27  ;;  %v24685_v55 = vpack.c.bf16 %v13460_v22, %v13453_v53  ;;  %v13955_v28 = vand.u32 4294901760, %v13954_v38  ;;  %v14368_v41 = vand.u32 4294901760, %v3223_v12  ;;  %v13455_v47 = vand.u32 4294901760, %v13454_v54 }
 0x3de   :  { %26561 = vst [vmem:[#allocation120_spill] sm:$0xff] %v24683_v21  ;;  %v24687_v15 = vpack.c.bf16 %v13961_v63, %v13954_v38  ;;  %v13963_v44 = vsub.f32 %v13961_v63, %v13962_v30  ;;  %v14463_v33 = vsub.f32 %v20394_v43, %v14371_v11 }
 0x3df   :  { %26562 = vst [vmem:[#allocation123_spill] sm:$0xff] %v24685_v55  ;;  %v13956_v27 = vsub.f32 %v13954_v38, %v13955_v28  ;;  %v24689_v48 = vpack.c.bf16 %v14371_v11, %v14368_v41  ;;  %v14456_v36 = vsub.f32 %v3223_v12, %v14368_v41  ;;  %v20397_v5 = vpop.f32.mrb[46].mxu0  ;;  %v24691_v57 = vpack.c.bf16 %v13462_v59, %v13455_v47 }
 0x3e0   :  { %26563 = vst [vmem:[#allocation124_spill] sm:$0xff] %v24687_v15  ;;  %v14464_v3 = vand.u32 4294901760, %v14463_v33  ;;  %v14873_v29 = vand.u32 4294901760, %v20397_v5  ;;  %v3235_v21 = vpop.f32.mrb[47].mxu0  ;;  %v13964_v0 = vand.u32 4294901760, %v13963_v44  ;;  %v24693_v22 = vpack.c.bf16 %v13962_v30, %v13955_v28 }
 0x3e1   :  { %26564 = vst [vmem:[#allocation18_spill] sm:$0xff] %v24689_v48  ;;  %v14457_v53 = vand.u32 4294901760, %v14456_v36  ;;  %v14870_v55 = vand.u32 4294901760, %v3235_v21  ;;  %20498 = vmatmul.mubr.f32.vlgmr.msra.gmra.mrb[2].mxu1 %v24468_v7  ;;  %v13957_v54 = vand.u32 4294901760, %v13956_v27  ;;  %v24696_v63 = vpack.c.bf16 %v14463_v33, %v14456_v36 }
 0x3e2   :  { %26565 = vst [vmem:[#allocation19_spill] sm:$0xff] %v24693_v22  ;;  %v14465_v38 = vsub.f32 %v14463_v33, %v14464_v3  ;;  %v14965_v43 = vsub.f32 %v20397_v5, %v14873_v29  ;;  %21751 = vmatpush3.bf16.msra.mxu1 %v24492_v39  ;;  %20504 = vmatprep.mubr.f32.mxu1 %v24451_v56 }
 0x3e3   :  { %26566 = vst [vmem:[#allocation20_spill] sm:$0xff] %v24696_v63  ;;  %v14458_v11 = vsub.f32 %v14456_v36, %v14457_v53  ;;  %v24700_v12 = vpack.c.bf16 %v14873_v29, %v14870_v55  ;;  %v14958_v59 = vsub.f32 %v3235_v21, %v14870_v55  ;;  %21753 = vmatprep.subr.bf16.mxu1 %v24511_v61  ;;  %v20400_v30 = vpop.f32.mrb[48].mxu0 }
 0x3e4   :  { %v24703_v28 = vpack.c.bf16 %v13964_v0, %v13957_v54  ;;  %v14966_v41 = vand.u32 4294901760, %v14965_v43  ;;  %v15375_v47 = vand.u32 4294901760, %v20400_v30  ;;  %v3247_v27 = vpop.f32.mrb[49].mxu0  ;;  %v14466_v44 = vand.u32 4294901760, %v14465_v38 }
 0x3e5   :  { %26567 = vst [vmem:[#allocation22_spill] sm:$0xff] %v24700_v12  ;;  %v24705_v63 = vpack.c.bf16 %v14464_v3, %v14457_v53  ;;  %v14959_v5 = vand.u32 4294901760, %v14958_v59  ;;  %v15372_v33 = vand.u32 4294901760, %v3247_v27  ;;  %20505 = vmatmul.mubr.f32.vlgmr.msra.gmra.mrb[4].mxu1 %v24481_v24  ;;  %v14459_v48 = vand.u32 4294901760, %v14458_v11 }
 0x3e6   :  { %26568 = vst [vmem:[#allocation26_spill] sm:$0xff] %v24703_v28  ;;  %v24708_v36 = vpack.c.bf16 %v14965_v43, %v14958_v59  ;;  %v14967_v29 = vsub.f32 %v14965_v43, %v14966_v41  ;;  %v15467_v55 = vsub.f32 %v20400_v30, %v15375_v47  ;;  %21755 = vmatpush3.bf16.msra.mxu1 %v24511_v61 }
 0x3e7   :  { %26569 = vst [vmem:[#allocation27_spill] sm:$0xff] %v24705_v63  ;;  %20511 = vmatprep.mubr.f32.mxu1 %v24437_v52  ;;  %v14960_v21 = vsub.f32 %v14958_v59, %v14959_v5  ;;  %v24712_v0 = vpack.c.bf16 %v15375_v47, %v15372_v33  ;;  %v15460_v54 = vsub.f32 %v3247_v27, %v15372_v33  ;;  %v20403_v3 = vpop.f32.mrb[50].mxu0 }
 0x3e8   :  { %26570 = vst [vmem:[#allocation30_spill] sm:$0xff] %v24708_v36  ;;  %21757 = vmatprep.subr.bf16.mxu1 %v24496_v6  ;;  %v24715_v53 = vpack.c.bf16 %v14466_v44, %v14459_v48  ;;  %v15468_v38 = vand.u32 4294901760, %v15467_v55  ;;  %v15877_v12 = vand.u32 4294901760, %v20403_v3  ;;  %v3259_v11 = vpop.f32.mrb[51].mxu0  ;;  %v14968_v63 = vand.u32 4294901760, %v14967_v29 }
 0x3e9   :  { %26571 = vst [vmem:[#allocation31_spill] sm:$0xff] %v24712_v0  ;;  %v24717_v36 = vpack.c.bf16 %v14966_v41, %v14959_v5  ;;  %v15461_v43 = vand.u32 4294901760, %v15460_v54  ;;  %v15874_v30 = vand.u32 4294901760, %v3259_v11  ;;  %v14961_v61 = vand.u32 4294901760, %v14960_v21 }
 0x3ea   :  { %26572 = vst [vmem:[#allocation34_spill] sm:$0xff] %v24715_v53  ;;  %v24719_v22 = vpack.c.bf16 %v15467_v55, %v15460_v54  ;;  %v15469_v59 = vsub.f32 %v15467_v55, %v15468_v38  ;;  %v15969_v47 = vsub.f32 %v20403_v3, %v15877_v12 }
 0x3eb   :  { %26573 = vst [vmem:[#allocation35_spill] sm:$0xff] %v24717_v36  ;;  %v15462_v0 = vsub.f32 %v15460_v54, %v15461_v43  ;;  %v24721_v27 = vpack.c.bf16 %v15877_v12, %v15874_v30  ;;  %v15962_v33 = vsub.f32 %v3259_v11, %v15874_v30  ;;  %v20406_v15 = vpop.f32.mrb[52].mxu0  ;;  %v24723_v48 = vpack.c.bf16 %v14968_v63, %v14961_v61 }
 0x3ec   :  { %26574 = vst [vmem:[#allocation36_spill] sm:$0xff] %v24719_v22  ;;  %v15970_v44 = vand.u32 4294901760, %v15969_v47  ;;  %v16379_v53 = vand.u32 4294901760, %v20406_v15  ;;  %v3271_v28 = vpop.f32.mrb[53].mxu0  ;;  %v15470_v29 = vand.u32 4294901760, %v15469_v59  ;;  %v24725_v41 = vpack.c.bf16 %v15468_v38, %v15461_v43 }
 0x3ed   :  { %26575 = vst [vmem:[#allocation37_spill] sm:$0xff] %v24721_v27  ;;  %v15963_v5 = vand.u32 4294901760, %v15962_v33  ;;  %v16376_v36 = vand.u32 4294901760, %v3271_v28  ;;  %20512 = vmatmul.mubr.f32.vlgmr.msra.gmra.mrb[4].mxu1 %v24468_v7  ;;  %v15463_v21 = vand.u32 4294901760, %v15462_v0  ;;  %v24728_v55 = vpack.c.bf16 %v15969_v47, %v15962_v33 }
 0x3ee   :  { %26576 = vst [vmem:[#allocation42_spill] sm:$0xff] %v24725_v41  ;;  %v15971_v54 = vsub.f32 %v15969_v47, %v15970_v44  ;;  %v16471_v12 = vsub.f32 %v20406_v15, %v16379_v53  ;;  %21759 = vmatpush3.bf16.msra.mxu1 %v24496_v6  ;;  %20518 = vmatprep.mubr.f32.mxu1 %v24441_v23 }
 0x3ef   :  { %26577 = vst [vmem:[#allocation43_spill] sm:$0xff] %v24728_v55  ;;  %v15964_v63 = vsub.f32 %v15962_v33, %v15963_v5  ;;  %v24732_v3 = vpack.c.bf16 %v16379_v53, %v16376_v36  ;;  %v16464_v11 = vsub.f32 %v3271_v28, %v16376_v36  ;;  %21761 = vmatprep.subr.bf16.mxu1 %v24492_v39  ;;  %v20409_v38 = vpop.f32.mrb[54].mxu0 }
 0x3f0   :  { %v24735_v43 = vpack.c.bf16 %v15470_v29, %v15463_v21  ;;  %v16472_v30 = vand.u32 4294901760, %v16471_v12  ;;  %v16881_v61 = vand.u32 4294901760, %v20409_v38  ;;  %v3283_v0 = vpop.f32.mrb[55].mxu0  ;;  %v15972_v59 = vand.u32 4294901760, %v15971_v54 }
 0x3f1   :  { %26578 = vst [vmem:[#allocation46_spill] sm:$0xff] %v24732_v3  ;;  %v24737_v55 = vpack.c.bf16 %v15970_v44, %v15963_v5  ;;  %v16465_v15 = vand.u32 4294901760, %v16464_v11  ;;  %v16878_v47 = vand.u32 4294901760, %v3283_v0  ;;  %v15965_v6 = vand.u32 4294901760, %v15964_v63 }
 0x3f2   :  { %26579 = vst [vmem:[#allocation47_spill] sm:$0xff] %v24735_v43  ;;  %v24739_v27 = vpack.c.bf16 %v16471_v12, %v16464_v11  ;;  %v16473_v33 = vsub.f32 %v16471_v12, %v16472_v30  ;;  %v16973_v53 = vsub.f32 %v20409_v38, %v16881_v61 }
 0x3f3   :  { %26580 = vst [vmem:[#allocation50_spill] sm:$0xff] %v24737_v55  ;;  %v16466_v3 = vsub.f32 %v16464_v11, %v16465_v15  ;;  %v24741_v28 = vpack.c.bf16 %v16881_v61, %v16878_v47  ;;  %v16966_v36 = vsub.f32 %v3283_v0, %v16878_v47  ;;  %v20412_v41 = vpop.f32.mrb[56].mxu0  ;;  %v24743_v29 = vpack.c.bf16 %v15972_v59, %v15965_v6 }
 0x3f4   :  { %26581 = vst [vmem:[#allocation51_spill] sm:$0xff] %v24739_v27  ;;  %v16974_v21 = vand.u32 4294901760, %v16973_v53  ;;  %v17383_v22 = vand.u32 4294901760, %v20412_v41  ;;  %v3295_v43 = vpop.f32.mrb[57].mxu0  ;;  %v16474_v54 = vand.u32 4294901760, %v16473_v33  ;;  %v24745_v44 = vpack.c.bf16 %v16472_v30, %v16465_v15 }
 0x3f5   :  { %26582 = vst [vmem:[#allocation52_spill] sm:$0xff] %v24741_v28  ;;  %v16967_v5 = vand.u32 4294901760, %v16966_v36  ;;  %v17380_v55 = vand.u32 4294901760, %v3295_v43  ;;  %20519 = vmatmul.mubr.f32.vlgmr.msra.gmra.mrb[4].mxu1 %v24471_v10  ;;  %v16467_v63 = vand.u32 4294901760, %v16466_v3  ;;  %v24748_v12 = vpack.c.bf16 %v16973_v53, %v16966_v36 }
 0x3f6   :  { %26583 = vst [vmem:[#allocation53_spill] sm:$0xff] %v24745_v44  ;;  %v16975_v11 = vsub.f32 %v16973_v53, %v16974_v21  ;;  %v17475_v38 = vsub.f32 %v20412_v41, %v17383_v22  ;;  %21763 = vmatpush3.bf16.msra.mxu1 %v24492_v39  ;;  %20525 = vmatprep.mubr.f32.mxu1 %v24445_v37 }
 0x3f7   :  { %26584 = vst [vmem:[#allocation58_spill] sm:$0xff] %v24748_v12  ;;  %v16968_v61 = vsub.f32 %v16966_v36, %v16967_v5  ;;  %v24752_v0 = vpack.c.bf16 %v17383_v22, %v17380_v55  ;;  %v17468_v59 = vsub.f32 %v3295_v43, %v17380_v55  ;;  %21765 = vmatprep.subr.bf16.mxu1 %v24502_v20  ;;  %v20415_v30 = vpop.f32.mrb[58].mxu0 }
 0x3f8   :  { %v24755_v15 = vpack.c.bf16 %v16474_v54, %v16467_v63  ;;  %v17476_v47 = vand.u32 4294901760, %v17475_v38  ;;  %v17885_v6 = vand.u32 4294901760, %v20415_v30  ;;  %v3307_v3 = vpop.f32.mrb[59].mxu0  ;;  %v16976_v33 = vand.u32 4294901760, %v16975_v11 }
 0x3f9   :  { %26585 = vst [vmem:[#allocation59_spill] sm:$0xff] %v24752_v0  ;;  %v24757_v12 = vpack.c.bf16 %v16974_v21, %v16967_v5  ;;  %v17469_v41 = vand.u32 4294901760, %v17468_v59  ;;  %v17882_v53 = vand.u32 4294901760, %v3307_v3  ;;  %v16969_v28 = vand.u32 4294901760, %v16968_v61 }
 0x3fa   :  { %26586 = vst [vmem:[#allocation62_spill] sm:$0xff] %v24755_v15  ;;  %v24759_v44 = vpack.c.bf16 %v17475_v38, %v17468_v59  ;;  %v17477_v36 = vsub.f32 %v17475_v38, %v17476_v47  ;;  %v17977_v22 = vsub.f32 %v20415_v30, %v17885_v6 }
 0x3fb   :  { %v17470_v0 = vsub.f32 %v17468_v59, %v17469_v41  ;;  %v24761_v55 = vpack.c.bf16 %v17885_v6, %v17882_v53  ;;  %v17970_v43 = vsub.f32 %v3307_v3, %v17882_v53  ;;  %v24763_v27 = vpack.c.bf16 %v16976_v33, %v16969_v28 }
 0x3fc   :  { %v17978_v54 = vand.u32 4294901760, %v17977_v22  ;;  %v17478_v63 = vand.u32 4294901760, %v17477_v36  ;;  %v24765_v15 = vpack.c.bf16 %v17476_v47, %v17469_v41 }
 0x3fd   :  { %26587 = vst [vmem:[#allocation63_spill] sm:$0xff] %v24761_v55  ;;  %v17971_v11 = vand.u32 4294901760, %v17970_v43  ;;  %20526 = vmatmul.mubr.f32.vlgmr.msra.gmra.mrb[4].mxu1 %v24474_v13  ;;  %v17471_v21 = vand.u32 4294901760, %v17470_v0  ;;  %v24768_v5 = vpack.c.bf16 %v17977_v22, %v17970_v43 }
 0x3fe   :  { %26588 = vst [vmem:[#allocation66_spill] sm:$0xff] %v24765_v15  ;;  %v17979_v61 = vsub.f32 %v17977_v22, %v17978_v54  ;;  %21767 = vmatpush3.bf16.msra.mxu1 %v24502_v20  ;;  %20532 = vmatprep.mubr.f32.mxu1 %v24437_v52 }
 0x3ff   :  { %26589 = vst [vmem:[#allocation67_spill] sm:$0xff] %v24768_v5  ;;  %v17972_v38 = vsub.f32 %v17970_v43, %v17971_v11  ;;  %21769 = vmatprep.subr.bf16.mxu1 %v24492_v39  ;;  %v24773_v28 = vpack.c.bf16 %v17478_v63, %v17471_v21  ;;  %v24775_v59 = vpack.c.bf16 %v17978_v54, %v17971_v11  ;;  %v26607_v63 = vld [vmem:[#allocation40_spill] sm:$0xff]  ;;  %v26608_v21 = vld [vmem:[#allocation45_spill] sm:$0xff]  ;;  %v26653_v5 = vld [vmem:[#allocation118_spill] sm:$0xff] }
 0x400   :  { %v17980_v30 = vand.u32 4294901760, %v17979_v61  ;;  %v26609_v61 = vld [vmem:[#allocation54_spill] sm:$0xff] }
 0x401   :  { %26590 = vst [vmem:[#allocation68_spill] sm:$0xff] %v24775_v59  ;;  %v17973_v47 = vand.u32 4294901760, %v17972_v38 }
 0x403   :  { %v24777_v6 = vpack.c.bf16 %v17980_v30, %v17973_v47 }
 0x405   :  { %26591 = vst [vmem:[#allocation70_spill] sm:$0xff] %v24777_v6  ;;  %20533 = vmatmul.mubr.f32.vlgmr.msra.gmra.mrb[4].mxu1 %v24468_v7  ;;  %v26657_v6 = vld [vmem:[#allocation124_spill] sm:$0xff] }
 0x406   :  { %21771 = vmatpush3.bf16.msra.mxu1 %v24492_v39  ;;  %20539 = vmatprep.mubr.f32.mxu1 %v24437_v52 }
 0x407   :  { %21773 = vmatprep.subr.bf16.mxu1 %v24498_v60 }
 0x40d   :  { %20540 = vmatmul.mubr.f32.vlgmr.msra.gmra.mrb[4].mxu1 %v24468_v7 }
 0x40e   :  { %21775 = vmatpush3.bf16.msra.mxu1 %v24498_v60  ;;  %20546 = vmatprep.mubr.f32.mxu1 %v24451_v56 }
 0x40f   :  { %21777 = vmatprep.subr.bf16.mxu1 %v24519_v19 }
 0x411   :  { %20547 = vmatmul.mubr.f32.vlgmr.msra.gmra.mrb[6].mxu1 %v24481_v24 }
 0x412   :  { %21779 = vmatpush3.bf16.msra.mxu1 %v24519_v19  ;;  %20553 = vmatprep.mubr.f32.mxu1 %v24437_v52 }
 0x413   :  { %21781 = vmatprep.subr.bf16.mxu1 %v24505_v16 }
 0x419   :  { %20554 = vmatmul.mubr.f32.vlgmr.msra.gmra.mrb[6].mxu1 %v24468_v7 }
 0x41a   :  { %21783 = vmatpush3.bf16.msra.mxu1 %v24505_v16  ;;  %20560 = vmatprep.mubr.f32.mxu1 %v24441_v23 }
 0x41b   :  { %21785 = vmatprep.subr.bf16.mxu1 %v24498_v60 }
 0x421   :  { %20561 = vmatmul.mubr.f32.vlgmr.msra.gmra.mrb[6].mxu1 %v24471_v10 }
 0x422   :  { %21787 = vmatpush3.bf16.msra.mxu1 %v24498_v60  ;;  %20567 = vmatprep.mubr.f32.mxu1 %v24445_v37 }
 0x423   :  { %21789 = vmatprep.subr.bf16.mxu1 %v24513_v9 }
 0x429   :  { %20568 = vmatmul.mubr.f32.vlgmr.msra.gmra.mrb[6].mxu1 %v24474_v13 }
 0x42a   :  { %21791 = vmatpush3.bf16.msra.mxu1 %v24513_v9  ;;  %20574 = vmatprep.mubr.f32.mxu1 %v24437_v52 }
 0x42b   :  { %21793 = vmatprep.subr.bf16.mxu1 %v24498_v60 }
 0x431   :  { %20575 = vmatmul.mubr.f32.vlgmr.msra.gmra.mrb[6].mxu1 %v24468_v7 }
 0x432   :  { %21795 = vmatpush3.bf16.msra.mxu1 %v24498_v60  ;;  %20581 = vmatprep.mubr.f32.mxu1 %v24437_v52 }
 0x433   :  { %21797 = vmatprep.subr.bf16.mxu1 %v24508_v25 }
 0x439   :  { %20582 = vmatmul.mubr.f32.vlgmr.msra.gmra.mrb[6].mxu1 %v24468_v7 }
 0x43a   :  { %21799 = vmatpush3.bf16.msra.mxu1 %v24508_v25  ;;  %20588 = vmatprep.mubr.f32.mxu1 %v24451_v56 }
 0x43b   :  { %21801 = vmatprep.subr.bf16.mxu1 %v24531_v49 }
 0x43d   :  { %20589 = vmatmul.mubr.f32.vlgmr.msra.gmra.mrb[8].mxu1 %v24481_v24 }
 0x43e   :  { %21803 = vmatpush3.bf16.msra.mxu1 %v24531_v49  ;;  %20595 = vmatprep.mubr.f32.mxu1 %v24437_v52  ;;  %v26596_v49 = vld [vmem:[#allocation29_spill] sm:$0xff] }
 0x43f   :  { %21805 = vmatprep.subr.bf16.mxu1 %v24515_v32 }
 0x445   :  { %20596 = vmatmul.mubr.f32.vlgmr.msra.gmra.mrb[8].mxu1 %v24468_v7 }
 0x446   :  { %21807 = vmatpush3.bf16.msra.mxu1 %v24515_v32  ;;  %20602 = vmatprep.mubr.f32.mxu1 %v24441_v23  ;;  %v26592_v32 = vld [vmem:[#allocation21_spill] sm:$0xff] }
 0x447   :  { %21809 = vmatprep.subr.bf16.mxu1 %v24508_v25 }
 0x44d   :  { %20603 = vmatmul.mubr.f32.vlgmr.msra.gmra.mrb[8].mxu1 %v24471_v10 }
 0x44e   :  { %21811 = vmatpush3.bf16.msra.mxu1 %v24508_v25  ;;  %20609 = vmatprep.mubr.f32.mxu1 %v24445_v37 }
 0x44f   :  { %21813 = vmatprep.subr.bf16.mxu1 %v24521_v62 }
 0x455   :  { %20610 = vmatmul.mubr.f32.vlgmr.msra.gmra.mrb[8].mxu1 %v24474_v13 }
 0x456   :  { %21815 = vmatpush3.bf16.msra.mxu1 %v24521_v62  ;;  %20616 = vmatprep.mubr.f32.mxu1 %v24437_v52 }
 0x457   :  { %21817 = vmatprep.subr.bf16.mxu1 %v24508_v25 }
 0x45d   :  { %20617 = vmatmul.mubr.f32.vlgmr.msra.gmra.mrb[8].mxu1 %v24468_v7 }
 0x45e   :  { %21819 = vmatpush3.bf16.msra.mxu1 %v24508_v25  ;;  %20623 = vmatprep.mubr.f32.mxu1 %v24437_v52 }
 0x45f   :  { %21821 = vmatprep.subr.bf16.mxu1 %v24517_v46 }
 0x465   :  { %20624 = vmatmul.mubr.f32.vlgmr.msra.gmra.mrb[8].mxu1 %v24468_v7 }
 0x466   :  { %21823 = vmatpush3.bf16.msra.mxu1 %v24517_v46  ;;  %20630 = vmatprep.mubr.f32.mxu1 %v24451_v56 }
 0x467   :  { %21825 = vmatprep.subr.bf16.mxu1 %v24539_v4 }
 0x469   :  { %20631 = vmatmul.mubr.f32.vlgmr.msra.gmra.mrb[10].mxu1 %v24481_v24 }
 0x46a   :  { %21827 = vmatpush3.bf16.msra.mxu1 %v24539_v4  ;;  %20637 = vmatprep.mubr.f32.mxu1 %v24437_v52  ;;  %v26598_v4 = vld [vmem:[#allocation41_spill] sm:$0xff] }
 0x46b   :  { %21829 = vmatprep.subr.bf16.mxu1 %v24524_v58 }
 0x471   :  { %20638 = vmatmul.mubr.f32.vlgmr.msra.gmra.mrb[10].mxu1 %v24468_v7 }
 0x472   :  { %21831 = vmatpush3.bf16.msra.mxu1 %v24524_v58  ;;  %20644 = vmatprep.mubr.f32.mxu1 %v24441_v23  ;;  %v26594_v58 = vld [vmem:[#allocation23_spill] sm:$0xff] }
 0x473   :  { %21833 = vmatprep.subr.bf16.mxu1 %v24517_v46 }
 0x479   :  { %20645 = vmatmul.mubr.f32.vlgmr.msra.gmra.mrb[10].mxu1 %v24471_v10 }
 0x47a   :  { %21835 = vmatpush3.bf16.msra.mxu1 %v24517_v46  ;;  %20651 = vmatprep.mubr.f32.mxu1 %v24445_v37 }
 0x47b   :  { %21837 = vmatprep.subr.bf16.mxu1 %v24533_v40 }
 0x481   :  { %20652 = vmatmul.mubr.f32.vlgmr.msra.gmra.mrb[10].mxu1 %v24474_v13 }
 0x482   :  { %21839 = vmatpush3.bf16.msra.mxu1 %v24533_v40  ;;  %20658 = vmatprep.mubr.f32.mxu1 %v24437_v52 }
 0x483   :  { %21841 = vmatprep.subr.bf16.mxu1 %v24517_v46 }
 0x488   :  { %v24851_v39 = vpop.f32.mrb[0].mxu1 }
 0x489   :  { %v24853_v60 = vpop.f32.mrb[1].mxu1  ;;  %20659 = vmatmul.mubr.f32.vlgmr.msra.gmra.mrb[10].mxu1 %v24468_v7  ;;  %v25021_v3 = vmul.f32 %v24851_v39, %v24851_v39 }
 0x48a   :  { %21843 = vmatpush3.bf16.msra.mxu1 %v24517_v46  ;;  %20665 = vmatprep.mubr.f32.mxu1 %v24437_v52  ;;  %v26593_v46 = vld [vmem:[#allocation24_spill] sm:$0xff]  ;;  %v25031_v36 = vmul.f32 %v24853_v60, %v24853_v60 }
 0x48b   :  { %21845 = vmatprep.subr.bf16.mxu1 %v24528_v34 }
 0x491   :  { %20666 = vmatmul.mubr.f32.vlgmr.msra.gmra.mrb[10].mxu1 %v24468_v7 }
 0x492   :  { %21847 = vmatpush3.bf16.msra.mxu1 %v24528_v34  ;;  %20672 = vmatprep.mubr.f32.mxu1 %v24451_v56 }
 0x493   :  { %21849 = vmatprep.subr.bf16.mxu1 %v24551_v2 }
 0x495   :  { %20673 = vmatmul.mubr.f32.vlgmr.msra.gmra.mrb[12].mxu1 %v24481_v24 }
 0x496   :  { %21851 = vmatpush3.bf16.msra.mxu1 %v24551_v2  ;;  %20679 = vmatprep.mubr.f32.mxu1 %v24437_v52 }
 0x497   :  { %21853 = vmatprep.subr.bf16.mxu1 %v24535_v51 }
 0x49d   :  { %20680 = vmatmul.mubr.f32.vlgmr.msra.gmra.mrb[12].mxu1 %v24468_v7 }
 0x49e   :  { %21855 = vmatpush3.bf16.msra.mxu1 %v24535_v51  ;;  %20686 = vmatprep.mubr.f32.mxu1 %v24441_v23 }
 0x49f   :  { %21857 = vmatprep.subr.bf16.mxu1 %v24528_v34 }
 0x4a5   :  { %20687 = vmatmul.mubr.f32.vlgmr.msra.gmra.mrb[12].mxu1 %v24471_v10 }
 0x4a6   :  { %21859 = vmatpush3.bf16.msra.mxu1 %v24528_v34  ;;  %20693 = vmatprep.mubr.f32.mxu1 %v24445_v37 }
 0x4a7   :  { %21861 = vmatprep.subr.bf16.mxu1 %v24541_v31 }
 0x4ad   :  { %20694 = vmatmul.mubr.f32.vlgmr.msra.gmra.mrb[12].mxu1 %v24474_v13 }
 0x4ae   :  { %21863 = vmatpush3.bf16.msra.mxu1 %v24541_v31  ;;  %20700 = vmatprep.mubr.f32.mxu1 %v24437_v52  ;;  %v26599_v31 = vld [vmem:[#allocation32_spill] sm:$0xff] }
 0x4af   :  { %21865 = vmatprep.subr.bf16.mxu1 %v24528_v34 }
 0x4b4   :  { %v24879_v20 = vpop.f32.mrb[2].mxu1 }
 0x4b5   :  { %v24881_v16 = vpop.f32.mrb[3].mxu1  ;;  %20701 = vmatmul.mubr.f32.vlgmr.msra.gmra.mrb[12].mxu1 %v24468_v7  ;;  %v25071_v38 = vmul.f32 %v24879_v20, %v24879_v20 }
 0x4b6   :  { %21867 = vmatpush3.bf16.msra.mxu1 %v24528_v34  ;;  %20707 = vmatprep.mubr.f32.mxu1 %v24437_v52  ;;  %v26595_v34 = vld [vmem:[#allocation25_spill] sm:$0xff] }
 0x4b7   :  { %21869 = vmatprep.subr.bf16.mxu1 %v24537_v45 }
 0x4bd   :  { %20708 = vmatmul.mubr.f32.vlgmr.msra.gmra.mrb[12].mxu1 %v24468_v7 }
 0x4be   :  { %21871 = vmatpush3.bf16.msra.mxu1 %v24537_v45  ;;  %20714 = vmatprep.mubr.f32.mxu1 %v24451_v56 }
 0x4bf   :  { %21873 = vmatprep.subr.bf16.mxu1 %v24559_v26 }
 0x4c1   :  { %20715 = vmatmul.mubr.f32.vlgmr.msra.gmra.mrb[14].mxu1 %v24481_v24 }
 0x4c2   :  { %21875 = vmatpush3.bf16.msra.mxu1 %v24559_v26  ;;  %20721 = vmatprep.mubr.f32.mxu1 %v24437_v52  ;;  %v26602_v26 = vld [vmem:[#allocation49_spill] sm:$0xff] }
 0x4c3   :  { %21877 = vmatprep.subr.bf16.mxu1 %v24544_v1 }
 0x4c9   :  { %20722 = vmatmul.mubr.f32.vlgmr.msra.gmra.mrb[14].mxu1 %v24468_v7 }
 0x4ca   :  { %21879 = vmatpush3.bf16.msra.mxu1 %v24544_v1  ;;  %20728 = vmatprep.mubr.f32.mxu1 %v24441_v23  ;;  %v26600_v1 = vld [vmem:[#allocation38_spill] sm:$0xff] }
 0x4cb   :  { %21881 = vmatprep.subr.bf16.mxu1 %v24537_v45 }
 0x4d1   :  { %20729 = vmatmul.mubr.f32.vlgmr.msra.gmra.mrb[14].mxu1 %v24471_v10 }
 0x4d2   :  { %21883 = vmatpush3.bf16.msra.mxu1 %v24537_v45  ;;  %20735 = vmatprep.mubr.f32.mxu1 %v24445_v37 }
 0x4d3   :  { %21885 = vmatprep.subr.bf16.mxu1 %v24553_v17 }
 0x4d9   :  { %20736 = vmatmul.mubr.f32.vlgmr.msra.gmra.mrb[14].mxu1 %v24474_v13 }
 0x4da   :  { %21887 = vmatpush3.bf16.msra.mxu1 %v24553_v17  ;;  %20742 = vmatprep.mubr.f32.mxu1 %v24437_v52  ;;  %v26601_v17 = vld [vmem:[#allocation33_spill] sm:$0xff] }
 0x4db   :  { %21889 = vmatprep.subr.bf16.mxu1 %v24537_v45 }
 0x4e0   :  { %v24907_v25 = vpop.f32.mrb[4].mxu1 }
 0x4e1   :  { %v24909_v9 = vpop.f32.mrb[5].mxu1  ;;  %20743 = vmatmul.mubr.f32.vlgmr.msra.gmra.mrb[14].mxu1 %v24468_v7 }
 0x4e2   :  { %21891 = vmatpush3.bf16.msra.mxu1 %v24537_v45  ;;  %20749 = vmatprep.mubr.f32.mxu1 %v24437_v52  ;;  %v26597_v45 = vld [vmem:[#allocation28_spill] sm:$0xff] }
 0x4e3   :  { %21893 = vmatprep.subr.bf16.mxu1 %v24548_v35 }
 0x4e9   :  { %20750 = vmatmul.mubr.f32.vlgmr.msra.gmra.mrb[14].mxu1 %v24468_v7 }
 0x4ea   :  { %21895 = vmatpush3.bf16.msra.mxu1 %v24548_v35  ;;  %20756 = vmatprep.mubr.f32.mxu1 %v24451_v56 }
 0x4eb   :  { %21897 = vmatprep.subr.bf16.mxu1 %v24571_v18 }
 0x4ed   :  { %20757 = vmatmul.mubr.f32.vlgmr.msra.gmra.mrb[16].mxu1 %v24481_v24 }
 0x4ee   :  { %21899 = vmatpush3.bf16.msra.mxu1 %v24571_v18  ;;  %20763 = vmatprep.mubr.f32.mxu1 %v24437_v52  ;;  %v26603_v18 = vld [vmem:[#allocation39_spill] sm:$0xff] }
 0x4ef   :  { %21901 = vmatprep.subr.bf16.mxu1 %v26592_v32 }
 0x4f5   :  { %20764 = vmatmul.mubr.f32.vlgmr.msra.gmra.mrb[16].mxu1 %v24468_v7 }
 0x4f6   :  { %21903 = vmatpush3.bf16.msra.mxu1 %v26592_v32  ;;  %20770 = vmatprep.mubr.f32.mxu1 %v24441_v23 }
 0x4f7   :  { %21905 = vmatprep.subr.bf16.mxu1 %v24548_v35 }
 0x4fd   :  { %20771 = vmatmul.mubr.f32.vlgmr.msra.gmra.mrb[16].mxu1 %v24471_v10 }
 0x4fe   :  { %21907 = vmatpush3.bf16.msra.mxu1 %v24548_v35  ;;  %20777 = vmatprep.mubr.f32.mxu1 %v24445_v37 }
 0x4ff   :  { %21909 = vmatprep.subr.bf16.mxu1 %v26593_v46 }
 0x505   :  { %20778 = vmatmul.mubr.f32.vlgmr.msra.gmra.mrb[16].mxu1 %v24474_v13 }
 0x506   :  { %21911 = vmatpush3.bf16.msra.mxu1 %v26593_v46  ;;  %20784 = vmatprep.mubr.f32.mxu1 %v24437_v52 }
 0x507   :  { %21913 = vmatprep.subr.bf16.mxu1 %v24548_v35 }
 0x50c   :  { %v24935_v19 = vpop.f32.mrb[6].mxu1 }
 0x50d   :  { %v24937_v62 = vpop.f32.mrb[7].mxu1  ;;  %20785 = vmatmul.mubr.f32.vlgmr.msra.gmra.mrb[16].mxu1 %v24468_v7 }
 0x50e   :  { %21915 = vmatpush3.bf16.msra.mxu1 %v24548_v35  ;;  %20791 = vmatprep.mubr.f32.mxu1 %v24437_v52 }
 0x50f   :  { %21917 = vmatprep.subr.bf16.mxu1 %v26594_v58 }
 0x515   :  { %20792 = vmatmul.mubr.f32.vlgmr.msra.gmra.mrb[16].mxu1 %v24468_v7 }
 0x516   :  { %21919 = vmatpush3.bf16.msra.mxu1 %v26594_v58  ;;  %20798 = vmatprep.mubr.f32.mxu1 %v24451_v56 }
 0x517   :  { %21921 = vmatprep.subr.bf16.mxu1 %v24579_v42 }
 0x519   :  { %20799 = vmatmul.mubr.f32.vlgmr.msra.gmra.mrb[18].mxu1 %v24481_v24 }
 0x51a   :  { %21923 = vmatpush3.bf16.msra.mxu1 %v24579_v42  ;;  %20805 = vmatprep.mubr.f32.mxu1 %v24437_v52  ;;  %v26604_v42 = vld [vmem:[#allocation44_spill] sm:$0xff] }
 0x51b   :  { %21925 = vmatprep.subr.bf16.mxu1 %v26595_v34 }
 0x521   :  { %20806 = vmatmul.mubr.f32.vlgmr.msra.gmra.mrb[18].mxu1 %v24468_v7 }
 0x522   :  { %21927 = vmatpush3.bf16.msra.mxu1 %v26595_v34  ;;  %20812 = vmatprep.mubr.f32.mxu1 %v24441_v23 }
 0x523   :  { %21929 = vmatprep.subr.bf16.mxu1 %v26594_v58 }
 0x529   :  { %20813 = vmatmul.mubr.f32.vlgmr.msra.gmra.mrb[18].mxu1 %v24471_v10 }
 0x52a   :  { %21931 = vmatpush3.bf16.msra.mxu1 %v26594_v58  ;;  %20819 = vmatprep.mubr.f32.mxu1 %v24445_v37 }
 0x52b   :  { %21933 = vmatprep.subr.bf16.mxu1 %v26596_v49 }
 0x531   :  { %20820 = vmatmul.mubr.f32.vlgmr.msra.gmra.mrb[18].mxu1 %v24474_v13 }
 0x532   :  { %21935 = vmatpush3.bf16.msra.mxu1 %v26596_v49  ;;  %20826 = vmatprep.mubr.f32.mxu1 %v24437_v52  ;;  %v26614_v49 = vld [vmem:[#allocation55_spill] sm:$0xff] }
 0x533   :  { %21937 = vmatprep.subr.bf16.mxu1 %v26594_v58 }
 0x538   :  { %v24963_v40 = vpop.f32.mrb[8].mxu1 }
 0x539   :  { %v24965_v51 = vpop.f32.mrb[9].mxu1  ;;  %20827 = vmatmul.mubr.f32.vlgmr.msra.gmra.mrb[18].mxu1 %v24468_v7 }
 0x53a   :  { %21939 = vmatpush3.bf16.msra.mxu1 %v26594_v58  ;;  %20833 = vmatprep.mubr.f32.mxu1 %v24437_v52  ;;  %v26612_v58 = vld [vmem:[#allocation48_spill] sm:$0xff] }
 0x53b   :  { %21941 = vmatprep.subr.bf16.mxu1 %v26597_v45 }
 0x541   :  { %20834 = vmatmul.mubr.f32.vlgmr.msra.gmra.mrb[18].mxu1 %v24468_v7 }
 0x542   :  { %21943 = vmatpush3.bf16.msra.mxu1 %v26597_v45  ;;  %20840 = vmatprep.mubr.f32.mxu1 %v24451_v56 }
 0x543   :  { %21945 = vmatprep.subr.bf16.mxu1 %v26598_v4 }
 0x545   :  { %20841 = vmatmul.mubr.f32.vlgmr.msra.gmra.mrb[20].mxu1 %v24481_v24 }
 0x546   :  { %21947 = vmatpush3.bf16.msra.mxu1 %v26598_v4  ;;  %20847 = vmatprep.mubr.f32.mxu1 %v24437_v52 }
 0x547   :  { %21949 = vmatprep.subr.bf16.mxu1 %v26599_v31 }
 0x54d   :  { %20848 = vmatmul.mubr.f32.vlgmr.msra.gmra.mrb[20].mxu1 %v24468_v7 }
 0x54e   :  { %21951 = vmatpush3.bf16.msra.mxu1 %v26599_v31  ;;  %20854 = vmatprep.mubr.f32.mxu1 %v24441_v23  ;;  %v25121_v31 = vmul.f32 %v24907_v25, %v24907_v25 }
 0x54f   :  { %21953 = vmatprep.subr.bf16.mxu1 %v26597_v45 }
 0x555   :  { %20855 = vmatmul.mubr.f32.vlgmr.msra.gmra.mrb[20].mxu1 %v24471_v10 }
 0x556   :  { %21955 = vmatpush3.bf16.msra.mxu1 %v26597_v45  ;;  %20861 = vmatprep.mubr.f32.mxu1 %v24445_v37 }
 0x557   :  { %21957 = vmatprep.subr.bf16.mxu1 %v26600_v1 }
 0x55d   :  { %20862 = vmatmul.mubr.f32.vlgmr.msra.gmra.mrb[20].mxu1 %v24474_v13 }
 0x55e   :  { %21959 = vmatpush3.bf16.msra.mxu1 %v26600_v1  ;;  %20868 = vmatprep.mubr.f32.mxu1 %v24437_v52 }
 0x55f   :  { %21961 = vmatprep.subr.bf16.mxu1 %v26597_v45 }
 0x564   :  { %v24991_v35 = vpop.f32.mrb[10].mxu1 }
 0x565   :  { %v24993_v2 = vpop.f32.mrb[11].mxu1  ;;  %20869 = vmatmul.mubr.f32.vlgmr.msra.gmra.mrb[20].mxu1 %v24468_v7 }
 0x566   :  { %21963 = vmatpush3.bf16.msra.mxu1 %v26597_v45  ;;  %20875 = vmatprep.mubr.f32.mxu1 %v24437_v52  ;;  %v26615_v45 = vld [vmem:[#allocation57_spill] sm:$0xff] }
 0x567   :  { %21965 = vmatprep.subr.bf16.mxu1 %v26601_v17 }
 0x56d   :  { %20876 = vmatmul.mubr.f32.vlgmr.msra.gmra.mrb[20].mxu1 %v24468_v7 }
 0x56e   :  { %21967 = vmatpush3.bf16.msra.mxu1 %v26601_v17  ;;  %20882 = vmatprep.mubr.f32.mxu1 %v24451_v56 }
 0x56f   :  { %21969 = vmatprep.subr.bf16.mxu1 %v26602_v26 }
 0x571   :  { %20883 = vmatmul.mubr.f32.vlgmr.msra.gmra.mrb[22].mxu1 %v24481_v24 }
 0x572   :  { %21971 = vmatpush3.bf16.msra.mxu1 %v26602_v26  ;;  %20889 = vmatprep.mubr.f32.mxu1 %v24437_v52 }
 0x573   :  { %21973 = vmatprep.subr.bf16.mxu1 %v26603_v18 }
 0x579   :  { %20890 = vmatmul.mubr.f32.vlgmr.msra.gmra.mrb[22].mxu1 %v24468_v7 }
 0x57a   :  { %21975 = vmatpush3.bf16.msra.mxu1 %v26603_v18  ;;  %20896 = vmatprep.mubr.f32.mxu1 %v24441_v23  ;;  %v25131_v18 = vmul.f32 %v24909_v9, %v24909_v9 }
 0x57b   :  { %21977 = vmatprep.subr.bf16.mxu1 %v26601_v17 }
 0x581   :  { %20897 = vmatmul.mubr.f32.vlgmr.msra.gmra.mrb[22].mxu1 %v24471_v10 }
 0x582   :  { %21979 = vmatpush3.bf16.msra.mxu1 %v26601_v17  ;;  %20903 = vmatprep.mubr.f32.mxu1 %v24445_v37 }
 0x583   :  { %21981 = vmatprep.subr.bf16.mxu1 %v26604_v42 }
 0x589   :  { %20904 = vmatmul.mubr.f32.vlgmr.msra.gmra.mrb[22].mxu1 %v24474_v13 }
 0x58a   :  { %21983 = vmatpush3.bf16.msra.mxu1 %v26604_v42  ;;  %20910 = vmatprep.mubr.f32.mxu1 %v24437_v52 }
 0x58b   :  { %21985 = vmatprep.subr.bf16.mxu1 %v26601_v17 }
 0x590   :  { %v20709_v0 = vpop.f32.mrb[12].mxu1 }
 0x591   :  { %v25023_v33 = vmul.f32 %v20709_v0, %v20709_v0  ;;  %v25026_v41 = vmul.f32 %v20709_v0, %v24851_v39  ;;  %v6827_v53 = vpop.f32.mrb[13].mxu1  ;;  %20911 = vmatmul.mubr.f32.vlgmr.msra.gmra.mrb[22].mxu1 %v24468_v7 }
 0x592   :  { %v25033_v22 = vmul.f32 %v6827_v53, %v6827_v53  ;;  %v25036_v43 = vmul.f32 %v6827_v53, %v24853_v60  ;;  %21987 = vmatpush3.bf16.msra.mxu1 %v26601_v17  ;;  %20917 = vmatprep.mubr.f32.mxu1 %v24437_v52  ;;  %v25081_v60 = vmul.f32 %v24881_v16, %v24881_v16  ;;  %v26618_v53 = vld [vmem:[#allocation56_spill] sm:$0xff] }
 0x593   :  { %26605 = vst [vmem:[#allocation74_spill] sm:$0xff] %v25026_v41  ;;  %v25042_v54 = vadd.f32 %v25023_v33, %v25021_v3  ;;  %21989 = vmatprep.subr.bf16.mxu1 %v26607_v63  ;;  %v26650_v41 = vld [vmem:[#allocation100_spill] sm:$0xff] }
 0x594   :  { %26606 = vst [vmem:[#allocation76_spill] sm:$0xff] %v25036_v43  ;;  %v25047_v11 = vadd.f32 %v25033_v22, %v25031_v36  ;;  %v26646_v43 = vld [vmem:[#allocation91_spill] sm:$0xff] }
 0x596   :  { %v18527_v15 = vadd.f32 0.0001, %v25047_v11 }
 0x599   :  { %20918 = vmatmul.mubr.f32.vlgmr.msra.gmra.mrb[22].mxu1 %v24468_v7 }
 0x59a   :  { %21991 = vmatpush3.bf16.msra.mxu1 %v26607_v63  ;;  %20924 = vmatprep.mubr.f32.mxu1 %v24451_v56 }
 0x59b   :  { %21993 = vmatprep.subr.bf16.mxu1 %v24611_v14 }
 0x59d   :  { %20925 = vmatmul.mubr.f32.vlgmr.msra.gmra.mrb[24].mxu1 %v24481_v24 }
 0x59e   :  { %21995 = vmatpush3.bf16.msra.mxu1 %v24611_v14  ;;  %20931 = vmatprep.mubr.f32.mxu1 %v24437_v52 }
 0x59f   :  { %21997 = vmatprep.subr.bf16.mxu1 %v26608_v21 }
 0x5a5   :  { %20932 = vmatmul.mubr.f32.vlgmr.msra.gmra.mrb[24].mxu1 %v24468_v7 }
 0x5a6   :  { %21999 = vmatpush3.bf16.msra.mxu1 %v26608_v21  ;;  %20938 = vmatprep.mubr.f32.mxu1 %v24441_v23  ;;  %v26620_v21 = vld [vmem:[#allocation60_spill] sm:$0xff] }
 0x5a7   :  { %22001 = vmatprep.subr.bf16.mxu1 %v26607_v63 }
 0x5ad   :  { %20939 = vmatmul.mubr.f32.vlgmr.msra.gmra.mrb[24].mxu1 %v24471_v10 }
 0x5ae   :  { %22003 = vmatpush3.bf16.msra.mxu1 %v26607_v63  ;;  %20945 = vmatprep.mubr.f32.mxu1 %v24445_v37 }
 0x5af   :  { %22005 = vmatprep.subr.bf16.mxu1 %v26609_v61 }
 0x5b5   :  { %20946 = vmatmul.mubr.f32.vlgmr.msra.gmra.mrb[24].mxu1 %v24474_v13 }
 0x5b6   :  { %22007 = vmatpush3.bf16.msra.mxu1 %v26609_v61  ;;  %20952 = vmatprep.mubr.f32.mxu1 %v24437_v52  ;;  %v26621_v61 = vld [vmem:[#allocation65_spill] sm:$0xff] }
 0x5b7   :  { %22009 = vmatprep.subr.bf16.mxu1 %v26607_v63 }
 0x5bc   :  { %v20751_v14 = vpop.f32.mrb[14].mxu1 }
 0x5bd   :  { %v25073_v30 = vmul.f32 %v20751_v14, %v20751_v14  ;;  %v25076_v47 = vmul.f32 %v20751_v14, %v24879_v20  ;;  %v7329_v39 = vpop.f32.mrb[15].mxu1  ;;  %20953 = vmatmul.mubr.f32.vlgmr.msra.gmra.mrb[24].mxu1 %v24468_v7 }
 0x5be   :  { %v25083_v32 = vmul.f32 %v7329_v39, %v7329_v39  ;;  %v25086_v46 = vmul.f32 %v7329_v39, %v24881_v16  ;;  %22011 = vmatpush3.bf16.msra.mxu1 %v26607_v63  ;;  %20959 = vmatprep.mubr.f32.mxu1 %v24437_v52  ;;  %v26613_v16 = vld [vmem:[#allocation64_spill] sm:$0xff]  ;;  %v25171_v39 = vmul.f32 %v24935_v19, %v24935_v19 }
 0x5bf   :  { %26610 = vst [vmem:[#allocation77_spill] sm:$0xff] %v25076_v47  ;;  %v25092_v20 = vadd.f32 %v25073_v30, %v25071_v38  ;;  %22013 = vmatprep.subr.bf16.mxu1 %v26612_v58 }
 0x5c0   :  { %26611 = vst [vmem:[#allocation78_spill] sm:$0xff] %v25086_v46  ;;  %v25097_v34 = vadd.f32 %v25083_v32, %v25081_v60 }
 0x5c5   :  { %20960 = vmatmul.mubr.f32.vlgmr.msra.gmra.mrb[24].mxu1 %v24468_v7 }
 0x5c6   :  { %22015 = vmatpush3.bf16.msra.mxu1 %v26612_v58  ;;  %20966 = vmatprep.mubr.f32.mxu1 %v24451_v56 }
 0x5c7   :  { %22017 = vmatprep.subr.bf16.mxu1 %v26613_v16 }
 0x5c9   :  { %20967 = vmatmul.mubr.f32.vlgmr.msra.gmra.mrb[26].mxu1 %v24481_v24 }
 0x5ca   :  { %22019 = vmatpush3.bf16.msra.mxu1 %v26613_v16  ;;  %20973 = vmatprep.mubr.f32.mxu1 %v24437_v52 }
 0x5cb   :  { %22021 = vmatprep.subr.bf16.mxu1 %v26614_v49 }
 0x5d1   :  { %20974 = vmatmul.mubr.f32.vlgmr.msra.gmra.mrb[26].mxu1 %v24468_v7 }
 0x5d2   :  { %22023 = vmatpush3.bf16.msra.mxu1 %v26614_v49  ;;  %20980 = vmatprep.mubr.f32.mxu1 %v24441_v23 }
 0x5d3   :  { %22025 = vmatprep.subr.bf16.mxu1 %v26612_v58 }
 0x5d9   :  { %20981 = vmatmul.mubr.f32.vlgmr.msra.gmra.mrb[26].mxu1 %v24471_v10 }
 0x5da   :  { %22027 = vmatpush3.bf16.msra.mxu1 %v26612_v58  ;;  %20987 = vmatprep.mubr.f32.mxu1 %v24445_v37 }
 0x5db   :  { %22029 = vmatprep.subr.bf16.mxu1 %v26615_v45 }
 0x5e1   :  { %20988 = vmatmul.mubr.f32.vlgmr.msra.gmra.mrb[26].mxu1 %v24474_v13 }
 0x5e2   :  { %22031 = vmatpush3.bf16.msra.mxu1 %v26615_v45  ;;  %20994 = vmatprep.mubr.f32.mxu1 %v24437_v52  ;;  %v25181_v45 = vmul.f32 %v24937_v62, %v24937_v62 }
 0x5e3   :  { %22033 = vmatprep.subr.bf16.mxu1 %v26612_v58 }
 0x5e8   :  { %v20793_v4 = vpop.f32.mrb[16].mxu1 }
 0x5e9   :  { %v25123_v1 = vmul.f32 %v20793_v4, %v20793_v4  ;;  %v25126_v17 = vmul.f32 %v20793_v4, %v24907_v25  ;;  %v7831_v26 = vpop.f32.mrb[17].mxu1  ;;  %20995 = vmatmul.mubr.f32.vlgmr.msra.gmra.mrb[26].mxu1 %v24468_v7 }
 0x5ea   :  { %v25133_v42 = vmul.f32 %v7831_v26, %v7831_v26  ;;  %v25136_v0 = vmul.f32 %v7831_v26, %v24909_v9  ;;  %22035 = vmatpush3.bf16.msra.mxu1 %v26612_v58  ;;  %21001 = vmatprep.mubr.f32.mxu1 %v24437_v52  ;;  %v26619_v9 = vld [vmem:[#allocation72_spill] sm:$0xff] }
 0x5eb   :  { %26616 = vst [vmem:[#allocation81_spill] sm:$0xff] %v25126_v17  ;;  %v25142_v25 = vadd.f32 %v25123_v1, %v25121_v31  ;;  %22037 = vmatprep.subr.bf16.mxu1 %v26618_v53 }
 0x5ec   :  { %26617 = vst [vmem:[#allocation83_spill] sm:$0xff] %v25136_v0  ;;  %v25147_v63 = vadd.f32 %v25133_v42, %v25131_v18 }
 0x5f1   :  { %21002 = vmatmul.mubr.f32.vlgmr.msra.gmra.mrb[26].mxu1 %v24468_v7 }
 0x5f2   :  { %22039 = vmatpush3.bf16.msra.mxu1 %v26618_v53  ;;  %21008 = vmatprep.mubr.f32.mxu1 %v24451_v56 }
 0x5f3   :  { %22041 = vmatprep.subr.bf16.mxu1 %v26619_v9 }
 0x5f5   :  { %21009 = vmatmul.mubr.f32.vlgmr.msra.gmra.mrb[28].mxu1 %v24481_v24 }
 0x5f6   :  { %22043 = vmatpush3.bf16.msra.mxu1 %v26619_v9  ;;  %21015 = vmatprep.mubr.f32.mxu1 %v24437_v52  ;;  %v26624_v9 = vld [vmem:[#allocation61_spill] sm:$0xff] }
 0x5f7   :  { %22045 = vmatprep.subr.bf16.mxu1 %v26620_v21 }
 0x5fd   :  { %21016 = vmatmul.mubr.f32.vlgmr.msra.gmra.mrb[28].mxu1 %v24468_v7 }
 0x5fe   :  { %22047 = vmatpush3.bf16.msra.mxu1 %v26620_v21  ;;  %21022 = vmatprep.mubr.f32.mxu1 %v24441_v23 }
 0x5ff   :  { %22049 = vmatprep.subr.bf16.mxu1 %v26618_v53 }
 0x605   :  { %21023 = vmatmul.mubr.f32.vlgmr.msra.gmra.mrb[28].mxu1 %v24471_v10 }
 0x606   :  { %22051 = vmatpush3.bf16.msra.mxu1 %v26618_v53  ;;  %21029 = vmatprep.mubr.f32.mxu1 %v24445_v37 }
 0x607   :  { %22053 = vmatprep.subr.bf16.mxu1 %v26621_v61 }
 0x60d   :  { %21030 = vmatmul.mubr.f32.vlgmr.msra.gmra.mrb[28].mxu1 %v24474_v13 }
 0x60e   :  { %22055 = vmatpush3.bf16.msra.mxu1 %v26621_v61  ;;  %21036 = vmatprep.mubr.f32.mxu1 %v24437_v52  ;;  %v26627_v61 = vld [vmem:[#allocation73_spill] sm:$0xff] }
 0x60f   :  { %22057 = vmatprep.subr.bf16.mxu1 %v26618_v53 }
 0x614   :  { %v20835_v14 = vpop.f32.mrb[18].mxu1 }
 0x615   :  { %v25173_v58 = vmul.f32 %v20835_v14, %v20835_v14  ;;  %v25176_v16 = vmul.f32 %v20835_v14, %v24935_v19  ;;  %v8333_v49 = vpop.f32.mrb[19].mxu1  ;;  %21037 = vmatmul.mubr.f32.vlgmr.msra.gmra.mrb[28].mxu1 %v24468_v7 }
 0x616   :  { %v25183_v4 = vmul.f32 %v8333_v49, %v8333_v49  ;;  %v25186_v26 = vmul.f32 %v8333_v49, %v24937_v62  ;;  %22059 = vmatpush3.bf16.msra.mxu1 %v26618_v53  ;;  %21043 = vmatprep.mubr.f32.mxu1 %v24437_v52  ;;  %v26625_v62 = vld [vmem:[#allocation80_spill] sm:$0xff]  ;;  %v26626_v53 = vld [vmem:[#allocation69_spill] sm:$0xff]  ;;  %v25221_v49 = vmul.f32 %v24963_v40, %v24963_v40 }
 0x617   :  { %26622 = vst [vmem:[#allocation84_spill] sm:$0xff] %v25176_v16  ;;  %v25192_v19 = vadd.f32 %v25173_v58, %v25171_v39  ;;  %22061 = vmatprep.subr.bf16.mxu1 %v26624_v9 }
 0x618   :  { %26623 = vst [vmem:[#allocation87_spill] sm:$0xff] %v25186_v26  ;;  %v25197_v21 = vadd.f32 %v25183_v4, %v25181_v45 }
 0x61d   :  { %21044 = vmatmul.mubr.f32.vlgmr.msra.gmra.mrb[28].mxu1 %v24468_v7 }
 0x61e   :  { %22063 = vmatpush3.bf16.msra.mxu1 %v26624_v9  ;;  %21050 = vmatprep.mubr.f32.mxu1 %v24451_v56 }
 0x61f   :  { %22065 = vmatprep.subr.bf16.mxu1 %v26625_v62 }
 0x621   :  { %21051 = vmatmul.mubr.f32.vlgmr.msra.gmra.mrb[30].mxu1 %v24481_v24 }
 0x622   :  { %22067 = vmatpush3.bf16.msra.mxu1 %v26625_v62  ;;  %21057 = vmatprep.mubr.f32.mxu1 %v24437_v52 }
 0x623   :  { %22069 = vmatprep.subr.bf16.mxu1 %v26626_v53 }
 0x629   :  { %21058 = vmatmul.mubr.f32.vlgmr.msra.gmra.mrb[30].mxu1 %v24468_v7 }
 0x62a   :  { %22071 = vmatpush3.bf16.msra.mxu1 %v26626_v53  ;;  %21064 = vmatprep.mubr.f32.mxu1 %v24441_v23 }
 0x62b   :  { %22073 = vmatprep.subr.bf16.mxu1 %v26624_v9 }
 0x631   :  { %21065 = vmatmul.mubr.f32.vlgmr.msra.gmra.mrb[30].mxu1 %v24471_v10 }
 0x632   :  { %22075 = vmatpush3.bf16.msra.mxu1 %v26624_v9  ;;  %21071 = vmatprep.mubr.f32.mxu1 %v24445_v37 }
 0x633   :  { %22077 = vmatprep.subr.bf16.mxu1 %v26627_v61 }
 0x639   :  { %21072 = vmatmul.mubr.f32.vlgmr.msra.gmra.mrb[30].mxu1 %v24474_v13 }
 0x63a   :  { %22079 = vmatpush3.bf16.msra.mxu1 %v26627_v61  ;;  %21078 = vmatprep.mubr.f32.mxu1 %v24437_v52  ;;  %v25231_v61 = vmul.f32 %v24965_v51, %v24965_v51 }
 0x63b   :  { %22081 = vmatprep.subr.bf16.mxu1 %v26624_v9 }
 0x640   :  { %v20877_v14 = vpop.f32.mrb[20].mxu1 }
 0x641   :  { %v25223_v62 = vmul.f32 %v20877_v14, %v20877_v14  ;;  %v25226_v53 = vmul.f32 %v20877_v14, %v24963_v40  ;;  %v8835_v26 = vpop.f32.mrb[21].mxu1  ;;  %21079 = vmatmul.mubr.f32.vlgmr.msra.gmra.mrb[30].mxu1 %v24468_v7  ;;  %v26630_v14 = vld [vmem:[#allocation71_spill] sm:$0xff] }
 0x642   :  { %v25233_v16 = vmul.f32 %v8835_v26, %v8835_v26  ;;  %v25236_v0 = vmul.f32 %v8835_v26, %v24965_v51  ;;  %22083 = vmatpush3.bf16.msra.mxu1 %v26624_v9  ;;  %21085 = vmatprep.mubr.f32.mxu1 %v24437_v52  ;;  %v26631_v51 = vld [vmem:[#allocation75_spill] sm:$0xff]  ;;  %v26632_v26 = vld [vmem:[#allocation82_spill] sm:$0xff]  ;;  %v25271_v9 = vmul.f32 %v24991_v35, %v24991_v35 }
 0x643   :  { %26628 = vst [vmem:[#allocation89_spill] sm:$0xff] %v25226_v53  ;;  %v25242_v40 = vadd.f32 %v25223_v62, %v25221_v49  ;;  %22085 = vmatprep.subr.bf16.mxu1 %v26630_v14 }
 0x644   :  { %26629 = vst [vmem:[#allocation90_spill] sm:$0xff] %v25236_v0  ;;  %v25247_v53 = vadd.f32 %v25233_v16, %v25231_v61  ;;  %26633 = vst [vmem:[#allocation92_spill] sm:$0xff] %v25271_v9 }
 0x649   :  { %21086 = vmatmul.mubr.f32.vlgmr.msra.gmra.mrb[30].mxu1 %v24468_v7 }
 0x64a   :  { %22087 = vmatpush3.bf16.msra.mxu1 %v26630_v14  ;;  %21092 = vmatprep.mubr.f32.mxu1 %v24451_v56 }
 0x64b   :  { %22089 = vmatprep.subr.bf16.mxu1 %v24651_v8 }
 0x64d   :  { %21093 = vmatmul.mubr.f32.vlgmr.msra.gmra.mrb[32].mxu1 %v24481_v24 }
 0x64e   :  { %22091 = vmatpush3.bf16.msra.mxu1 %v24651_v8  ;;  %21099 = vmatprep.mubr.f32.mxu1 %v24437_v52 }
 0x64f   :  { %22093 = vmatprep.subr.bf16.mxu1 %v26631_v51 }
 0x655   :  { %21100 = vmatmul.mubr.f32.vlgmr.msra.gmra.mrb[32].mxu1 %v24468_v7 }
 0x656   :  { %22095 = vmatpush3.bf16.msra.mxu1 %v26631_v51  ;;  %21106 = vmatprep.mubr.f32.mxu1 %v24441_v23 }
 0x657   :  { %22097 = vmatprep.subr.bf16.mxu1 %v26630_v14 }
 0x65d   :  { %21107 = vmatmul.mubr.f32.vlgmr.msra.gmra.mrb[32].mxu1 %v24471_v10 }
 0x65e   :  { %22099 = vmatpush3.bf16.msra.mxu1 %v26630_v14  ;;  %21113 = vmatprep.mubr.f32.mxu1 %v24445_v37 }
 0x65f   :  { %22101 = vmatprep.subr.bf16.mxu1 %v26632_v26 }
 0x665   :  { %21114 = vmatmul.mubr.f32.vlgmr.msra.gmra.mrb[32].mxu1 %v24474_v13 }
 0x666   :  { %22103 = vmatpush3.bf16.msra.mxu1 %v26632_v26  ;;  %21120 = vmatprep.mubr.f32.mxu1 %v24437_v52  ;;  %v25281_v26 = vmul.f32 %v24993_v2, %v24993_v2 }
 0x667   :  { %22105 = vmatprep.subr.bf16.mxu1 %v26630_v14 }
 0x668   :  { %26636 = vst [vmem:[#allocation98_spill] sm:$0xff] %v25281_v26 }
 0x66c   :  { %v20919_v8 = vpop.f32.mrb[22].mxu1 }
 0x66d   :  { %v25273_v51 = vmul.f32 %v20919_v8, %v20919_v8  ;;  %v25276_v0 = vmul.f32 %v20919_v8, %v24991_v35  ;;  %v9337_v17 = vpop.f32.mrb[23].mxu1  ;;  %21121 = vmatmul.mubr.f32.vlgmr.msra.gmra.mrb[32].mxu1 %v24468_v7  ;;  %v26640_v8 = vld [vmem:[#allocation79_spill] sm:$0xff] }
 0x66e   :  { %v25283_v46 = vmul.f32 %v9337_v17, %v9337_v17  ;;  %v25286_v47 = vmul.f32 %v9337_v17, %v24993_v2  ;;  %22107 = vmatpush3.bf16.msra.mxu1 %v26630_v14  ;;  %21127 = vmatprep.mubr.f32.mxu1 %v24437_v52  ;;  %v26642_v2 = vld [vmem:[#allocation94_spill] sm:$0xff]  ;;  %v26643_v17 = vld [vmem:[#allocation85_spill] sm:$0xff]  ;;  %v26644_v14 = vld [vmem:[#allocation88_spill] sm:$0xff] }
 0x66f   :  { %26634 = vst [vmem:[#allocation95_spill] sm:$0xff] %v25273_v51  ;;  %26635 = vst [vmem:[#allocation97_spill] sm:$0xff] %v25276_v0  ;;  %v25292_v35 = vadd.f32 %v25273_v51, %v25271_v9  ;;  %22109 = vmatprep.subr.bf16.mxu1 %v26640_v8  ;;  %v26669_v9 = vld [vmem:[#allocation31_spill] sm:$0xff] }
 0x670   :  { %26637 = vst [vmem:[#allocation99_spill] sm:$0xff] %v25283_v46  ;;  %26638 = vst [vmem:[#allocation101_spill] sm:$0xff] %v25286_v47  ;;  %v25297_v0 = vadd.f32 %v25283_v46, %v25281_v26  ;;  %v26666_v46 = vld [vmem:[#allocation30_spill] sm:$0xff] }
 0x671   :  { %26639 = vst [vmem:[#allocation102_spill] sm:$0xff] %v25292_v35  ;;  %v26661_v35 = vld [vmem:[#allocation20_spill] sm:$0xff] }
 0x672   :  { %26641 = vst [vmem:[#allocation103_spill] sm:$0xff] %v25297_v0 }
 0x675   :  { %21128 = vmatmul.mubr.f32.vlgmr.msra.gmra.mrb[32].mxu1 %v24468_v7 }
 0x676   :  { %22111 = vmatpush3.bf16.msra.mxu1 %v26640_v8  ;;  %21134 = vmatprep.mubr.f32.mxu1 %v24451_v56 }
 0x677   :  { %22113 = vmatprep.subr.bf16.mxu1 %v26642_v2 }
 0x679   :  { %21135 = vmatmul.mubr.f32.vlgmr.msra.gmra.mrb[34].mxu1 %v24481_v24 }
 0x67a   :  { %22115 = vmatpush3.bf16.msra.mxu1 %v26642_v2  ;;  %21141 = vmatprep.mubr.f32.mxu1 %v24437_v52 }
 0x67b   :  { %22117 = vmatprep.subr.bf16.mxu1 %v26643_v17 }
 0x681   :  { %21142 = vmatmul.mubr.f32.vlgmr.msra.gmra.mrb[34].mxu1 %v24468_v7 }
 0x682   :  { %22119 = vmatpush3.bf16.msra.mxu1 %v26643_v17  ;;  %21148 = vmatprep.mubr.f32.mxu1 %v24441_v23 }
 0x683   :  { %22121 = vmatprep.subr.bf16.mxu1 %v26640_v8 }
 0x689   :  { %21149 = vmatmul.mubr.f32.vlgmr.msra.gmra.mrb[34].mxu1 %v24471_v10 }
 0x68a   :  { %22123 = vmatpush3.bf16.msra.mxu1 %v26640_v8  ;;  %21155 = vmatprep.mubr.f32.mxu1 %v24445_v37 }
 0x68b   :  { %22125 = vmatprep.subr.bf16.mxu1 %v26644_v14 }
 0x691   :  { %21156 = vmatmul.mubr.f32.vlgmr.msra.gmra.mrb[34].mxu1 %v24474_v13 }
 0x692   :  { %22127 = vmatpush3.bf16.msra.mxu1 %v26644_v14  ;;  %21162 = vmatprep.mubr.f32.mxu1 %v24437_v52  ;;  %v26645_v14 = vld [vmem:[#allocation86_spill] sm:$0xff] }
 0x693   :  { %22129 = vmatprep.subr.bf16.mxu1 %v26640_v8 }
 0x698   :  { %v25319_v2 = vpop.f32.mrb[24].mxu1 }
 0x699   :  { %v25323_v47 = vpop.f32.mrb[25].mxu1  ;;  %21163 = vmatmul.mubr.f32.vlgmr.msra.gmra.mrb[34].mxu1 %v24468_v7 }
 0x69a   :  { %22131 = vmatpush3.bf16.msra.mxu1 %v26640_v8  ;;  %21169 = vmatprep.mubr.f32.mxu1 %v24437_v52  ;;  %v26647_v8 = vld [vmem:[#allocation96_spill] sm:$0xff] }
 0x69b   :  { %22133 = vmatprep.subr.bf16.mxu1 %v26645_v14 }
 0x6a1   :  { %21170 = vmatmul.mubr.f32.vlgmr.msra.gmra.mrb[34].mxu1 %v24468_v7 }
 0x6a2   :  { %22135 = vmatpush3.bf16.msra.mxu1 %v26645_v14  ;;  %21176 = vmatprep.mubr.f32.mxu1 %v24451_v56 }
 0x6a3   :  { %22137 = vmatprep.subr.bf16.mxu1 %v24671_v50 }
 0x6a5   :  { %21177 = vmatmul.mubr.f32.vlgmr.msra.gmra.mrb[36].mxu1 %v24481_v24 }
 0x6a6   :  { %22139 = vmatpush3.bf16.msra.mxu1 %v24671_v50  ;;  %21183 = vmatprep.mubr.f32.mxu1 %v24437_v52 }
 0x6a7   :  { %22141 = vmatprep.subr.bf16.mxu1 %v26646_v43 }
 0x6ad   :  { %21184 = vmatmul.mubr.f32.vlgmr.msra.gmra.mrb[36].mxu1 %v24468_v7 }
 0x6ae   :  { %22143 = vmatpush3.bf16.msra.mxu1 %v26646_v43  ;;  %21190 = vmatprep.mubr.f32.mxu1 %v24441_v23  ;;  %v26649_v43 = vld [vmem:[#allocation120_spill] sm:$0xff] }
 0x6af   :  { %22145 = vmatprep.subr.bf16.mxu1 %v26645_v14 }
 0x6b5   :  { %21191 = vmatmul.mubr.f32.vlgmr.msra.gmra.mrb[36].mxu1 %v24471_v10 }
 0x6b6   :  { %22147 = vmatpush3.bf16.msra.mxu1 %v26645_v14  ;;  %21197 = vmatprep.mubr.f32.mxu1 %v24445_v37 }
 0x6b7   :  { %22149 = vmatprep.subr.bf16.mxu1 %v26647_v8 }
 0x6bd   :  { %21198 = vmatmul.mubr.f32.vlgmr.msra.gmra.mrb[36].mxu1 %v24474_v13 }
 0x6be   :  { %22151 = vmatpush3.bf16.msra.mxu1 %v26647_v8  ;;  %21204 = vmatprep.mubr.f32.mxu1 %v24437_v52  ;;  %v26648_v8 = vld [vmem:[#allocation93_spill] sm:$0xff] }
 0x6bf   :  { %22153 = vmatprep.subr.bf16.mxu1 %v26645_v14 }
 0x6c4   :  { %v25351_v50 = vpop.f32.mrb[26].mxu1 }
 0x6c5   :  { %v25355_v17 = vpop.f32.mrb[27].mxu1  ;;  %21205 = vmatmul.mubr.f32.vlgmr.msra.gmra.mrb[36].mxu1 %v24468_v7 }
 0x6c6   :  { %22155 = vmatpush3.bf16.msra.mxu1 %v26645_v14  ;;  %21211 = vmatprep.mubr.f32.mxu1 %v24437_v52  ;;  %v26651_v14 = vld [vmem:[#allocation110_spill] sm:$0xff] }
 0x6c7   :  { %22157 = vmatprep.subr.bf16.mxu1 %v26648_v8 }
 0x6cd   :  { %21212 = vmatmul.mubr.f32.vlgmr.msra.gmra.mrb[36].mxu1 %v24468_v7 }
 0x6ce   :  { %22159 = vmatpush3.bf16.msra.mxu1 %v26648_v8  ;;  %21218 = vmatprep.mubr.f32.mxu1 %v24451_v56 }
 0x6cf   :  { %22161 = vmatprep.subr.bf16.mxu1 %v26649_v43 }
 0x6d1   :  { %21219 = vmatmul.mubr.f32.vlgmr.msra.gmra.mrb[38].mxu1 %v24481_v24 }
 0x6d2   :  { %22163 = vmatpush3.bf16.msra.mxu1 %v26649_v43  ;;  %21225 = vmatprep.mubr.f32.mxu1 %v24437_v52 }
 0x6d3   :  { %22165 = vmatprep.subr.bf16.mxu1 %v26650_v41 }
 0x6d9   :  { %21226 = vmatmul.mubr.f32.vlgmr.msra.gmra.mrb[38].mxu1 %v24468_v7 }
 0x6da   :  { %22167 = vmatpush3.bf16.msra.mxu1 %v26650_v41  ;;  %21232 = vmatprep.mubr.f32.mxu1 %v24441_v23 }
 0x6db   :  { %22169 = vmatprep.subr.bf16.mxu1 %v26648_v8 }
 0x6e1   :  { %21233 = vmatmul.mubr.f32.vlgmr.msra.gmra.mrb[38].mxu1 %v24471_v10 }
 0x6e2   :  { %22171 = vmatpush3.bf16.msra.mxu1 %v26648_v8  ;;  %21239 = vmatprep.mubr.f32.mxu1 %v24445_v37 }
 0x6e3   :  { %22173 = vmatprep.subr.bf16.mxu1 %v26651_v14 }
 0x6e9   :  { %21240 = vmatmul.mubr.f32.vlgmr.msra.gmra.mrb[38].mxu1 %v24474_v13 }
 0x6ea   :  { %22175 = vmatpush3.bf16.msra.mxu1 %v26651_v14  ;;  %21246 = vmatprep.mubr.f32.mxu1 %v24437_v52  ;;  %v26652_v14 = vld [vmem:[#allocation109_spill] sm:$0xff] }
 0x6eb   :  { %22177 = vmatprep.subr.bf16.mxu1 %v26648_v8 }
 0x6f0   :  { %v25383_v41 = vpop.f32.mrb[28].mxu1 }
 0x6f1   :  { %v25387_v59 = vpop.f32.mrb[29].mxu1  ;;  %21247 = vmatmul.mubr.f32.vlgmr.msra.gmra.mrb[38].mxu1 %v24468_v7 }
 0x6f2   :  { %22179 = vmatpush3.bf16.msra.mxu1 %v26648_v8  ;;  %21253 = vmatprep.mubr.f32.mxu1 %v24437_v52  ;;  %v26654_v8 = vld [vmem:[#allocation123_spill] sm:$0xff] }
 0x6f3   :  { %22181 = vmatprep.subr.bf16.mxu1 %v26652_v14 }
 0x6f9   :  { %21254 = vmatmul.mubr.f32.vlgmr.msra.gmra.mrb[38].mxu1 %v24468_v7 }
 0x6fa   :  { %22183 = vmatpush3.bf16.msra.mxu1 %v26652_v14  ;;  %21260 = vmatprep.mubr.f32.mxu1 %v24451_v56 }
 0x6fb   :  { %22185 = vmatprep.subr.bf16.mxu1 %v24691_v57 }
 0x6fd   :  { %21261 = vmatmul.mubr.f32.vlgmr.msra.gmra.mrb[40].mxu1 %v24481_v24 }
 0x6fe   :  { %22187 = vmatpush3.bf16.msra.mxu1 %v24691_v57  ;;  %21267 = vmatprep.mubr.f32.mxu1 %v24437_v52 }
 0x6ff   :  { %22189 = vmatprep.subr.bf16.mxu1 %v26653_v5 }
 0x705   :  { %21268 = vmatmul.mubr.f32.vlgmr.msra.gmra.mrb[40].mxu1 %v24468_v7 }
 0x706   :  { %22191 = vmatpush3.bf16.msra.mxu1 %v26653_v5  ;;  %21274 = vmatprep.mubr.f32.mxu1 %v24441_v23  ;;  %v26656_v5 = vld [vmem:[#allocation26_spill] sm:$0xff] }
 0x707   :  { %22193 = vmatprep.subr.bf16.mxu1 %v26652_v14 }
 0x70d   :  { %21275 = vmatmul.mubr.f32.vlgmr.msra.gmra.mrb[40].mxu1 %v24471_v10 }
 0x70e   :  { %22195 = vmatpush3.bf16.msra.mxu1 %v26652_v14  ;;  %21281 = vmatprep.mubr.f32.mxu1 %v24445_v37 }
 0x70f   :  { %22197 = vmatprep.subr.bf16.mxu1 %v26654_v8 }
 0x715   :  { %21282 = vmatmul.mubr.f32.vlgmr.msra.gmra.mrb[40].mxu1 %v24474_v13 }
 0x716   :  { %22199 = vmatpush3.bf16.msra.mxu1 %v26654_v8  ;;  %21288 = vmatprep.mubr.f32.mxu1 %v24437_v52  ;;  %v26655_v8 = vld [vmem:[#allocation115_spill] sm:$0xff] }
 0x717   :  { %22201 = vmatprep.subr.bf16.mxu1 %v26652_v14 }
 0x71c   :  { %v25415_v57 = vpop.f32.mrb[30].mxu1 }
 0x71d   :  { %v25419_v43 = vpop.f32.mrb[31].mxu1  ;;  %21289 = vmatmul.mubr.f32.vlgmr.msra.gmra.mrb[40].mxu1 %v24468_v7 }
 0x71e   :  { %22203 = vmatpush3.bf16.msra.mxu1 %v26652_v14  ;;  %21295 = vmatprep.mubr.f32.mxu1 %v24437_v52  ;;  %v26658_v14 = vld [vmem:[#allocation19_spill] sm:$0xff] }
 0x71f   :  { %22205 = vmatprep.subr.bf16.mxu1 %v26655_v8 }
 0x725   :  { %21296 = vmatmul.mubr.f32.vlgmr.msra.gmra.mrb[40].mxu1 %v24468_v7 }
 0x726   :  { %22207 = vmatpush3.bf16.msra.mxu1 %v26655_v8  ;;  %21302 = vmatprep.mubr.f32.mxu1 %v24451_v56 }
 0x727   :  { %22209 = vmatprep.subr.bf16.mxu1 %v26656_v5 }
 0x729   :  { %21303 = vmatmul.mubr.f32.vlgmr.msra.gmra.mrb[42].mxu1 %v24481_v24 }
 0x72a   :  { %22211 = vmatpush3.bf16.msra.mxu1 %v26656_v5  ;;  %21309 = vmatprep.mubr.f32.mxu1 %v24437_v52  ;;  %v26660_v5 = vld [vmem:[#allocation34_spill] sm:$0xff] }
 0x72b   :  { %22213 = vmatprep.subr.bf16.mxu1 %v26657_v6 }
 0x731   :  { %21310 = vmatmul.mubr.f32.vlgmr.msra.gmra.mrb[42].mxu1 %v24468_v7 }
 0x732   :  { %22215 = vmatpush3.bf16.msra.mxu1 %v26657_v6  ;;  %21316 = vmatprep.mubr.f32.mxu1 %v24441_v23 }
 0x733   :  { %22217 = vmatprep.subr.bf16.mxu1 %v26655_v8 }
 0x739   :  { %21317 = vmatmul.mubr.f32.vlgmr.msra.gmra.mrb[42].mxu1 %v24471_v10 }
 0x73a   :  { %22219 = vmatpush3.bf16.msra.mxu1 %v26655_v8  ;;  %21323 = vmatprep.mubr.f32.mxu1 %v24445_v37 }
 0x73b   :  { %22221 = vmatprep.subr.bf16.mxu1 %v26658_v14 }
 0x741   :  { %21324 = vmatmul.mubr.f32.vlgmr.msra.gmra.mrb[42].mxu1 %v24474_v13 }
 0x742   :  { %22223 = vmatpush3.bf16.msra.mxu1 %v26658_v14  ;;  %21330 = vmatprep.mubr.f32.mxu1 %v24437_v52  ;;  %v26659_v14 = vld [vmem:[#allocation18_spill] sm:$0xff] }
 0x743   :  { %22225 = vmatprep.subr.bf16.mxu1 %v26655_v8 }
 0x748   :  { %v25447_v6 = vpop.f32.mrb[32].mxu1 }
 0x749   :  { %v25451_v0 = vpop.f32.mrb[33].mxu1  ;;  %21331 = vmatmul.mubr.f32.vlgmr.msra.gmra.mrb[42].mxu1 %v24468_v7 }
 0x74a   :  { %22227 = vmatpush3.bf16.msra.mxu1 %v26655_v8  ;;  %21337 = vmatprep.mubr.f32.mxu1 %v24437_v52  ;;  %v26662_v8 = vld [vmem:[#allocation27_spill] sm:$0xff] }
 0x74b   :  { %22229 = vmatprep.subr.bf16.mxu1 %v26659_v14 }
 0x751   :  { %21338 = vmatmul.mubr.f32.vlgmr.msra.gmra.mrb[42].mxu1 %v24468_v7 }
 0x752   :  { %22231 = vmatpush3.bf16.msra.mxu1 %v26659_v14  ;;  %21344 = vmatprep.mubr.f32.mxu1 %v24451_v56 }
 0x753   :  { %22233 = vmatprep.subr.bf16.mxu1 %v26660_v5 }
 0x755   :  { %21345 = vmatmul.mubr.f32.vlgmr.msra.gmra.mrb[44].mxu1 %v24481_v24 }
 0x756   :  { %22235 = vmatpush3.bf16.msra.mxu1 %v26660_v5  ;;  %21351 = vmatprep.mubr.f32.mxu1 %v24437_v52 }
 0x757   :  { %22237 = vmatprep.subr.bf16.mxu1 %v26661_v35 }
 0x75d   :  { %21352 = vmatmul.mubr.f32.vlgmr.msra.gmra.mrb[44].mxu1 %v24468_v7 }
 0x75e   :  { %22239 = vmatpush3.bf16.msra.mxu1 %v26661_v35  ;;  %21358 = vmatprep.mubr.f32.mxu1 %v24441_v23 }
 0x75f   :  { %22241 = vmatprep.subr.bf16.mxu1 %v26659_v14 }
 0x765   :  { %21359 = vmatmul.mubr.f32.vlgmr.msra.gmra.mrb[44].mxu1 %v24471_v10 }
 0x766   :  { %22243 = vmatpush3.bf16.msra.mxu1 %v26659_v14  ;;  %21365 = vmatprep.mubr.f32.mxu1 %v24445_v37 }
 0x767   :  { %22245 = vmatprep.subr.bf16.mxu1 %v26662_v8 }
 0x76d   :  { %21366 = vmatmul.mubr.f32.vlgmr.msra.gmra.mrb[44].mxu1 %v24474_v13 }
 0x76e   :  { %22247 = vmatpush3.bf16.msra.mxu1 %v26662_v8  ;;  %21372 = vmatprep.mubr.f32.mxu1 %v24437_v52  ;;  %v26665_v8 = vld [vmem:[#allocation22_spill] sm:$0xff] }
 0x76f   :  { %22249 = vmatprep.subr.bf16.mxu1 %v26659_v14 }
 0x774   :  { %v25479_v35 = vpop.f32.mrb[34].mxu1 }
 0x775   :  { %26663 = vst [vmem:[#allocation104_spill] sm:$0xff] %v25479_v35  ;;  %v25483_v55 = vpop.f32.mrb[35].mxu1  ;;  %21373 = vmatmul.mubr.f32.vlgmr.msra.gmra.mrb[44].mxu1 %v24468_v7  ;;  %v26670_v35 = vsub.f32 %v25323_v47, %v25031_v36 }
 0x776   :  { %26664 = vst [vmem:[#allocation105_spill] sm:$0xff] %v25483_v55  ;;  %22251 = vmatpush3.bf16.msra.mxu1 %v26659_v14  ;;  %21379 = vmatprep.mubr.f32.mxu1 %v24437_v52  ;;  %v26667_v14 = vld [vmem:[#allocation35_spill] sm:$0xff]  ;;  %v26668_v55 = vsub.f32 %v25319_v2, %v25021_v3  ;;  %v26672_v3 = vld [vmem:[#allocation36_spill] sm:$0xff]  ;;  %v26675_v2 = vld [vmem:[#allocation37_spill] sm:$0xff] }
 0x777   :  { %22253 = vmatprep.subr.bf16.mxu1 %v26665_v8 }
 0x77d   :  { %21380 = vmatmul.mubr.f32.vlgmr.msra.gmra.mrb[44].mxu1 %v24468_v7 }
 0x77e   :  { %22255 = vmatpush3.bf16.msra.mxu1 %v26665_v8  ;;  %21386 = vmatprep.mubr.f32.mxu1 %v24451_v56 }
 0x77f   :  { %22257 = vmatprep.subr.bf16.mxu1 %v24723_v48 }
 0x781   :  { %21387 = vmatmul.mubr.f32.vlgmr.msra.gmra.mrb[46].mxu1 %v24481_v24 }
 0x782   :  { %22259 = vmatpush3.bf16.msra.mxu1 %v24723_v48  ;;  %21393 = vmatprep.mubr.f32.mxu1 %v24437_v52 }
 0x783   :  { %22261 = vmatprep.subr.bf16.mxu1 %v26666_v46 }
 0x789   :  { %21394 = vmatmul.mubr.f32.vlgmr.msra.gmra.mrb[46].mxu1 %v24468_v7 }
 0x78a   :  { %22263 = vmatpush3.bf16.msra.mxu1 %v26666_v46  ;;  %21400 = vmatprep.mubr.f32.mxu1 %v24441_v23 }
 0x78b   :  { %22265 = vmatprep.subr.bf16.mxu1 %v26665_v8 }
 0x791   :  { %21401 = vmatmul.mubr.f32.vlgmr.msra.gmra.mrb[46].mxu1 %v24471_v10 }
 0x792   :  { %22267 = vmatpush3.bf16.msra.mxu1 %v26665_v8  ;;  %21407 = vmatprep.mubr.f32.mxu1 %v24445_v37 }
 0x793   :  { %22269 = vmatprep.subr.bf16.mxu1 %v26667_v14 }
 0x799   :  { %21408 = vmatmul.mubr.f32.vlgmr.msra.gmra.mrb[46].mxu1 %v24474_v13 }
 0x79a   :  { %22271 = vmatpush3.bf16.msra.mxu1 %v26667_v14  ;;  %21414 = vmatprep.mubr.f32.mxu1 %v24437_v52 }
 0x79b   :  { %22273 = vmatprep.subr.bf16.mxu1 %v26665_v8 }
 0x7a0   :  { %v21213_v48 = vpop.f32.mrb[36].mxu1 }
 0x7a1   :  { %v18432_v46 = vsub.f32 %v21213_v48, %v25023_v33  ;;  %v12851_v5 = vpop.f32.mrb[37].mxu1  ;;  %21415 = vmatmul.mubr.f32.vlgmr.msra.gmra.mrb[46].mxu1 %v24468_v7  ;;  %v18528_v33 = vadd.f32 0.0001, %v25042_v54 }
 0x7a2   :  { %v18431_v26 = vsub.f32 %v12851_v5, %v25033_v22  ;;  %22275 = vmatpush3.bf16.msra.mxu1 %v26665_v8  ;;  %21421 = vmatprep.mubr.f32.mxu1 %v24437_v52 }
 0x7a3   :  { %v18540_v14 = vadd.f32 %v18432_v46, %v26668_v55  ;;  %22277 = vmatprep.subr.bf16.mxu1 %v26669_v9  ;;  %v26671_v55 = vld [vmem:[#allocation47_spill] sm:$0xff] }
 0x7a4   :  { %v18539_v51 = vadd.f32 %v18431_v26, %v26670_v35  ;;  %v26676_v35 = vsub.f32 %v25355_v17, %v25081_v60  ;;  %v26678_v60 = vld [vmem:[#allocation50_spill] sm:$0xff] }
 0x7a5   :  { %v18552_v48 = vadd.f32 0.0009, %v18540_v14 }
 0x7a6   :  { %v18551_v22 = vadd.f32 0.0009, %v18539_v51  ;;  %v26674_v51 = vsub.f32 %v25351_v50, %v25071_v38  ;;  %v26677_v38 = vld [vmem:[#allocation43_spill] sm:$0xff]  ;;  %v26679_v50 = vsub.f32 %v25383_v41, %v25121_v31  ;;  %v26682_v31 = vld [vmem:[#allocation62_spill] sm:$0xff] }
 0x7a7   :  { %v25525_v5 = vmul.f32 %v18552_v48, %v18528_v33  ;;  %v18529_v33 = vadd.f32 0.0001, %v25097_v34 }
 0x7a8   :  { %v25527_v8 = vmul.f32 %v18551_v22, %v18527_v15  ;;  %v26673_v15 = vld [vmem:[#allocation42_spill] sm:$0xff] }
 0x7a9   :  { %21422 = vmatmul.mubr.f32.vlgmr.msra.gmra.mrb[46].mxu1 %v24468_v7  ;;  %23033 = vrcp.f32 %v25525_v5 }
 0x7aa   :  { %22279 = vmatpush3.bf16.msra.mxu1 %v26669_v9  ;;  %21428 = vmatprep.mubr.f32.mxu1 %v24451_v56  ;;  %23035 = vrcp.f32 %v25527_v8 }
 0x7ab   :  { %22281 = vmatprep.subr.bf16.mxu1 %v26671_v55 }
 0x7ad   :  { %21429 = vmatmul.mubr.f32.vlgmr.msra.gmra.mrb[48].mxu1 %v24481_v24 }
 0x7ae   :  { %22283 = vmatpush3.bf16.msra.mxu1 %v26671_v55  ;;  %21435 = vmatprep.mubr.f32.mxu1 %v24437_v52  ;;  %v26680_v55 = vld [vmem:[#allocation46_spill] sm:$0xff] }
 0x7af   :  { %22285 = vmatprep.subr.bf16.mxu1 %v26672_v3 }
 0x7b5   :  { %21436 = vmatmul.mubr.f32.vlgmr.msra.gmra.mrb[48].mxu1 %v24468_v7 }
 0x7b6   :  { %22287 = vmatpush3.bf16.msra.mxu1 %v26672_v3  ;;  %21442 = vmatprep.mubr.f32.mxu1 %v24441_v23  ;;  %v26681_v3 = vsub.f32 %v25387_v59, %v25131_v18  ;;  %v26683_v59 = vld [vmem:[#allocation51_spill] sm:$0xff]  ;;  %v26684_v18 = vld [vmem:[#allocation53_spill] sm:$0xff] }
 0x7b7   :  { %22289 = vmatprep.subr.bf16.mxu1 %v26669_v9 }
 0x7bd   :  { %21443 = vmatmul.mubr.f32.vlgmr.msra.gmra.mrb[48].mxu1 %v24471_v10 }
 0x7be   :  { %22291 = vmatpush3.bf16.msra.mxu1 %v26669_v9  ;;  %21449 = vmatprep.mubr.f32.mxu1 %v24445_v37 }
 0x7bf   :  { %22293 = vmatprep.subr.bf16.mxu1 %v26673_v15 }
 0x7c5   :  { %21450 = vmatmul.mubr.f32.vlgmr.msra.gmra.mrb[48].mxu1 %v24474_v13 }
 0x7c6   :  { %22295 = vmatpush3.bf16.msra.mxu1 %v26673_v15  ;;  %21456 = vmatprep.mubr.f32.mxu1 %v24437_v52 }
 0x7c7   :  { %22297 = vmatprep.subr.bf16.mxu1 %v26669_v9 }
 0x7cc   :  { %v21255_v36 = vpop.f32.mrb[38].mxu1 }
 0x7cd   :  { %v18434_v54 = vsub.f32 %v21255_v36, %v25073_v30  ;;  %v13353_v11 = vpop.f32.mrb[39].mxu1  ;;  %21457 = vmatmul.mubr.f32.vlgmr.msra.gmra.mrb[48].mxu1 %v24468_v7  ;;  %v18530_v30 = vadd.f32 0.0001, %v25092_v20 }
 0x7ce   :  { %v18433_v47 = vsub.f32 %v13353_v11, %v25083_v32  ;;  %22299 = vmatpush3.bf16.msra.mxu1 %v26669_v9  ;;  %21463 = vmatprep.mubr.f32.mxu1 %v24437_v52 }
 0x7cf   :  { %v18542_v26 = vadd.f32 %v18434_v54, %v26674_v51  ;;  %22301 = vmatprep.subr.bf16.mxu1 %v26675_v2  ;;  %v18531_v54 = vadd.f32 0.0001, %v25147_v63 }
 0x7d0   :  { %v18541_v46 = vadd.f32 %v18433_v47, %v26676_v35  ;;  %v26686_v35 = vld [vmem:[#allocation52_spill] sm:$0xff] }
 0x7d1   :  { %v18554_v14 = vadd.f32 0.0009, %v18542_v26  ;;  %v26685_v26 = vsub.f32 %v25415_v57, %v25171_v39  ;;  %v26688_v39 = vld [vmem:[#allocation58_spill] sm:$0xff]  ;;  %v26690_v57 = vld [vmem:[#allocation59_spill] sm:$0xff] }
 0x7d2   :  { %v18553_v32 = vadd.f32 0.0009, %v18541_v46  ;;  %v26687_v46 = vsub.f32 %v25419_v43, %v25181_v45  ;;  %v26689_v43 = vsub.f32 %v25447_v6, %v25221_v49  ;;  %v26695_v6 = vld [vmem:[#allocation104_spill] sm:$0xff] }
 0x7d3   :  { %v25563_v48 = vmul.f32 %v18554_v14, %v18530_v30 }
 0x7d4   :  { %v25565_v9 = vmul.f32 %v18553_v32, %v18529_v33  ;;  %v18533_v33 = vadd.f32 0.0001, %v25197_v21 }
 0x7d5   :  { %21464 = vmatmul.mubr.f32.vlgmr.msra.gmra.mrb[48].mxu1 %v24468_v7  ;;  %23037 = vrcp.f32 %v25563_v48 }
 0x7d6   :  { %22303 = vmatpush3.bf16.msra.mxu1 %v26675_v2  ;;  %21470 = vmatprep.mubr.f32.mxu1 %v24451_v56  ;;  %23039 = vrcp.f32 %v25565_v9 }
 0x7d7   :  { %22305 = vmatprep.subr.bf16.mxu1 %v24743_v29 }
 0x7d9   :  { %21471 = vmatmul.mubr.f32.vlgmr.msra.gmra.mrb[50].mxu1 %v24481_v24 }
 0x7da   :  { %22307 = vmatpush3.bf16.msra.mxu1 %v24743_v29  ;;  %21477 = vmatprep.mubr.f32.mxu1 %v24437_v52 }
 0x7db   :  { %22309 = vmatprep.subr.bf16.mxu1 %v26677_v38 }
 0x7e1   :  { %21478 = vmatmul.mubr.f32.vlgmr.msra.gmra.mrb[50].mxu1 %v24468_v7 }
 0x7e2   :  { %22311 = vmatpush3.bf16.msra.mxu1 %v26677_v38  ;;  %21484 = vmatprep.mubr.f32.mxu1 %v24441_v23 }
 0x7e3   :  { %22313 = vmatprep.subr.bf16.mxu1 %v26675_v2 }
 0x7e9   :  { %21485 = vmatmul.mubr.f32.vlgmr.msra.gmra.mrb[50].mxu1 %v24471_v10 }
 0x7ea   :  { %22315 = vmatpush3.bf16.msra.mxu1 %v26675_v2  ;;  %21491 = vmatprep.mubr.f32.mxu1 %v24445_v37 }
 0x7eb   :  { %22317 = vmatprep.subr.bf16.mxu1 %v26678_v60 }
 0x7f1   :  { %21492 = vmatmul.mubr.f32.vlgmr.msra.gmra.mrb[50].mxu1 %v24474_v13 }
 0x7f2   :  { %22319 = vmatpush3.bf16.msra.mxu1 %v26678_v60  ;;  %21498 = vmatprep.mubr.f32.mxu1 %v24437_v52  ;;  %v26691_v60 = vsub.f32 %v25451_v0, %v25231_v61  ;;  %v26692_v0 = vld [vmem:[#allocation66_spill] sm:$0xff]  ;;  %v26694_v61 = vld [vmem:[#allocation99_spill] sm:$0xff] }
 0x7f3   :  { %22321 = vmatprep.subr.bf16.mxu1 %v26675_v2 }
 0x7f8   :  { %v21297_v29 = vpop.f32.mrb[40].mxu1 }
 0x7f9   :  { %v18436_v20 = vsub.f32 %v21297_v29, %v25123_v1  ;;  %v13855_v34 = vpop.f32.mrb[41].mxu1  ;;  %21499 = vmatmul.mubr.f32.vlgmr.msra.gmra.mrb[50].mxu1 %v24468_v7  ;;  %v18532_v1 = vadd.f32 0.0001, %v25142_v25 }
 0x7fa   :  { %v18435_v17 = vsub.f32 %v13855_v34, %v25133_v42  ;;  %22323 = vmatpush3.bf16.msra.mxu1 %v26675_v2  ;;  %21505 = vmatprep.mubr.f32.mxu1 %v24437_v52  ;;  %v18535_v34 = vadd.f32 0.0001, %v25247_v53 }
 0x7fb   :  { %v18544_v22 = vadd.f32 %v18436_v20, %v26679_v50  ;;  %22325 = vmatprep.subr.bf16.mxu1 %v26680_v55 }
 0x7fc   :  { %v18543_v15 = vadd.f32 %v18435_v17, %v26681_v3 }
 0x7fd   :  { %v18556_v36 = vadd.f32 0.0009, %v18544_v22  ;;  %v26696_v22 = vld [vmem:[#allocation92_spill] sm:$0xff] }
 0x7fe   :  { %v18555_v42 = vadd.f32 0.0009, %v18543_v15  ;;  %v26698_v15 = vld [vmem:[#allocation63_spill] sm:$0xff] }
 0x7ff   :  { %v25601_v11 = vmul.f32 %v18556_v36, %v18532_v1  ;;  %v26699_v1 = vld [vmem:[#allocation105_spill] sm:$0xff]  ;;  %v26700_v36 = vld [vmem:[#allocation98_spill] sm:$0xff] }
 0x800   :  { %v25603_v47 = vmul.f32 %v18555_v42, %v18531_v54  ;;  %v26701_v54 = vsub.f32 %v26699_v1, %v26700_v36 }
 0x801   :  { %21506 = vmatmul.mubr.f32.vlgmr.msra.gmra.mrb[50].mxu1 %v24468_v7  ;;  %23041 = vrcp.f32 %v25601_v11 }
 0x802   :  { %22327 = vmatpush3.bf16.msra.mxu1 %v26680_v55  ;;  %21512 = vmatprep.mubr.f32.mxu1 %v24451_v56  ;;  %23043 = vrcp.f32 %v25603_v47 }
 0x803   :  { %22329 = vmatprep.subr.bf16.mxu1 %v26682_v31 }
 0x805   :  { %21513 = vmatmul.mubr.f32.vlgmr.msra.gmra.mrb[52].mxu1 %v24481_v24 }
 0x806   :  { %22331 = vmatpush3.bf16.msra.mxu1 %v26682_v31  ;;  %21519 = vmatprep.mubr.f32.mxu1 %v24437_v52  ;;  %v26702_v31 = vld [vmem:[#allocation102_spill] sm:$0xff] }
 0x807   :  { %22333 = vmatprep.subr.bf16.mxu1 %v26683_v59 }
 0x80d   :  { %21520 = vmatmul.mubr.f32.vlgmr.msra.gmra.mrb[52].mxu1 %v24468_v7 }
 0x80e   :  { %22335 = vmatpush3.bf16.msra.mxu1 %v26683_v59  ;;  %21526 = vmatprep.mubr.f32.mxu1 %v24441_v23  ;;  %v18538_v59 = vadd.f32 0.0001, %v26702_v31 }
 0x80f   :  { %22337 = vmatprep.subr.bf16.mxu1 %v26680_v55 }
 0x815   :  { %21527 = vmatmul.mubr.f32.vlgmr.msra.gmra.mrb[52].mxu1 %v24471_v10 }
 0x816   :  { %22339 = vmatpush3.bf16.msra.mxu1 %v26680_v55  ;;  %21533 = vmatprep.mubr.f32.mxu1 %v24445_v37 }
 0x817   :  { %22341 = vmatprep.subr.bf16.mxu1 %v26684_v18 }
 0x81d   :  { %21534 = vmatmul.mubr.f32.vlgmr.msra.gmra.mrb[52].mxu1 %v24474_v13 }
 0x81e   :  { %22343 = vmatpush3.bf16.msra.mxu1 %v26684_v18  ;;  %21540 = vmatprep.mubr.f32.mxu1 %v24437_v52 }
 0x81f   :  { %22345 = vmatprep.subr.bf16.mxu1 %v26680_v55 }
 0x824   :  { %v21339_v25 = vpop.f32.mrb[42].mxu1 }
 0x825   :  { %v18438_v63 = vsub.f32 %v21339_v25, %v25173_v58  ;;  %v14357_v41 = vpop.f32.mrb[43].mxu1  ;;  %21541 = vmatmul.mubr.f32.vlgmr.msra.gmra.mrb[52].mxu1 %v24468_v7  ;;  %v18534_v58 = vadd.f32 0.0001, %v25192_v19  ;;  %v26703_v25 = vld [vmem:[#allocation103_spill] sm:$0xff] }
 0x826   :  { %v18437_v51 = vsub.f32 %v14357_v41, %v25183_v4  ;;  %22347 = vmatpush3.bf16.msra.mxu1 %v26680_v55  ;;  %21547 = vmatprep.mubr.f32.mxu1 %v24437_v52  ;;  %v26697_v55 = vsub.f32 %v26695_v6, %v26696_v22  ;;  %v26710_v6 = vld [vmem:[#allocation78_spill] sm:$0xff] }
 0x827   :  { %v18546_v2 = vadd.f32 %v18438_v63, %v26685_v26  ;;  %22349 = vmatprep.subr.bf16.mxu1 %v26686_v35  ;;  %v18537_v63 = vadd.f32 0.0001, %v26703_v25  ;;  %v18457_v22 = vmul.f32 2.0, %v26710_v6 }
 0x828   :  { %v18545_v30 = vadd.f32 %v18437_v51, %v26687_v46 }
 0x829   :  { %v18558_v14 = vadd.f32 0.0009, %v18546_v2  ;;  %v26704_v2 = vld [vmem:[#allocation70_spill] sm:$0xff] }
 0x82a   :  { %v18557_v4 = vadd.f32 0.0009, %v18545_v30  ;;  %v26708_v30 = vld [vmem:[#allocation76_spill] sm:$0xff] }
 0x82b   :  { %v25639_v32 = vmul.f32 %v18558_v14, %v18534_v58 }
 0x82c   :  { %v25641_v38 = vmul.f32 %v18557_v4, %v18533_v33 }
 0x82d   :  { %21548 = vmatmul.mubr.f32.vlgmr.msra.gmra.mrb[52].mxu1 %v24468_v7  ;;  %23045 = vrcp.f32 %v25639_v32 }
 0x82e   :  { %22351 = vmatpush3.bf16.msra.mxu1 %v26686_v35  ;;  %21554 = vmatprep.mubr.f32.mxu1 %v24451_v56  ;;  %23047 = vrcp.f32 %v25641_v38 }
 0x82f   :  { %22353 = vmatprep.subr.bf16.mxu1 %v24763_v27 }
 0x831   :  { %21555 = vmatmul.mubr.f32.vlgmr.msra.gmra.mrb[54].mxu1 %v24481_v24 }
 0x832   :  { %22355 = vmatpush3.bf16.msra.mxu1 %v24763_v27  ;;  %21561 = vmatprep.mubr.f32.mxu1 %v24437_v52 }
 0x833   :  { %22357 = vmatprep.subr.bf16.mxu1 %v26688_v39 }
 0x839   :  { %21562 = vmatmul.mubr.f32.vlgmr.msra.gmra.mrb[54].mxu1 %v24468_v7 }
 0x83a   :  { %22359 = vmatpush3.bf16.msra.mxu1 %v26688_v39  ;;  %21568 = vmatprep.mubr.f32.mxu1 %v24441_v23 }
 0x83b   :  { %22361 = vmatprep.subr.bf16.mxu1 %v26686_v35 }
 0x841   :  { %21569 = vmatmul.mubr.f32.vlgmr.msra.gmra.mrb[54].mxu1 %v24471_v10 }
 0x842   :  { %22363 = vmatpush3.bf16.msra.mxu1 %v26686_v35  ;;  %21575 = vmatprep.mubr.f32.mxu1 %v24445_v37 }
 0x843   :  { %22365 = vmatprep.subr.bf16.mxu1 %v24757_v12 }
 0x849   :  { %21576 = vmatmul.mubr.f32.vlgmr.msra.gmra.mrb[54].mxu1 %v24474_v13 }
 0x84a   :  { %22367 = vmatpush3.bf16.msra.mxu1 %v24757_v12  ;;  %21582 = vmatprep.mubr.f32.mxu1 %v24437_v52 }
 0x84b   :  { %22369 = vmatprep.subr.bf16.mxu1 %v26686_v35 }
 0x850   :  { %v21381_v27 = vpop.f32.mrb[44].mxu1 }
 0x851   :  { %v18440_v45 = vsub.f32 %v21381_v27, %v25223_v62  ;;  %v14859_v19 = vpop.f32.mrb[45].mxu1  ;;  %21583 = vmatmul.mubr.f32.vlgmr.msra.gmra.mrb[54].mxu1 %v24468_v7  ;;  %v18536_v62 = vadd.f32 0.0001, %v25242_v40 }
 0x852   :  { %v18439_v21 = vsub.f32 %v14859_v19, %v25233_v16  ;;  %22371 = vmatpush3.bf16.msra.mxu1 %v26686_v35  ;;  %21589 = vmatprep.mubr.f32.mxu1 %v24437_v52  ;;  %v26705_v35 = vld [vmem:[#allocation67_spill] sm:$0xff] }
 0x853   :  { %v18548_v12 = vadd.f32 %v18440_v45, %v26689_v43  ;;  %22373 = vmatprep.subr.bf16.mxu1 %v26690_v57  ;;  %v23034_v45 = vpop.eup %23033 }
 0x854   :  { %v18547_v29 = vadd.f32 %v18439_v21, %v26691_v60  ;;  %v23036_v21 = vpop.eup %23035  ;;  %v23205_v60 = vmov 0.0  }
 0x855   :  { %v18560_v20 = vadd.f32 0.0009, %v18548_v12  ;;  %v23038_v48 = vpop.eup %23037 }
 0x856   :  { %v18559_v16 = vadd.f32 0.0009, %v18547_v29  ;;  %v23040_v9 = vpop.eup %23039 }
 0x857   :  { %v25677_v17 = vmul.f32 %v18560_v20, %v18536_v62  ;;  %v23042_v11 = vpop.eup %23041 }
 0x858   :  { %v25679_v50 = vmul.f32 %v18559_v16, %v18535_v34  ;;  %v23044_v47 = vpop.eup %23043 }
 0x859   :  { %21590 = vmatmul.mubr.f32.vlgmr.msra.gmra.mrb[54].mxu1 %v24468_v7  ;;  %v23046_v32 = vpop.eup %23045  ;;  %23049 = vrcp.f32 %v25677_v17 }
 0x85a   :  { %22375 = vmatpush3.bf16.msra.mxu1 %v26690_v57  ;;  %21596 = vmatprep.mubr.f32.mxu1 %v24451_v56  ;;  %v23048_v38 = vpop.eup %23047  ;;  %23051 = vrcp.f32 %v25679_v50 }
 0x85b   :  { %22377 = vmatprep.subr.bf16.mxu1 %v24773_v28 }
 0x85d   :  { %21597 = vmatmul.mubr.f32.vlgmr.msra.gmra.mrb[56].mxu1 %v24481_v24 }
 0x85e   :  { %22379 = vmatpush3.bf16.msra.mxu1 %v24773_v28  ;;  %21603 = vmatprep.mubr.f32.mxu1 %v24437_v52  ;;  %v26693_v28 = vld [vmem:[#allocation95_spill] sm:$0xff] }
 0x85f   :  { %22381 = vmatprep.subr.bf16.mxu1 %v24759_v44 }
 0x863   :  { %v23050_v17 = vpop.eup %23049 }
 0x864   :  { %v23052_v50 = vpop.eup %23051 }
 0x865   :  { %21604 = vmatmul.mubr.f32.vlgmr.msra.gmra.mrb[56].mxu1 %v24468_v7 }
 0x866   :  { %22383 = vmatpush3.bf16.msra.mxu1 %v24759_v44  ;;  %21610 = vmatprep.mubr.f32.mxu1 %v24441_v23 }
 0x867   :  { %22385 = vmatprep.subr.bf16.mxu1 %v26690_v57 }
 0x86d   :  { %21611 = vmatmul.mubr.f32.vlgmr.msra.gmra.mrb[56].mxu1 %v24471_v10 }
 0x86e   :  { %22387 = vmatpush3.bf16.msra.mxu1 %v26690_v57  ;;  %21617 = vmatprep.mubr.f32.mxu1 %v24445_v37 }
 0x86f   :  { %22389 = vmatprep.subr.bf16.mxu1 %v26692_v0 }
 0x875   :  { %21618 = vmatmul.mubr.f32.vlgmr.msra.gmra.mrb[56].mxu1 %v24474_v13 }
 0x876   :  { %22391 = vmatpush3.bf16.msra.mxu1 %v26692_v0  ;;  %21624 = vmatprep.mubr.f32.mxu1 %v24437_v52 }
 0x877   :  { %22393 = vmatprep.subr.bf16.mxu1 %v26690_v57 }
 0x87c   :  { %v21423_v44 = vpop.f32.mrb[46].mxu1 }
 0x87d   :  { %v18442_v49 = vsub.f32 %v21423_v44, %v26693_v28  ;;  %v15361_v53 = vpop.f32.mrb[47].mxu1  ;;  %21625 = vmatmul.mubr.f32.vlgmr.msra.gmra.mrb[56].mxu1 %v24468_v7 }
 0x87e   :  { %v18441_v40 = vsub.f32 %v15361_v53, %v26694_v61  ;;  %22395 = vmatpush3.bf16.msra.mxu1 %v26690_v57  ;;  %21631 = vmatprep.mubr.f32.mxu1 %v24437_v52 }
 0x87f   :  { %v18550_v3 = vadd.f32 %v18442_v49, %v26697_v55  ;;  %22397 = vmatprep.subr.bf16.mxu1 %v26698_v15  ;;  %v26709_v49 = vld [vmem:[#allocation77_spill] sm:$0xff] }
 0x880   :  { %v18549_v42 = vadd.f32 %v18441_v40, %v26701_v54  ;;  %v18458_v53 = vmul.f32 2.0, %v26709_v49  ;;  %v18469_v54 = vadd.f32 0.0001, %v18457_v22 }
 0x881   :  { %v18562_v18 = vadd.f32 0.0009, %v18550_v3 }
 0x882   :  { %v18561_v41 = vadd.f32 0.0009, %v18549_v42  ;;  %v18470_v1 = vadd.f32 0.0001, %v18458_v53 }
 0x883   :  { %v25715_v51 = vmul.f32 %v18562_v18, %v18538_v59 }
 0x884   :  { %v25717_v26 = vmul.f32 %v18561_v41, %v18537_v63 }
 0x885   :  { %21632 = vmatmul.mubr.f32.vlgmr.msra.gmra.mrb[56].mxu1 %v24468_v7  ;;  %23053 = vrcp.f32 %v25715_v51 }
 0x886   :  { %22399 = vmatpush3.bf16.msra.mxu1 %v26698_v15  ;;  %21638 = vmatprep.mubr.f32.mxu1 %v24451_v56  ;;  %v26706_v56 = vld [vmem:[#allocation68_spill] sm:$0xff]  ;;  %23055 = vrcp.f32 %v25717_v26 }
 0x887   :  { %22401 = vmatprep.subr.bf16.mxu1 %v26704_v2 }
 0x889   :  { %21639 = vmatmul.mubr.f32.vlgmr.msra.gmra.mrb[58].mxu1 %v24481_v24 }
 0x88a   :  { %22403 = vmatpush3.bf16.msra.mxu1 %v26704_v2  ;;  %21645 = vmatprep.mubr.f32.mxu1 %v24437_v52 }
 0x88b   :  { %22405 = vmatprep.subr.bf16.mxu1 %v26705_v35 }
 0x88f   :  { %v23054_v51 = vpop.eup %23053 }
 0x890   :  { %v23056_v26 = vpop.eup %23055 }
 0x891   :  { %21646 = vmatmul.mubr.f32.vlgmr.msra.gmra.mrb[58].mxu1 %v24468_v7 }
 0x892   :  { %22407 = vmatpush3.bf16.msra.mxu1 %v26705_v35  ;;  %21652 = vmatprep.mubr.f32.mxu1 %v24441_v23 }
 0x893   :  { %22409 = vmatprep.subr.bf16.mxu1 %v26698_v15 }
 0x899   :  { %21653 = vmatmul.mubr.f32.vlgmr.msra.gmra.mrb[58].mxu1 %v24471_v10  ;;  %v26707_v10 = vld [vmem:[#allocation74_spill] sm:$0xff] }
 0x89a   :  { %22411 = vmatpush3.bf16.msra.mxu1 %v26698_v15  ;;  %21659 = vmatprep.mubr.f32.mxu1 %v24445_v37  ;;  %v18456_v24 = vmul.f32 2.0, %v26707_v10 }
 0x89b   :  { %22413 = vmatprep.subr.bf16.mxu1 %v26706_v56 }
 0x89c   :  { %v18468_v33 = vadd.f32 0.0001, %v18456_v24 }
 0x8a1   :  { %21660 = vmatmul.mubr.f32.vlgmr.msra.gmra.mrb[58].mxu1 %v24474_v13  ;;  %v18455_v13 = vmul.f32 2.0, %v26708_v30 }
 0x8a2   :  { %22415 = vmatpush3.bf16.msra.mxu1 %v26706_v56  ;;  %21666 = vmatprep.mubr.f32.mxu1 %v24437_v52 }
 0x8a3   :  { %22417 = vmatprep.subr.bf16.mxu1 %v26698_v15  ;;  %v18467_v4 = vadd.f32 0.0001, %v18455_v13 }
 0x8a8   :  { %v21465_v23 = vpop.f32.mrb[48].mxu1 }
 0x8a9   :  { %v18444_v46 = vsub.f32 %v21465_v23, %v26707_v10  ;;  %v15863_v37 = vpop.f32.mrb[49].mxu1  ;;  %21667 = vmatmul.mubr.f32.vlgmr.msra.gmra.mrb[58].mxu1 %v24468_v7 }
 0x8aa   :  { %v18443_v58 = vsub.f32 %v15863_v37, %v26708_v30  ;;  %22419 = vmatpush3.bf16.msra.mxu1 %v26698_v15  ;;  %21673 = vmatprep.mubr.f32.mxu1 %v24437_v52 }
 0x8ab   :  { %v18480_v14 = vmul.f32 2.0, %v18444_v46 }
 0x8ac   :  { %v18479_v5 = vmul.f32 2.0, %v18443_v58 }
 0x8ad   :  { %v18492_v8 = vadd.f32 0.0009, %v18480_v14  ;;  %v26711_v14 = vld [vmem:[#allocation81_spill] sm:$0xff] }
 0x8ae   :  { %v18491_v39 = vadd.f32 0.0009, %v18479_v5  ;;  %v18460_v5 = vmul.f32 2.0, %v26711_v14 }
 0x8af   :  { %v18504_v27 = vmul.f32 %v18492_v8, %v18468_v33 }
 0x8b0   :  { %v18503_v19 = vmul.f32 %v18491_v39, %v18467_v4  ;;  %v26712_v4 = vld [vmem:[#allocation83_spill] sm:$0xff] }
 0x8b1   :  { %v18578_v43 = vmul.f32 %v23034_v45, %v18504_v27  ;;  %21674 = vmatmul.mubr.f32.vlgmr.msra.gmra.mrb[58].mxu1 %v24468_v7  ;;  %v18459_v39 = vmul.f32 2.0, %v26712_v4 }
 0x8b2   :  { %v18576_v12 = vmul.f32 %v23036_v21, %v18503_v19  ;;  %v18472_v21 = vadd.f32 0.0001, %v18460_v5 }
 0x8b3   :  { %vm18600_vm1 = vcmp.eq.f32.partialorder %v18578_v43, %v18578_v43 }
 0x8b4   :  { %v18612_v57 = vsel %vm18600_vm1, %v18578_v43, 0.0  ;;  %v18749_v29 = vsel %vm18600_vm1, 1.0, %v23205_v60  ;;  %vm18599_vm2 = vcmp.eq.f32.partialorder %v18576_v12, %v18576_v12 }
 0x8b5   :  { %v18624_v52 = vsel %vm140_vm0, %v18612_v57, 0.0  ;;  %v18680_v62 = vsel %vm140_vm0, %v18749_v29, 0.0  ;;  %v18611_v20 = vsel %vm18599_vm2, %v18576_v12, 0.0  ;;  %v18748_v34 = vsel %vm18599_vm2, 1.0, %v23205_v60 }
 0x8b6   :  { %v18623_v16 = vsel %vm140_vm0, %v18611_v20, 0.0  ;;  %v18679_v0 = vsel %vm140_vm0, %v18748_v34, 0.0  ;;  %v18471_v12 = vadd.f32 0.0001, %v18459_v39  ;;  %v26715_v39 = vld [vmem:[#allocation89_spill] sm:$0xff] }
 0x8b7   :  { %v18625_v44 = vadd.f32 %v18624_v52, %v18623_v16  ;;  %v18681_v7 = vadd.f32 %v18680_v62, %v18679_v0 }
 0x8d4   :  { %v21507_v28 = vpop.f32.mrb[50].mxu1 }
 0x8d5   :  { %v18446_v61 = vsub.f32 %v21507_v28, %v26709_v49  ;;  %v16365_v40 = vpop.f32.mrb[51].mxu1 }
 0x8d6   :  { %v18445_v55 = vsub.f32 %v16365_v40, %v26710_v6 }
 0x8d7   :  { %v18482_v3 = vmul.f32 2.0, %v18446_v61 }
 0x8d8   :  { %v18481_v15 = vmul.f32 2.0, %v18445_v55 }
 0x8d9   :  { %v18494_v36 = vadd.f32 0.0009, %v18482_v3  ;;  %v26713_v3 = vld [vmem:[#allocation84_spill] sm:$0xff] }
 0x8da   :  { %v18493_v42 = vadd.f32 0.0009, %v18481_v15  ;;  %v18462_v15 = vmul.f32 2.0, %v26713_v3 }
 0x8db   :  { %v18506_v31 = vmul.f32 %v18494_v36, %v18470_v1 }
 0x8dc   :  { %v18505_v59 = vmul.f32 %v18493_v42, %v18469_v54  ;;  %v26714_v54 = vld [vmem:[#allocation87_spill] sm:$0xff] }
 0x8dd   :  { %v18582_v18 = vmul.f32 %v23038_v48, %v18506_v31  ;;  %v18461_v42 = vmul.f32 2.0, %v26714_v54 }
 0x8de   :  { %v18580_v25 = vmul.f32 %v23040_v9, %v18505_v59  ;;  %v18474_v9 = vadd.f32 0.0001, %v18462_v15 }
 0x8df   :  { %vm18602_vm3 = vcmp.eq.f32.partialorder %v18582_v18, %v18582_v18 }
 0x8e0   :  { %vm18601_vm4 = vcmp.eq.f32.partialorder %v18580_v25, %v18580_v25  ;;  %v18614_v63 = vsel %vm18602_vm3, %v18582_v18, 0.0  ;;  %v18751_v41 = vsel %vm18602_vm3, 1.0, %v23205_v60 }
 0x8e1   :  { %v18613_v2 = vsel %vm18601_vm4, %v18580_v25, 0.0  ;;  %v18750_v35 = vsel %vm18601_vm4, 1.0, %v23205_v60  ;;  %v18628_v46 = vsel %vm140_vm0, %v18614_v63, 0.0  ;;  %v18684_v37 = vsel %vm140_vm0, %v18751_v41, 0.0 }
 0x8e2   :  { %v18626_v56 = vsel %vm140_vm0, %v18613_v2, 0.0  ;;  %v18682_v23 = vsel %vm140_vm0, %v18750_v35, 0.0  ;;  %v18473_v25 = vadd.f32 0.0001, %v18461_v42 }
 0x8e3   :  { %v18627_v10 = vadd.f32 %v18626_v56, %v18625_v44  ;;  %v18683_v24 = vadd.f32 %v18682_v23, %v18681_v7 }
 0x8e5   :  { %v18629_v30 = vadd.f32 %v18628_v46, %v18627_v10  ;;  %v18685_v13 = vadd.f32 %v18684_v37, %v18683_v24 }
 0x900   :  { %v21549_v58 = vpop.f32.mrb[52].mxu1 }
 0x901   :  { %v18448_v33 = vsub.f32 %v21549_v58, %v26711_v14  ;;  %v16867_v8 = vpop.f32.mrb[53].mxu1 }
 0x902   :  { %v18447_v27 = vsub.f32 %v16867_v8, %v26712_v4 }
 0x903   :  { %v18484_v45 = vmul.f32 2.0, %v18448_v33 }
 0x904   :  { %v18483_v19 = vmul.f32 2.0, %v18447_v27  ;;  %v18464_v27 = vmul.f32 2.0, %v26715_v39 }
 0x905   :  { %v18496_v43 = vadd.f32 0.0009, %v18484_v45 }
 0x906   :  { %v18495_v57 = vadd.f32 0.0009, %v18483_v19 }
 0x907   :  { %v18508_v29 = vmul.f32 %v18496_v43, %v18472_v21  ;;  %v26716_v21 = vld [vmem:[#allocation90_spill] sm:$0xff] }
 0x908   :  { %v18507_v52 = vmul.f32 %v18495_v57, %v18471_v12  ;;  %v18463_v43 = vmul.f32 2.0, %v26716_v21 }
 0x909   :  { %v18586_v62 = vmul.f32 %v23042_v11, %v18508_v29  ;;  %v18476_v11 = vadd.f32 0.0001, %v18464_v27 }
 0x90a   :  { %v18584_v20 = vmul.f32 %v23044_v47, %v18507_v52  ;;  %v18475_v47 = vadd.f32 0.0001, %v18463_v43 }
 0x90b   :  { %vm18604_vm5 = vcmp.eq.f32.partialorder %v18586_v62, %v18586_v62 }
 0x90c   :  { %vm18603_vm6 = vcmp.eq.f32.partialorder %v18584_v20, %v18584_v20  ;;  %v18616_v34 = vsel %vm18604_vm5, %v18586_v62, 0.0  ;;  %v18753_v16 = vsel %vm18604_vm5, 1.0, %v23205_v60 }
 0x90d   :  { %v18615_v0 = vsel %vm18603_vm6, %v18584_v20, 0.0  ;;  %v18752_v44 = vsel %vm18603_vm6, 1.0, %v23205_v60  ;;  %v18632_v61 = vsel %vm140_vm0, %v18616_v34, 0.0  ;;  %v18688_v40 = vsel %vm140_vm0, %v18753_v16, 0.0 }
 0x90e   :  { %v18630_v7 = vsel %vm140_vm0, %v18615_v0, 0.0  ;;  %v18686_v28 = vsel %vm140_vm0, %v18752_v44, 0.0 }
 0x90f   :  { %v18631_v49 = vadd.f32 %v18630_v7, %v18629_v30  ;;  %v18687_v53 = vadd.f32 %v18686_v28, %v18685_v13 }
 0x911   :  { %v18633_v6 = vadd.f32 %v18632_v61, %v18631_v49  ;;  %v18689_v22 = vadd.f32 %v18688_v40, %v18687_v53 }
 0x92c   :  { %v21591_v55 = vpop.f32.mrb[54].mxu1 }
 0x92d   :  { %v18450_v1 = vsub.f32 %v21591_v55, %v26713_v3  ;;  %v17369_v36 = vpop.f32.mrb[55].mxu1 }
 0x92e   :  { %v18449_v31 = vsub.f32 %v17369_v36, %v26714_v54  ;;  %v26717_v36 = vld [vmem:[#allocation97_spill] sm:$0xff] }
 0x92f   :  { %v18486_v48 = vmul.f32 2.0, %v18450_v1  ;;  %v18466_v54 = vmul.f32 2.0, %v26717_v36 }
 0x930   :  { %v18485_v59 = vmul.f32 2.0, %v18449_v31 }
 0x931   :  { %v18498_v18 = vadd.f32 0.0009, %v18486_v48  ;;  %v26718_v48 = vld [vmem:[#allocation101_spill] sm:$0xff] }
 0x932   :  { %v18497_v63 = vadd.f32 0.0009, %v18485_v59  ;;  %v18465_v59 = vmul.f32 2.0, %v26718_v48 }
 0x933   :  { %v18510_v41 = vmul.f32 %v18498_v18, %v18474_v9 }
 0x934   :  { %v18509_v2 = vmul.f32 %v18497_v63, %v18473_v25  ;;  %v18478_v63 = vadd.f32 0.0001, %v18466_v54 }
 0x935   :  { %v18590_v35 = vmul.f32 %v23046_v32, %v18510_v41  ;;  %v18477_v32 = vadd.f32 0.0001, %v18465_v59 }
 0x936   :  { %v18588_v56 = vmul.f32 %v23048_v38, %v18509_v2 }
 0x937   :  { %vm18606_vm7 = vcmp.eq.f32.partialorder %v18590_v35, %v18590_v35 }
 0x938   :  { %vm18605_vm8 = vcmp.eq.f32.partialorder %v18588_v56, %v18588_v56  ;;  %v18618_v23 = vsel %vm18606_vm7, %v18590_v35, 0.0  ;;  %v18755_v10 = vsel %vm18606_vm7, 1.0, %v23205_v60 }
 0x939   :  { %v18617_v24 = vsel %vm18605_vm8, %v18588_v56, 0.0  ;;  %v18754_v46 = vsel %vm18605_vm8, 1.0, %v23205_v60  ;;  %v18636_v14 = vsel %vm140_vm0, %v18618_v23, 0.0  ;;  %v18692_v5 = vsel %vm140_vm0, %v18755_v10, 0.0 }
 0x93a   :  { %v18634_v37 = vsel %vm140_vm0, %v18617_v24, 0.0  ;;  %v18690_v30 = vsel %vm140_vm0, %v18754_v46, 0.0 }
 0x93b   :  { %v18635_v13 = vadd.f32 %v18634_v37, %v18633_v6  ;;  %v18691_v58 = vadd.f32 %v18690_v30, %v18689_v22 }
 0x93d   :  { %v18637_v33 = vadd.f32 %v18636_v14, %v18635_v13  ;;  %v18693_v8 = vadd.f32 %v18692_v5, %v18691_v58 }
 0x958   :  { %v21633_v4 = vpop.f32.mrb[56].mxu1 }
 0x959   :  { %v18452_v45 = vsub.f32 %v21633_v4, %v26715_v39  ;;  %v17871_v19 = vpop.f32.mrb[57].mxu1 }
 0x95a   :  { %v18451_v12 = vsub.f32 %v17871_v19, %v26716_v21 }
 0x95b   :  { %v18488_v57 = vmul.f32 2.0, %v18452_v45 }
 0x95c   :  { %v18487_v29 = vmul.f32 2.0, %v18451_v12 }
 0x95d   :  { %v18500_v52 = vadd.f32 0.0009, %v18488_v57 }
 0x95e   :  { %v18499_v62 = vadd.f32 0.0009, %v18487_v29 }
 0x95f   :  { %v18512_v20 = vmul.f32 %v18500_v52, %v18476_v11 }
 0x960   :  { %v18511_v34 = vmul.f32 %v18499_v62, %v18475_v47 }
 0x961   :  { %v18594_v16 = vmul.f32 %v23050_v17, %v18512_v20 }
 0x962   :  { %v18592_v0 = vmul.f32 %v23052_v50, %v18511_v34 }
 0x963   :  { %vm18608_vm9 = vcmp.eq.f32.partialorder %v18594_v16, %v18594_v16 }
 0x964   :  { %vm18607_vm10 = vcmp.eq.f32.partialorder %v18592_v0, %v18592_v0  ;;  %v18620_v28 = vsel %vm18608_vm9, %v18594_v16, 0.0  ;;  %v18757_v49 = vsel %vm18608_vm9, 1.0, %v23205_v60 }
 0x965   :  { %v18619_v44 = vsel %vm18607_vm10, %v18592_v0, 0.0  ;;  %v18756_v7 = vsel %vm18607_vm10, 1.0, %v23205_v60  ;;  %v18640_v22 = vsel %vm140_vm0, %v18620_v28, 0.0  ;;  %v18696_v55 = vsel %vm140_vm0, %v18757_v49, 0.0 }
 0x966   :  { %v18638_v53 = vsel %vm140_vm0, %v18619_v44, 0.0  ;;  %v18694_v61 = vsel %vm140_vm0, %v18756_v7, 0.0 }
 0x967   :  { %v18639_v40 = vadd.f32 %v18638_v53, %v18637_v33  ;;  %v18695_v6 = vadd.f32 %v18694_v61, %v18693_v8 }
 0x969   :  { %v18641_v3 = vadd.f32 %v18640_v22, %v18639_v40  ;;  %v18697_v15 = vadd.f32 %v18696_v55, %v18695_v6 }
 0x984   :  { %v21675_v1 = vpop.f32.mrb[58].mxu1 }
 0x985   :  { %v18454_v42 = vsub.f32 %v21675_v1, %v26717_v36  ;;  %v18373_v31 = vpop.f32.mrb[59].mxu1 }
 0x986   :  { %v18453_v9 = vsub.f32 %v18373_v31, %v26718_v48 }
 0x987   :  { %v18490_v18 = vmul.f32 2.0, %v18454_v42 }
 0x988   :  { %v18489_v25 = vmul.f32 2.0, %v18453_v9 }
 0x989   :  { %v18502_v41 = vadd.f32 0.0009, %v18490_v18 }
 0x98a   :  { %v18501_v2 = vadd.f32 0.0009, %v18489_v25 }
 0x98b   :  { %v18514_v38 = vmul.f32 %v18502_v41, %v18478_v63 }
 0x98c   :  { %v18513_v35 = vmul.f32 %v18501_v2, %v18477_v32 }
 0x98d   :  { %v18598_v56 = vmul.f32 %v23054_v51, %v18514_v38 }
 0x98e   :  { %v18596_v23 = vmul.f32 %v23056_v26, %v18513_v35 }
 0x98f   :  { %vm18610_vm11 = vcmp.eq.f32.partialorder %v18598_v56, %v18598_v56 }
 0x990   :  { %vm18609_vm12 = vcmp.eq.f32.partialorder %v18596_v23, %v18596_v23  ;;  %v18622_v24 = vsel %vm18610_vm11, %v18598_v56, 0.0  ;;  %v18759_v37 = vsel %vm18610_vm11, 1.0, %v23205_v60 }
 0x991   :  { %v18621_v10 = vsel %vm18609_vm12, %v18596_v23, 0.0  ;;  %v18758_v46 = vsel %vm18609_vm12, 1.0, %v23205_v60  ;;  %v18644_v5 = vsel %vm140_vm0, %v18622_v24, 0.0  ;;  %v18700_v33 = vsel %vm140_vm0, %v18759_v37, 0.0 }
 0x992   :  { %v18642_v30 = vsel %vm140_vm0, %v18621_v10, 0.0  ;;  %v18698_v13 = vsel %vm140_vm0, %v18758_v46, 0.0 }
 0x993   :  { %v18643_v58 = vadd.f32 %v18642_v30, %v18641_v3  ;;  %v18699_v14 = vadd.f32 %v18698_v13, %v18697_v15 }
 0x995   :  { %v18645_v8 = vadd.f32 %v18644_v5, %v18643_v58  ;;  %v18701_v4 = vadd.f32 %v18700_v33, %v18699_v14 }
 0x997   :  { %18646 = vadd.xlane.f32.xlu0 %v18645_v8 }
 0x99b   :  { %18702 = vadd.xlane.f32.xlu0 %v18701_v4 }
 0xa24   :  { %v18647_v39 = vpop.xlane.xlu0 %18646 }
 0xa25   :  { %v18648_v27 = vrot.slane %v18647_v39, 4 }
 0xa27   :  { %v18649_v45 = vadd.f32 %v18648_v27, %v18647_v39 }
 0xa28   :  { %v18703_v19 = vpop.xlane.xlu0 %18702 }
 0xa29   :  { %v18650_v21 = vrot.slane %v18649_v45, 2  ;;  %v18704_v60 = vrot.slane %v18703_v19, 4 }
 0xa2b   :  { %v18705_v43 = vadd.f32 %v18704_v60, %v18703_v19  ;;  %v18651_v12 = vadd.f32 %v18650_v21, %v18649_v45 }
 0xa2d   :  { %v18706_v57 = vrot.slane %v18705_v43, 2  ;;  %v18652_v29 = vrot.slane %v18651_v12, 1 }
 0xa2f   :  { %v18707_v11 = vadd.f32 %v18706_v57, %v18705_v43  ;;  %v18653_v52 = vadd.f32 %v18652_v29, %v18651_v12 }
 0xa31   :  { %23020 = vpush %v18653_v52  ;;  %v18708_v47 = vrot.slane %v18707_v11, 1 }
 0xa33   :  { %v18709_v62 = vadd.f32 %v18708_v47, %v18707_v11 }
 0xa35   :  { %23022 = vpush %v18709_v62 }
 0xa62   :  { %s23021_s6 = spop %23020 }
 0xa63   :  { %v18711_v20 = vstv %s23021_s6 }
 0xa64   :  { %18713 = vst [vmem:[#allocation10] sm:$0xff] %v18711_v20 }
 0xa65   :  { %23156 = shalt.err (!%p23153_p8)
}
 0xa66   :  { %s23157_s22 = scalar_lea.hbm %s25843_s4, 128 }
 0xa67   :  { %p23158_p9 = scmp.ne.s32.totalorder %s25843_s4, %s23157_s22  ;;  %p23161_p10 = scmp.lt.u32.totalorder %s23157_s22, %s25843_s4 }
 0xa69   :  { %p23163_p11 = pnand %p23161_p10, %p23158_p9 }
 0xa6b   :  { %23166 = shalt.err (!%p23163_p11)
}
 0xa6c   :  { %18726 = dma.vmem_to_hbm [thread:$0]  %s18724_s30, 128, %s25843_s4, [#allocation4]  }
 0xa6d   :  { %s23023_s29 = spop %23022  ;;  %s23167_s0 = scalar_lea.vmem %s18734_s17, 128 }
 0xa6e   :  { %v18714_v17 = vstv %s23023_s29  ;;  %p23168_p12 = scmp.ne.s32.totalorder %s18734_s17, %s23167_s0  ;;  %p23172_p13 = scmp.lt.s32.totalorder %s18734_s17, %s18734_s17 }
 0xa6f   :  { %18716 = vst [vmem:[#allocation11] sm:$0xff] %v18714_v17  ;;  %p23173_p0 = scmp.lt.s32.totalorder %s23167_s0, %s23167_s0 }
 0xa71   :  { %p23174_p1 = por %p23173_p0, %p23172_p13 }
 0xa73   :  { %p23175_p2 = pnand %p23174_p1, %p23168_p12 }
 0xa75   :  { %23178 = shalt.err (!%p23175_p2)
}
 0xa76   :  { %s23179_s8 = scalar_lea.hbm %s25844_s5, 128 }
 0xa77   :  { %p23180_p3 = scmp.ne.s32.totalorder %s25844_s5, %s23179_s8  ;;  %p23183_p4 = scmp.lt.u32.totalorder %s23179_s8, %s25844_s5 }
 0xa79   :  { %p23185_p5 = pnand %p23183_p4, %p23180_p3 }
 0xa7b   :  { %23188 = shalt.err (!%p23185_p5)
}
 0xa7c   :  { %18736 = dma.vmem_to_hbm [thread:$0]  %s18734_s17, 128, %s25844_s5, [#allocation12]  }
 0xa7d   :  { %23195 = dma.done.wait [#allocation4], 128  }
 0xa7e   :  { %23196 = vsyncadd [#allocation4], 4294967168 }
 0xa7f   :  { %23197 = dma.done.wait [#allocation12], 128  }
 0xa80   :  { %23198 = vsyncadd [#allocation12], 4294967168 }
 0xa81   :  { %18743 = vsyncpa [#allocation3], 1 }
 0xa82   :  { %18744 = vsyncpa [#allocation6], 1 }
 0xa83   :  { %18745 = vsyncpa [#allocation9], 1 }
 0xa84   :  { %18746 = vsyncpa [#allocation4], 1 }
 0xa85   :  { %18747 = vsyncpa [#allocation12], 1 }

</bundles_post_ra>
